<compile_context>
chip_gen: v6e
topology: v6e:2x2x1
jax: 0.10.0
libtpu: 0.0.40
codegen_flags: <defaults>
</compile_context>

<pallas_src>
import functools

import numpy as np
import jax
import jax.numpy as jnp
from jax import lax
from jax.experimental import pallas as pl
from jax.experimental.pallas import tpu as pltpu  # noqa: F401  (TPU backend assumed)

NUM_CLASSES = 10
NUM_TARGETS = 2

SELU_ALPHA = 1.6732632423543772
SELU_SCALE = 1.0507009873554805
BN_EPS = 1e-5

# Static geometry implied by fc1 = Linear(4*4*16, 100): input images are 14x14.
IMG = 14
C1, K1, P1 = 8, 3, 2       # conv1: 1 -> 8,  k3, pad2 -> 16x16 -> pool -> 8x8
C2, K2, P2 = 16, 5, 2      # conv2: 8 -> 16, k5, pad2 ->  8x8  -> pool -> 4x4
POOL = 2
H1 = IMG + 2 * P1 - K1 + 1          # 16 (conv1 output spatial)
S1 = H1 // POOL                     # 8  (pooled spatial after cnn1)
H2 = S1 + 2 * P2 - K2 + 1           # 8  (conv2 output spatial)
S2 = H2 // POOL                     # 4  (pooled spatial after cnn2)
L1 = S1 * S1 * C1                   # 512 pooled lanes after cnn1 (h, w, c)
L2 = S2 * S2 * C2                   # 256 pooled lanes after cnn2 (h, w, c)


def _selu(x):
    # exp() only of min(x, 0): avoids inf in the untaken branch.
    return SELU_SCALE * jnp.where(
        x > 0, x, SELU_ALPHA * (jnp.exp(jnp.minimum(x, 0.0)) - 1.0))


def _lane_to_channel(lanes, channels):
    """(lanes, channels) one-hot: 1 where lane % channels == channel.

    channels is a power of two (8 / 16), so modulo is a bitwise AND.
    """
    l = lax.broadcasted_iota(jnp.int32, (lanes, channels), 0)
    c = lax.broadcasted_iota(jnp.int32, (lanes, channels), 1)
    return ((l & (channels - 1)) == c).astype(jnp.float32)


def _channel_to_lane(channels, lanes):
    """Transposed layout of _lane_to_channel, generated directly from iota."""
    c = lax.broadcasted_iota(jnp.int32, (channels, lanes), 0)
    l = lax.broadcasted_iota(jnp.int32, (channels, lanes), 1)
    return ((l & (channels - 1)) == c).astype(jnp.float32)


# --------------------------------------------------------------------------
# The fused Pallas kernel
# --------------------------------------------------------------------------
def _siamese_kernel(x_ref, w1_ref, w2_ref, wf1_ref, wf2_ref, w3a_ref, w3b_ref,
                    b1_ref, g1_ref, be1_ref, b2_ref, g2_ref, be2_ref,
                    bf1_ref, bf2_ref, bf3_ref,
                    logits_ref, pred_ref):
    """Whole forward pass, both siamese branches, one invocation.

    Rows of every activation are the 2*B samples (rows [0, B) = branch 0,
    rows [B, 2B) = branch 1); lanes are features.  Both convolutions are single
    MXU matmuls against Toeplitz-expanded weights whose columns are ordered
    (pool-window, pooled-position, channel), so 2x2 max-pooling is an
    elementwise max over four contiguous, 128-aligned lane blocks.
    """
    f32 = jnp.float32
    n_rows = x_ref.shape[0]            # 2 * B
    batch = n_rows // 2

    def mm(a, b):
        return jnp.dot(a, b, preferred_element_type=f32)

    def pool4(z):
        blk = z.shape[1] // 4
        return jnp.maximum(jnp.maximum(z[:, 0:blk], z[:, blk:2 * blk]),
                           jnp.maximum(z[:, 2 * blk:3 * blk], z[:, 3 * blk:]))

    # Branch <-> row one-hot maps, generated from iota (no extra inputs/DMAs).
    b_i = lax.broadcasted_iota(jnp.int32, (2, n_rows), 0)
    r_i = lax.broadcasted_iota(jnp.int32, (2, n_rows), 1)
    brow = ((r_i >= b_i * batch) &
            (r_i < (b_i + 1) * batch)).astype(f32)            # (2, 2B)
    r_j = lax.broadcasted_iota(jnp.int32, (n_rows, 2), 0)
    b_j = lax.broadcasted_iota(jnp.int32, (n_rows, 2), 1)
    browt = ((r_j >= b_j * batch) &
             (r_j < (b_j + 1) * batch)).astype(f32)           # (2B, 2)

    def branch_batchnorm(y, count, csum, cexp, gamma, beta):
        # Training-mode BatchNorm2d: per-branch, per-channel batch statistics,
        # biased variance.  One pass of sum / sum-of-squares (no duplicated
        # (y - mean) sweeps); row reduction via the branch one-hot matmul, lane
        # reduction via the lane->channel one-hot matmul.
        inv_n = 1.0 / float(count)
        mean = mm(mm(brow, y), csum) * inv_n                  # (2, C)  E[x]
        ex2 = mm(mm(brow, y * y), csum) * inv_n               # (2, C)  E[x^2]
        var = ex2 - mean * mean
        inv = lax.rsqrt(var + BN_EPS)
        scale = inv * gamma                                   # (2, C)
        shift = beta - mean * scale                           # (2, C)
        scale_rows = mm(browt, mm(scale, cexp))               # (2B, lanes)
        shift_rows = mm(browt, mm(shift, cexp))
        return y * scale_rows + shift_rows

    # ---- cnn1: conv(1->8, k3, pad2) + SELU + 2x2 max-pool + bn1 -------------
    # bias-add and SELU commute with the window max (same per-channel bias in
    # all four window positions; SELU is monotone), so both run on the pooled
    # (4x smaller) tensor.
    csum1 = _lane_to_channel(L1, C1)
    cexp1 = _channel_to_lane(C1, L1)
    z1 = mm(x_ref[...], w1_ref[...])                          # (2B, 4*L1)
    a1 = _selu(pool4(z1) + mm(b1_ref[...], cexp1))            # (2B, L1)
    a1 = branch_batchnorm(a1, S1 * S1 * batch, csum1, cexp1,
                          g1_ref[...], be1_ref[...])

    # ---- cnn2: conv(8->16, k5, pad2) + SELU + 2x2 max-pool + bn2 ------------
    csum2 = _lane_to_channel(L2, C2)
    cexp2 = _channel_to_lane(C2, L2)
    z2 = mm(a1, w2_ref[...])                                  # (2B, 4*L2)
    a2 = _selu(pool4(z2) + mm(b2_ref[...], cexp2))            # (2B, L2)
    a2 = branch_batchnorm(a2, S2 * S2 * batch, csum2, cexp2,
                          g2_ref[...], be2_ref[...])

    # ---- fc1 -> fc2 (shared weights; both branches in one matmul) -----------
    h = mm(a2, wf1_ref[...]) + bf1_ref[...]                   # (2B, 100)
    h = mm(h, wf2_ref[...]) + bf2_ref[...]                    # (2B, NUM_CLASSES)

    # ---- fc3 on hstack(out1, out2): two half-matmuls, no concatenate --------
    i_k = lax.broadcasted_iota(jnp.int32, (batch, n_rows), 0)
    r_k = lax.broadcasted_iota(jnp.int32, (batch, n_rows), 1)
    sel0 = (r_k == i_k).astype(f32)                           # branch-0 rows
    sel1 = (r_k == i_k + batch).astype(f32)                   # branch-1 rows
    logits = (mm(mm(sel0, h), w3a_ref[...]) +
              mm(mm(sel1, h), w3b_ref[...]) + bf3_ref[...])   # (B, NUM_TARGETS)
    logits_ref[...] = logits

    # ---- argmax over targets (first maximal index, like torch.argmax) -------
    col = lax.broadcasted_iota(jnp.int32, logits.shape, 1)
    maxv = jnp.max(logits, axis=1, keepdims=True)
    pred_ref[...] = jnp.min(
        jnp.where(logits == maxv, col, jnp.int32(logits.shape[1])),
        axis=1, keepdims=True)


# --------------------------------------------------------------------------
# One-time weight-side layout work (review: push permutations onto weights)
# --------------------------------------------------------------------------
@functools.lru_cache(maxsize=None)
def _conv_toeplitz_index(in_hw, c_in, c_out, k, pad, pool):
    """Gather indices that expand a stride-1 conv (+2x2-pool column order) into
    a Toeplitz matrix.

    Returns int32 [in_hw*in_hw*c_in, pool*pool*(out_hw/pool)^2*c_out]; each
    entry indexes conv_weight.reshape(-1) (OIHW order), or the trailing "zero
    slot" for taps that fall into the zero padding.  Output columns are ordered
    (pool-window di,dj, pooled row, pooled col, out-channel) so the consumer
    can max-pool with an elementwise max of four contiguous lane blocks.
    """
    out_hw = in_hw + 2 * pad - k + 1
    pn = out_hw // pool
    zero_slot = c_out * c_in * k * k
    idx = np.full((in_hw * in_hw * c_in, pool * pool * pn * pn * c_out),
                  zero_slot, dtype=np.int32)
    for di in range(pool):
        for dj in range(pool):
            for ph in range(pn):
                for pw in range(pn):
                    ho, wo = pool * ph + di, pool * pw + dj
                    for co in range(c_out):
                        col = (((di * pool + dj) * pn + ph) * pn + pw) * c_out + co
                        for kh in range(k):
                            hi = ho + kh - pad
                            if hi < 0 or hi >= in_hw:
                                continue
                            for kw in range(k):
                                wi = wo + kw - pad
                                if wi < 0 or wi >= in_hw:
                                    continue
                                for ci in range(c_in):
                                    row = (hi * in_hw + wi) * c_in + ci
                                    idx[row, col] = ((co * c_in + ci) * k + kh) * k + kw
    return idx


def prepare_params(params):
    """Expand conv weights to window-major Toeplitz matrices, permute fc1 rows
    to the kernel's (h, w, c) lane order, split fc3 into its hstack halves."""
    f32 = jnp.float32
    idx1 = _conv_toeplitz_index(IMG, 1, C1, K1, P1, POOL)      # (196, 4*L1)
    idx2 = _conv_toeplitz_index(S1, C1, C2, K2, P2, POOL)      # (L1, 4*L2)

    w1_ext = jnp.concatenate(
        [params["conv1_w"].astype(f32).reshape(-1), jnp.zeros((1,), f32)])
    w2_ext = jnp.concatenate(
        [params["conv2_w"].astype(f32).reshape(-1), jnp.zeros((1,), f32)])

    # fc1 rows reordered from torch's NCHW flatten (c, h, w) to (h, w, c).
    wf1 = params["fc1_w"].reshape(100, C2, S2, S2).transpose(0, 2, 3, 1)
    wf1 = wf1.reshape(100, S2 * S2 * C2).T                     # (256, 100)

    return dict(
        W1=w1_ext[idx1],                                       # (196, 2048)
        W2=w2_ext[idx2],                                       # (512, 1024)
        wf1=wf1,
        wf2=params["fc2_w"].T,                                 # (100, 10)
        w3a=params["fc3_w"][:, :NUM_CLASSES].T,                # (10, 2)
        w3b=params["fc3_w"][:, NUM_CLASSES:].T,                # (10, 2)
        b1=params["conv1_b"][None, :], g1=params["bn1_g"][None, :],
        be1=params["bn1_b"][None, :],
        b2=params["conv2_b"][None, :], g2=params["bn2_g"][None, :],
        be2=params["bn2_b"][None, :],
        bf1=params["fc1_b"][None, :], bf2=params["fc2_b"][None, :],
        bf3=params["fc3_b"][None, :],
    )


# --------------------------------------------------------------------------
# Parameters (deterministic synthetic init, PyTorch-convention shapes)
# --------------------------------------------------------------------------
def init_params(key):
    ks = jax.random.split(key, 10)

    def rnd(k, shape, fan_in):
        return jax.random.normal(k, shape, jnp.float32) / jnp.sqrt(float(fan_in))

    return dict(
        conv1_w=rnd(ks[0], (C1, 1, K1, K1), 9),
        conv1_b=rnd(ks[1], (C1,), 9),
        conv2_w=rnd(ks[2], (C2, C1, K2, K2), C1 * K2 * K2),
        conv2_b=rnd(ks[3], (C2,), C1 * K2 * K2),
        fc1_w=rnd(ks[4], (100, S2 * S2 * C2), 256),
        fc1_b=rnd(ks[5], (100,), 256),
        fc2_w=rnd(ks[6], (NUM_CLASSES, 100), 100),
        fc2_b=rnd(ks[7], (NUM_CLASSES,), 100),
        fc3_w=rnd(ks[8], (NUM_TARGETS, 2 * NUM_CLASSES), 20),
        fc3_b=rnd(ks[9], (NUM_TARGETS,), 20),
        bn1_g=jnp.ones((C1,), jnp.float32), bn1_b=jnp.zeros((C1,), jnp.float32),
        bn2_g=jnp.ones((C2,), jnp.float32), bn2_b=jnp.zeros((C2,), jnp.float32),
    )


# --------------------------------------------------------------------------
# Forward pass
# --------------------------------------------------------------------------
@jax.jit
def forward(prep, x):
    """x: (B, 2, 14, 14) float32.  Returns (predicted (B,) int32, out (B, 2))."""
    b = x.shape[0]
    # Branch-major sample rows (rows [0,B) = branch 0, [B,2B) = branch 1); this
    # transpose+reshape of the tiny raw input is the only activation-side glue.
    xr = jnp.transpose(x, (1, 0, 2, 3)).reshape(2 * b, IMG * IMG)

    logits, pred = pl.pallas_call(
        _siamese_kernel,
        out_shape=(jax.ShapeDtypeStruct((b, NUM_TARGETS), jnp.float32),
                   jax.ShapeDtypeStruct((b, 1), jnp.int32)),
    )(xr, prep["W1"], prep["W2"], prep["wf1"], prep["wf2"],
      prep["w3a"], prep["w3b"],
      prep["b1"], prep["g1"], prep["be1"],
      prep["b2"], prep["g2"], prep["be2"],
      prep["bf1"], prep["bf2"], prep["bf3"])
    # NOTE: torch.argmax returns int64; int32 indices here.
    return pred[:, 0], logits


if __name__ == "__main__":
    key = jax.random.PRNGKey(0)
    k_x, k_p = jax.random.split(key)
    B = 2
    # fc1 expects 4*4*16 features => input spatial size must be 14x14.
    x = jax.random.normal(k_x, (B, 2, IMG, IMG), dtype=jnp.float32)
    params = init_params(k_p)
    prep = prepare_params(params)        # one-time weight-side layout work

    predicted, out = forward(prep, x)
    jax.block_until_ready((predicted, out))

    assert out.shape == (B, NUM_TARGETS) and out.dtype == jnp.float32
    assert predicted.shape == (B,)
    assert bool(jnp.all((predicted >= 0) & (predicted < NUM_TARGETS)))
    print("KERNEL_OK")
</pallas_src>

<mosaic_0001>
module attributes {stable_mosaic.version = 11 : i64} {
  func.func @_siamese_kernel(%arg0: memref<4x196xf32, #tpu.memory_space<vmem>>, %arg1: memref<196x2048xf32, #tpu.memory_space<vmem>>, %arg2: memref<512x1024xf32, #tpu.memory_space<vmem>>, %arg3: memref<256x100xf32, #tpu.memory_space<vmem>>, %arg4: memref<100x10xf32, #tpu.memory_space<vmem>>, %arg5: memref<10x2xf32, #tpu.memory_space<vmem>>, %arg6: memref<10x2xf32, #tpu.memory_space<vmem>>, %arg7: memref<1x8xf32, #tpu.memory_space<vmem>>, %arg8: memref<1x8xf32, #tpu.memory_space<vmem>>, %arg9: memref<1x8xf32, #tpu.memory_space<vmem>>, %arg10: memref<1x16xf32, #tpu.memory_space<vmem>>, %arg11: memref<1x16xf32, #tpu.memory_space<vmem>>, %arg12: memref<1x16xf32, #tpu.memory_space<vmem>>, %arg13: memref<1x100xf32, #tpu.memory_space<vmem>>, %arg14: memref<1x10xf32, #tpu.memory_space<vmem>>, %arg15: memref<1x2xf32, #tpu.memory_space<vmem>>, %arg16: memref<2x2xf32, #tpu.memory_space<vmem>>, %arg17: memref<2x1xi32, #tpu.memory_space<vmem>>) attributes {dimension_semantics = [], scalar_prefetch = 0 : i64, scratch_operands = 0 : i64, tpu.core_type = #tpu.core_type<tc>} {
    %0 = tpu.iota {dimensions = array<i32: 0>} : vector<2x4xi32>
    %1 = tpu.iota {dimensions = array<i32: 1>} : vector<2x4xi32>
    %c2_i32 = arith.constant 2 : i32
    %2 = vector.broadcast %c2_i32 : i32 to vector<2x4xi32>
    %3 = arith.muli %0, %2 : vector<2x4xi32>
    %4 = arith.cmpi sge, %1, %3 : vector<2x4xi32>
    %c1_i32 = arith.constant 1 : i32
    %5 = vector.broadcast %c1_i32 : i32 to vector<2x4xi32>
    %6 = arith.addi %0, %5 : vector<2x4xi32>
    %c2_i32_0 = arith.constant 2 : i32
    %7 = vector.broadcast %c2_i32_0 : i32 to vector<2x4xi32>
    %8 = arith.muli %6, %7 : vector<2x4xi32>
    %9 = arith.cmpi slt, %1, %8 : vector<2x4xi32>
    %10 = arith.andi %4, %9 : vector<2x4xi1>
    %11 = arith.extui %10 : vector<2x4xi1> to vector<2x4xi32>
    %12 = arith.sitofp %11 : vector<2x4xi32> to vector<2x4xf32>
    %13 = tpu.iota {dimensions = array<i32: 0>} : vector<4x2xi32>
    %14 = tpu.iota {dimensions = array<i32: 1>} : vector<4x2xi32>
    %c2_i32_1 = arith.constant 2 : i32
    %15 = vector.broadcast %c2_i32_1 : i32 to vector<4x2xi32>
    %16 = arith.muli %14, %15 : vector<4x2xi32>
    %17 = arith.cmpi sge, %13, %16 : vector<4x2xi32>
    %c1_i32_2 = arith.constant 1 : i32
    %18 = vector.broadcast %c1_i32_2 : i32 to vector<4x2xi32>
    %19 = arith.addi %14, %18 : vector<4x2xi32>
    %c2_i32_3 = arith.constant 2 : i32
    %20 = vector.broadcast %c2_i32_3 : i32 to vector<4x2xi32>
    %21 = arith.muli %19, %20 : vector<4x2xi32>
    %22 = arith.cmpi slt, %13, %21 : vector<4x2xi32>
    %23 = arith.andi %17, %22 : vector<4x2xi1>
    %24 = arith.extui %23 : vector<4x2xi1> to vector<4x2xi32>
    %25 = arith.sitofp %24 : vector<4x2xi32> to vector<4x2xf32>
    %26 = tpu.iota {dimensions = array<i32: 0>} : vector<512x8xi32>
    %27 = tpu.iota {dimensions = array<i32: 1>} : vector<512x8xi32>
    %c7_i32 = arith.constant 7 : i32
    %28 = vector.broadcast %c7_i32 : i32 to vector<512x8xi32>
    %29 = arith.andi %26, %28 : vector<512x8xi32>
    %30 = arith.cmpi eq, %29, %27 : vector<512x8xi32>
    %31 = arith.extui %30 : vector<512x8xi1> to vector<512x8xi32>
    %32 = arith.sitofp %31 : vector<512x8xi32> to vector<512x8xf32>
    %33 = tpu.iota {dimensions = array<i32: 0>} : vector<8x512xi32>
    %34 = tpu.iota {dimensions = array<i32: 1>} : vector<8x512xi32>
    %c7_i32_4 = arith.constant 7 : i32
    %35 = vector.broadcast %c7_i32_4 : i32 to vector<8x512xi32>
    %36 = arith.andi %34, %35 : vector<8x512xi32>
    %37 = arith.cmpi eq, %36, %33 : vector<8x512xi32>
    %38 = arith.extui %37 : vector<8x512xi1> to vector<8x512xi32>
    %39 = arith.sitofp %38 : vector<8x512xi32> to vector<8x512xf32>
    %c0 = arith.constant 0 : index
    %c0_5 = arith.constant 0 : index
    %40 = vector.load %arg0[%c0, %c0_5] : memref<4x196xf32, #tpu.memory_space<vmem>>, vector<4x196xf32>
    %c0_6 = arith.constant 0 : index
    %c0_7 = arith.constant 0 : index
    %41 = vector.load %arg1[%c0_6, %c0_7] : memref<196x2048xf32, #tpu.memory_space<vmem>>, vector<196x2048xf32>
    %cst = arith.constant dense<0.000000e+00> : vector<4x2048xf32>
    %42 = tpu.matmul %40, %41, %cst {dimension_numbers = #tpu.dot_dimension_numbers<[1], [0], [0], [1], [0, 0, 1, 1], [], []>} : vector<4x196xf32>, vector<196x2048xf32>, vector<4x2048xf32> -> vector<4x2048xf32>
    %43 = vector.extract_strided_slice %42 {offsets = [0, 0], sizes = [4, 512], strides = [1, 1]} : vector<4x2048xf32> to vector<4x512xf32>
    %44 = vector.extract_strided_slice %42 {offsets = [0, 512], sizes = [4, 512], strides = [1, 1]} : vector<4x2048xf32> to vector<4x512xf32>
    %45 = arith.maximumf %43, %44 : vector<4x512xf32>
    %46 = vector.extract_strided_slice %42 {offsets = [0, 1024], sizes = [4, 512], strides = [1, 1]} : vector<4x2048xf32> to vector<4x512xf32>
    %47 = vector.extract_strided_slice %42 {offsets = [0, 1536], sizes = [4, 512], strides = [1, 1]} : vector<4x2048xf32> to vector<4x512xf32>
    %48 = arith.maximumf %46, %47 : vector<4x512xf32>
    %49 = arith.maximumf %45, %48 : vector<4x512xf32>
    %c0_8 = arith.constant 0 : index
    %c0_9 = arith.constant 0 : index
    %50 = vector.load %arg7[%c0_8, %c0_9] : memref<1x8xf32, #tpu.memory_space<vmem>>, vector<1x8xf32>
    %cst_10 = arith.constant dense<0.000000e+00> : vector<1x512xf32>
    %51 = tpu.matmul %50, %39, %cst_10 {dimension_numbers = #tpu.dot_dimension_numbers<[1], [0], [0], [1], [0, 0, 1, 1], [], []>} : vector<1x8xf32>, vector<8x512xf32>, vector<1x512xf32> -> vector<1x512xf32>
    %52 = vector.broadcast %51 : vector<1x512xf32> to vector<4x512xf32>
    %53 = arith.addf %49, %52 : vector<4x512xf32>
    %cst_11 = arith.constant 0.000000e+00 : f32
    %54 = vector.broadcast %cst_11 : f32 to vector<4x512xf32>
    %55 = arith.cmpf ogt, %53, %54 : vector<4x512xf32>
    %cst_12 = arith.constant 0.000000e+00 : f32
    %56 = vector.broadcast %cst_12 : f32 to vector<4x512xf32>
    %57 = arith.minimumf %53, %56 : vector<4x512xf32>
    %58 = math.exp %57 : vector<4x512xf32>
    %cst_13 = arith.constant 1.000000e+00 : f32
    %59 = vector.broadcast %cst_13 : f32 to vector<4x512xf32>
    %60 = arith.subf %58, %59 : vector<4x512xf32>
    %cst_14 = arith.constant 1.67326319 : f32
    %61 = vector.broadcast %cst_14 : f32 to vector<4x512xf32>
    %62 = arith.mulf %61, %60 : vector<4x512xf32>
    %63 = arith.select %55, %53, %62 : vector<4x512xi1>, vector<4x512xf32>
    %cst_15 = arith.constant 1.05070102 : f32
    %64 = vector.broadcast %cst_15 : f32 to vector<4x512xf32>
    %65 = arith.mulf %64, %63 : vector<4x512xf32>
    %c0_16 = arith.constant 0 : index
    %c0_17 = arith.constant 0 : index
    %66 = vector.load %arg8[%c0_16, %c0_17] : memref<1x8xf32, #tpu.memory_space<vmem>>, vector<1x8xf32>
    %c0_18 = arith.constant 0 : index
    %c0_19 = arith.constant 0 : index
    %67 = vector.load %arg9[%c0_18, %c0_19] : memref<1x8xf32, #tpu.memory_space<vmem>>, vector<1x8xf32>
    %cst_20 = arith.constant dense<0.000000e+00> : vector<2x512xf32>
    %68 = tpu.matmul %12, %65, %cst_20 {dimension_numbers = #tpu.dot_dimension_numbers<[1], [0], [0], [1], [0, 0, 1, 1], [], []>} : vector<2x4xf32>, vector<4x512xf32>, vector<2x512xf32> -> vector<2x512xf32>
    %cst_21 = arith.constant dense<0.000000e+00> : vector<2x8xf32>
    %69 = tpu.matmul %68, %32, %cst_21 {dimension_numbers = #tpu.dot_dimension_numbers<[1], [0], [0], [1], [0, 0, 1, 1], [], []>} : vector<2x512xf32>, vector<512x8xf32>, vector<2x8xf32> -> vector<2x8xf32>
    %cst_22 = arith.constant 7.812500e-03 : f32
    %70 = vector.broadcast %cst_22 : f32 to vector<2x8xf32>
    %71 = arith.mulf %69, %70 : vector<2x8xf32>
    %72 = arith.mulf %65, %65 : vector<4x512xf32>
    %cst_23 = arith.constant dense<0.000000e+00> : vector<2x512xf32>
    %73 = tpu.matmul %12, %72, %cst_23 {dimension_numbers = #tpu.dot_dimension_numbers<[1], [0], [0], [1], [0, 0, 1, 1], [], []>} : vector<2x4xf32>, vector<4x512xf32>, vector<2x512xf32> -> vector<2x512xf32>
    %cst_24 = arith.constant dense<0.000000e+00> : vector<2x8xf32>
    %74 = tpu.matmul %73, %32, %cst_24 {dimension_numbers = #tpu.dot_dimension_numbers<[1], [0], [0], [1], [0, 0, 1, 1], [], []>} : vector<2x512xf32>, vector<512x8xf32>, vector<2x8xf32> -> vector<2x8xf32>
    %cst_25 = arith.constant 7.812500e-03 : f32
    %75 = vector.broadcast %cst_25 : f32 to vector<2x8xf32>
    %76 = arith.mulf %74, %75 : vector<2x8xf32>
    %77 = arith.mulf %71, %71 : vector<2x8xf32>
    %78 = arith.subf %76, %77 : vector<2x8xf32>
    %cst_26 = arith.constant 9.99999974E-6 : f32
    %79 = vector.broadcast %cst_26 : f32 to vector<2x8xf32>
    %80 = arith.addf %78, %79 : vector<2x8xf32>
    %81 = math.rsqrt %80 : vector<2x8xf32>
    %82 = vector.broadcast %66 : vector<1x8xf32> to vector<2x8xf32>
    %83 = arith.mulf %81, %82 : vector<2x8xf32>
    %84 = arith.mulf %71, %83 : vector<2x8xf32>
    %85 = vector.broadcast %67 : vector<1x8xf32> to vector<2x8xf32>
    %86 = arith.subf %85, %84 : vector<2x8xf32>
    %cst_27 = arith.constant dense<0.000000e+00> : vector<2x512xf32>
    %87 = tpu.matmul %83, %39, %cst_27 {dimension_numbers = #tpu.dot_dimension_numbers<[1], [0], [0], [1], [0, 0, 1, 1], [], []>} : vector<2x8xf32>, vector<8x512xf32>, vector<2x512xf32> -> vector<2x512xf32>
    %cst_28 = arith.constant dense<0.000000e+00> : vector<4x512xf32>
    %88 = tpu.matmul %25, %87, %cst_28 {dimension_numbers = #tpu.dot_dimension_numbers<[1], [0], [0], [1], [0, 0, 1, 1], [], []>} : vector<4x2xf32>, vector<2x512xf32>, vector<4x512xf32> -> vector<4x512xf32>
    %cst_29 = arith.constant dense<0.000000e+00> : vector<2x512xf32>
    %89 = tpu.matmul %86, %39, %cst_29 {dimension_numbers = #tpu.dot_dimension_numbers<[1], [0], [0], [1], [0, 0, 1, 1], [], []>} : vector<2x8xf32>, vector<8x512xf32>, vector<2x512xf32> -> vector<2x512xf32>
    %cst_30 = arith.constant dense<0.000000e+00> : vector<4x512xf32>
    %90 = tpu.matmul %25, %89, %cst_30 {dimension_numbers = #tpu.dot_dimension_numbers<[1], [0], [0], [1], [0, 0, 1, 1], [], []>} : vector<4x2xf32>, vector<2x512xf32>, vector<4x512xf32> -> vector<4x512xf32>
    %91 = arith.mulf %65, %88 : vector<4x512xf32>
    %92 = arith.addf %91, %90 : vector<4x512xf32>
    %93 = tpu.iota {dimensions = array<i32: 0>} : vector<256x16xi32>
    %94 = tpu.iota {dimensions = array<i32: 1>} : vector<256x16xi32>
    %c15_i32 = arith.constant 15 : i32
    %95 = vector.broadcast %c15_i32 : i32 to vector<256x16xi32>
    %96 = arith.andi %93, %95 : vector<256x16xi32>
    %97 = arith.cmpi eq, %96, %94 : vector<256x16xi32>
    %98 = arith.extui %97 : vector<256x16xi1> to vector<256x16xi32>
    %99 = arith.sitofp %98 : vector<256x16xi32> to vector<256x16xf32>
    %100 = tpu.iota {dimensions = array<i32: 0>} : vector<16x256xi32>
    %101 = tpu.iota {dimensions = array<i32: 1>} : vector<16x256xi32>
    %c15_i32_31 = arith.constant 15 : i32
    %102 = vector.broadcast %c15_i32_31 : i32 to vector<16x256xi32>
    %103 = arith.andi %101, %102 : vector<16x256xi32>
    %104 = arith.cmpi eq, %103, %100 : vector<16x256xi32>
    %105 = arith.extui %104 : vector<16x256xi1> to vector<16x256xi32>
    %106 = arith.sitofp %105 : vector<16x256xi32> to vector<16x256xf32>
    %c0_32 = arith.constant 0 : index
    %c0_33 = arith.constant 0 : index
    %107 = vector.load %arg2[%c0_32, %c0_33] : memref<512x1024xf32, #tpu.memory_space<vmem>>, vector<512x1024xf32>
    %cst_34 = arith.constant dense<0.000000e+00> : vector<4x1024xf32>
    %108 = tpu.matmul %92, %107, %cst_34 {dimension_numbers = #tpu.dot_dimension_numbers<[1], [0], [0], [1], [0, 0, 1, 1], [], []>} : vector<4x512xf32>, vector<512x1024xf32>, vector<4x1024xf32> -> vector<4x1024xf32>
    %109 = vector.extract_strided_slice %108 {offsets = [0, 0], sizes = [4, 256], strides = [1, 1]} : vector<4x1024xf32> to vector<4x256xf32>
    %110 = vector.extract_strided_slice %108 {offsets = [0, 256], sizes = [4, 256], strides = [1, 1]} : vector<4x1024xf32> to vector<4x256xf32>
    %111 = arith.maximumf %109, %110 : vector<4x256xf32>
    %112 = vector.extract_strided_slice %108 {offsets = [0, 512], sizes = [4, 256], strides = [1, 1]} : vector<4x1024xf32> to vector<4x256xf32>
    %113 = vector.extract_strided_slice %108 {offsets = [0, 768], sizes = [4, 256], strides = [1, 1]} : vector<4x1024xf32> to vector<4x256xf32>
    %114 = arith.maximumf %112, %113 : vector<4x256xf32>
    %115 = arith.maximumf %111, %114 : vector<4x256xf32>
    %c0_35 = arith.constant 0 : index
    %c0_36 = arith.constant 0 : index
    %116 = vector.load %arg10[%c0_35, %c0_36] : memref<1x16xf32, #tpu.memory_space<vmem>>, vector<1x16xf32>
    %cst_37 = arith.constant dense<0.000000e+00> : vector<1x256xf32>
    %117 = tpu.matmul %116, %106, %cst_37 {dimension_numbers = #tpu.dot_dimension_numbers<[1], [0], [0], [1], [0, 0, 1, 1], [], []>} : vector<1x16xf32>, vector<16x256xf32>, vector<1x256xf32> -> vector<1x256xf32>
    %118 = vector.broadcast %117 : vector<1x256xf32> to vector<4x256xf32>
    %119 = arith.addf %115, %118 : vector<4x256xf32>
    %cst_38 = arith.constant 0.000000e+00 : f32
    %120 = vector.broadcast %cst_38 : f32 to vector<4x256xf32>
    %121 = arith.cmpf ogt, %119, %120 : vector<4x256xf32>
    %cst_39 = arith.constant 0.000000e+00 : f32
    %122 = vector.broadcast %cst_39 : f32 to vector<4x256xf32>
    %123 = arith.minimumf %119, %122 : vector<4x256xf32>
    %124 = math.exp %123 : vector<4x256xf32>
    %cst_40 = arith.constant 1.000000e+00 : f32
    %125 = vector.broadcast %cst_40 : f32 to vector<4x256xf32>
    %126 = arith.subf %124, %125 : vector<4x256xf32>
    %cst_41 = arith.constant 1.67326319 : f32
    %127 = vector.broadcast %cst_41 : f32 to vector<4x256xf32>
    %128 = arith.mulf %127, %126 : vector<4x256xf32>
    %129 = arith.select %121, %119, %128 : vector<4x256xi1>, vector<4x256xf32>
    %cst_42 = arith.constant 1.05070102 : f32
    %130 = vector.broadcast %cst_42 : f32 to vector<4x256xf32>
    %131 = arith.mulf %130, %129 : vector<4x256xf32>
    %c0_43 = arith.constant 0 : index
    %c0_44 = arith.constant 0 : index
    %132 = vector.load %arg11[%c0_43, %c0_44] : memref<1x16xf32, #tpu.memory_space<vmem>>, vector<1x16xf32>
    %c0_45 = arith.constant 0 : index
    %c0_46 = arith.constant 0 : index
    %133 = vector.load %arg12[%c0_45, %c0_46] : memref<1x16xf32, #tpu.memory_space<vmem>>, vector<1x16xf32>
    %cst_47 = arith.constant dense<0.000000e+00> : vector<2x256xf32>
    %134 = tpu.matmul %12, %131, %cst_47 {dimension_numbers = #tpu.dot_dimension_numbers<[1], [0], [0], [1], [0, 0, 1, 1], [], []>} : vector<2x4xf32>, vector<4x256xf32>, vector<2x256xf32> -> vector<2x256xf32>
    %cst_48 = arith.constant dense<0.000000e+00> : vector<2x16xf32>
    %135 = tpu.matmul %134, %99, %cst_48 {dimension_numbers = #tpu.dot_dimension_numbers<[1], [0], [0], [1], [0, 0, 1, 1], [], []>} : vector<2x256xf32>, vector<256x16xf32>, vector<2x16xf32> -> vector<2x16xf32>
    %cst_49 = arith.constant 3.125000e-02 : f32
    %136 = vector.broadcast %cst_49 : f32 to vector<2x16xf32>
    %137 = arith.mulf %135, %136 : vector<2x16xf32>
    %138 = arith.mulf %131, %131 : vector<4x256xf32>
    %cst_50 = arith.constant dense<0.000000e+00> : vector<2x256xf32>
    %139 = tpu.matmul %12, %138, %cst_50 {dimension_numbers = #tpu.dot_dimension_numbers<[1], [0], [0], [1], [0, 0, 1, 1], [], []>} : vector<2x4xf32>, vector<4x256xf32>, vector<2x256xf32> -> vector<2x256xf32>
    %cst_51 = arith.constant dense<0.000000e+00> : vector<2x16xf32>
    %140 = tpu.matmul %139, %99, %cst_51 {dimension_numbers = #tpu.dot_dimension_numbers<[1], [0], [0], [1], [0, 0, 1, 1], [], []>} : vector<2x256xf32>, vector<256x16xf32>, vector<2x16xf32> -> vector<2x16xf32>
    %cst_52 = arith.constant 3.125000e-02 : f32
    %141 = vector.broadcast %cst_52 : f32 to vector<2x16xf32>
    %142 = arith.mulf %140, %141 : vector<2x16xf32>
    %143 = arith.mulf %137, %137 : vector<2x16xf32>
    %144 = arith.subf %142, %143 : vector<2x16xf32>
    %cst_53 = arith.constant 9.99999974E-6 : f32
    %145 = vector.broadcast %cst_53 : f32 to vector<2x16xf32>
    %146 = arith.addf %144, %145 : vector<2x16xf32>
    %147 = math.rsqrt %146 : vector<2x16xf32>
    %148 = vector.broadcast %132 : vector<1x16xf32> to vector<2x16xf32>
    %149 = arith.mulf %147, %148 : vector<2x16xf32>
    %150 = arith.mulf %137, %149 : vector<2x16xf32>
    %151 = vector.broadcast %133 : vector<1x16xf32> to vector<2x16xf32>
    %152 = arith.subf %151, %150 : vector<2x16xf32>
    %cst_54 = arith.constant dense<0.000000e+00> : vector<2x256xf32>
    %153 = tpu.matmul %149, %106, %cst_54 {dimension_numbers = #tpu.dot_dimension_numbers<[1], [0], [0], [1], [0, 0, 1, 1], [], []>} : vector<2x16xf32>, vector<16x256xf32>, vector<2x256xf32> -> vector<2x256xf32>
    %cst_55 = arith.constant dense<0.000000e+00> : vector<4x256xf32>
    %154 = tpu.matmul %25, %153, %cst_55 {dimension_numbers = #tpu.dot_dimension_numbers<[1], [0], [0], [1], [0, 0, 1, 1], [], []>} : vector<4x2xf32>, vector<2x256xf32>, vector<4x256xf32> -> vector<4x256xf32>
    %cst_56 = arith.constant dense<0.000000e+00> : vector<2x256xf32>
    %155 = tpu.matmul %152, %106, %cst_56 {dimension_numbers = #tpu.dot_dimension_numbers<[1], [0], [0], [1], [0, 0, 1, 1], [], []>} : vector<2x16xf32>, vector<16x256xf32>, vector<2x256xf32> -> vector<2x256xf32>
    %cst_57 = arith.constant dense<0.000000e+00> : vector<4x256xf32>
    %156 = tpu.matmul %25, %155, %cst_57 {dimension_numbers = #tpu.dot_dimension_numbers<[1], [0], [0], [1], [0, 0, 1, 1], [], []>} : vector<4x2xf32>, vector<2x256xf32>, vector<4x256xf32> -> vector<4x256xf32>
    %157 = arith.mulf %131, %154 : vector<4x256xf32>
    %158 = arith.addf %157, %156 : vector<4x256xf32>
    %c0_58 = arith.constant 0 : index
    %c0_59 = arith.constant 0 : index
    %159 = vector.load %arg3[%c0_58, %c0_59] : memref<256x100xf32, #tpu.memory_space<vmem>>, vector<256x100xf32>
    %cst_60 = arith.constant dense<0.000000e+00> : vector<4x100xf32>
    %160 = tpu.matmul %158, %159, %cst_60 {dimension_numbers = #tpu.dot_dimension_numbers<[1], [0], [0], [1], [0, 0, 1, 1], [], []>} : vector<4x256xf32>, vector<256x100xf32>, vector<4x100xf32> -> vector<4x100xf32>
    %c0_61 = arith.constant 0 : index
    %c0_62 = arith.constant 0 : index
    %161 = vector.load %arg13[%c0_61, %c0_62] : memref<1x100xf32, #tpu.memory_space<vmem>>, vector<1x100xf32>
    %162 = vector.broadcast %161 : vector<1x100xf32> to vector<4x100xf32>
    %163 = arith.addf %160, %162 : vector<4x100xf32>
    %c0_63 = arith.constant 0 : index
    %c0_64 = arith.constant 0 : index
    %164 = vector.load %arg4[%c0_63, %c0_64] : memref<100x10xf32, #tpu.memory_space<vmem>>, vector<100x10xf32>
    %cst_65 = arith.constant dense<0.000000e+00> : vector<4x10xf32>
    %165 = tpu.matmul %163, %164, %cst_65 {dimension_numbers = #tpu.dot_dimension_numbers<[1], [0], [0], [1], [0, 0, 1, 1], [], []>} : vector<4x100xf32>, vector<100x10xf32>, vector<4x10xf32> -> vector<4x10xf32>
    %c0_66 = arith.constant 0 : index
    %c0_67 = arith.constant 0 : index
    %166 = vector.load %arg14[%c0_66, %c0_67] : memref<1x10xf32, #tpu.memory_space<vmem>>, vector<1x10xf32>
    %167 = vector.broadcast %166 : vector<1x10xf32> to vector<4x10xf32>
    %168 = arith.addf %165, %167 : vector<4x10xf32>
    %169 = tpu.iota {dimensions = array<i32: 0>} : vector<2x4xi32>
    %170 = tpu.iota {dimensions = array<i32: 1>} : vector<2x4xi32>
    %171 = arith.cmpi eq, %170, %169 : vector<2x4xi32>
    %172 = arith.extui %171 : vector<2x4xi1> to vector<2x4xi32>
    %173 = arith.sitofp %172 : vector<2x4xi32> to vector<2x4xf32>
    %c2_i32_68 = arith.constant 2 : i32
    %174 = vector.broadcast %c2_i32_68 : i32 to vector<2x4xi32>
    %175 = arith.addi %169, %174 : vector<2x4xi32>
    %176 = arith.cmpi eq, %170, %175 : vector<2x4xi32>
    %177 = arith.extui %176 : vector<2x4xi1> to vector<2x4xi32>
    %178 = arith.sitofp %177 : vector<2x4xi32> to vector<2x4xf32>
    %cst_69 = arith.constant dense<0.000000e+00> : vector<2x10xf32>
    %179 = tpu.matmul %173, %168, %cst_69 {dimension_numbers = #tpu.dot_dimension_numbers<[1], [0], [0], [1], [0, 0, 1, 1], [], []>} : vector<2x4xf32>, vector<4x10xf32>, vector<2x10xf32> -> vector<2x10xf32>
    %c0_70 = arith.constant 0 : index
    %c0_71 = arith.constant 0 : index
    %180 = vector.load %arg5[%c0_70, %c0_71] : memref<10x2xf32, #tpu.memory_space<vmem>>, vector<10x2xf32>
    %cst_72 = arith.constant dense<0.000000e+00> : vector<2x2xf32>
    %181 = tpu.matmul %179, %180, %cst_72 {dimension_numbers = #tpu.dot_dimension_numbers<[1], [0], [0], [1], [0, 0, 1, 1], [], []>} : vector<2x10xf32>, vector<10x2xf32>, vector<2x2xf32> -> vector<2x2xf32>
    %cst_73 = arith.constant dense<0.000000e+00> : vector<2x10xf32>
    %182 = tpu.matmul %178, %168, %cst_73 {dimension_numbers = #tpu.dot_dimension_numbers<[1], [0], [0], [1], [0, 0, 1, 1], [], []>} : vector<2x4xf32>, vector<4x10xf32>, vector<2x10xf32> -> vector<2x10xf32>
    %c0_74 = arith.constant 0 : index
    %c0_75 = arith.constant 0 : index
    %183 = vector.load %arg6[%c0_74, %c0_75] : memref<10x2xf32, #tpu.memory_space<vmem>>, vector<10x2xf32>
    %cst_76 = arith.constant dense<0.000000e+00> : vector<2x2xf32>
    %184 = tpu.matmul %182, %183, %cst_76 {dimension_numbers = #tpu.dot_dimension_numbers<[1], [0], [0], [1], [0, 0, 1, 1], [], []>} : vector<2x10xf32>, vector<10x2xf32>, vector<2x2xf32> -> vector<2x2xf32>
    %185 = arith.addf %181, %184 : vector<2x2xf32>
    %c0_77 = arith.constant 0 : index
    %c0_78 = arith.constant 0 : index
    %186 = vector.load %arg15[%c0_77, %c0_78] : memref<1x2xf32, #tpu.memory_space<vmem>>, vector<1x2xf32>
    %187 = vector.broadcast %186 : vector<1x2xf32> to vector<2x2xf32>
    %188 = arith.addf %185, %187 : vector<2x2xf32>
    %c0_79 = arith.constant 0 : index
    %c0_80 = arith.constant 0 : index
    %189 = vector.load %arg16[%c0_79, %c0_80] : memref<2x2xf32, #tpu.memory_space<vmem>>, vector<2x2xf32>
    tpu.vector_store %arg16[%c0_79, %c0_80], %188 {strides = array<i32>} : memref<2x2xf32, #tpu.memory_space<vmem>>, vector<2x2xf32>,
    %190 = tpu.iota {dimensions = array<i32: 1>} : vector<2x2xi32>
    %cst_81 = arith.constant dense<0xFF800000> : vector<2xf32>
    %191 = vector.multi_reduction <maximumf>, %188, %cst_81 [1] : vector<2x2xf32> to vector<2xf32>
    %192 = vector.shape_cast %191 : vector<2xf32> to vector<2x1xf32>
    %193 = vector.broadcast %192 : vector<2x1xf32> to vector<2x2xf32>
    %194 = arith.cmpf oeq, %188, %193 : vector<2x2xf32>
    %c2_i32_82 = arith.constant 2 : i32
    %195 = vector.broadcast %c2_i32_82 : i32 to vector<2x2xi32>
    %196 = arith.select %194, %190, %195 : vector<2x2xi1>, vector<2x2xi32>
    %cst_83 = arith.constant dense<2147483647> : vector<2xi32>
    %197 = vector.multi_reduction <minsi>, %196, %cst_83 [1] : vector<2x2xi32> to vector<2xi32>
    %198 = vector.shape_cast %197 : vector<2xi32> to vector<2x1xi32>
    %c0_84 = arith.constant 0 : index
    %c0_85 = arith.constant 0 : index
    %199 = vector.load %arg17[%c0_84, %c0_85] : memref<2x1xi32, #tpu.memory_space<vmem>>, vector<2x1xi32>
    tpu.vector_store %arg17[%c0_84, %c0_85], %198 {strides = array<i32>} : memref<2x1xi32, #tpu.memory_space<vmem>>, vector<2x1xi32>,
    return
  }
}

</mosaic_0001>

<bundles_post_ra>
// kernel: forward.1
= control target key start
LH: loop header
LB: loop body
LE: loop exit
PB: predicated region body
PF: predicated region fallthrough
CT: control target
= control target key end

     0   :  { %s8511_s0 = inlined_call_operand.vmem [shape: f32[4,196], index: 0, kind: input, shape index: {}]   ;;  %s8512_s1 = inlined_call_operand.hbm [shape: f32[196,2048], index: 1, kind: input, shape index: {}]   ;;  %s8513_s2 = inlined_call_operand.hbm [shape: f32[512,1024], index: 2, kind: input, shape index: {}]   ;;  %s8514_s3 = inlined_call_operand.vmem [shape: f32[256,100], index: 3, kind: input, shape index: {}]   ;;  %s8515_s4 = inlined_call_operand.vmem [shape: f32[100,10], index: 4, kind: input, shape index: {}]   ;;  %s8516_s5 = inlined_call_operand.vmem [shape: f32[10,2], index: 5, kind: input, shape index: {}]   ;;  %s8517_s6 = inlined_call_operand.vmem [shape: f32[10,2], index: 6, kind: input, shape index: {}]   ;;  %s8518_s7 = inlined_call_operand.hbm [shape: f32[1,8], index: 7, kind: input, shape index: {}]   ;;  %s8519_s8 = inlined_call_operand.hbm [shape: f32[1,8], index: 8, kind: input, shape index: {}]   ;;  %s8520_s9 = inlined_call_operand.hbm [shape: f32[1,8], index: 9, kind: input, shape index: {}]   ;;  %s8521_s10 = inlined_call_operand.hbm [shape: f32[1,16], index: 10, kind: input, shape index: {}]   ;;  %s8522_s11 = inlined_call_operand.hbm [shape: f32[1,16], index: 11, kind: input, shape index: {}]   ;;  %s8523_s12 = inlined_call_operand.hbm [shape: f32[1,16], index: 12, kind: input, shape index: {}]   ;;  %s8524_s13 = inlined_call_operand.hbm [shape: f32[1,100], index: 13, kind: input, shape index: {}]   ;;  %s8525_s14 = inlined_call_operand.hbm [shape: f32[1,10], index: 14, kind: input, shape index: {}]   ;;  %s8526_s15 = inlined_call_operand.hbm [shape: f32[1,2], index: 15, kind: input, shape index: {}]   ;;  %s8527_s16 = inlined_call_operand.hbm [shape: f32[2,2], index: 16, kind: output, shape index: {0}]   ;;  %s8528_s17 = inlined_call_operand.vmem [shape: s32[2,1], index: 17, kind: output, shape index: {1}]  }
   0x1   :  { %8701 = sst [smem:[#allocation81_spill]] %s8511_s0 }
   0x2   :  { %8702 = sst [smem:[#allocation82_spill]] %s8512_s1 }
   0x3   :  { %23 = vsyncpa [#allocation3], 0 }
   0x4   :  { %24 = vsyncpa [#allocation6], 0 }
   0x5   :  { %25 = vsyncpa [#allocation9], 0 }
   0x6   :  { %26 = vsyncpa [#allocation12], 0 }
   0x7   :  { %27 = vsyncpa [#allocation15], 0 }
   0x8   :  { %28 = vsyncpa [#allocation18], 0 }
   0x9   :  { %29 = vsyncpa [#allocation4], 0  ;;  %s6568_s24 = smov [#allocation5]  }
   0xa   :  { %s49_s25 = sshll.u32 %s6568_s24, 4  ;;  %s50_s25 = int_to_ptr.vmem [resolvable:$true] %s49_s25 }
   0xb   :  { %s6322_s26 = scalar_lea.vmem %s50_s25, 65536  ;;  %p6327_p1 = scmp.lt.s32.totalorder %s50_s25, %s50_s25 }
   0xc   :  { %p6323_p0 = scmp.ne.s32.totalorder %s50_s25, %s6322_s26  ;;  %p6328_p2 = scmp.lt.s32.totalorder %s6322_s26, %s6322_s26 }
   0xe   :  { %p6329_p3 = por %p6328_p2, %p6327_p1 }
  0x10   :  { %p6330_p4 = pnand %p6329_p3, %p6323_p0 }
  0x12   :  { %6333 = shalt.err (!%p6330_p4)
}
  0x13   :  { %s6569_s27 = smov 1024   ;;  %s6570_s28 = smov 64  }
  0x14   :  { %55 = dma.hbm_to_vmem [thread:$0]  %s8513_s2, 65536, %s50_s25, [#allocation6], %s6569_s27, %s6569_s27, %s6570_s28  }
  0x15   :  { %s6571_s30 = smov [#allocation8]   ;;  %s6572_s19 = smov [#allocation11]  }
  0x16   :  { %s80_s18 = sshll.u32 %s6571_s30, 4  ;;  %s100_s1 = sshll.u32 %s6572_s19, 4  ;;  %s81_s18 = int_to_ptr.vmem [resolvable:$true] %s80_s18  ;;  %s101_s1 = int_to_ptr.vmem [resolvable:$true] %s100_s1 }
  0x17   :  { %s6342_s20 = scalar_lea.vmem %s81_s18, 16  ;;  %s6346_s21 = scalar_lea.vmem %s81_s18, 32 }
  0x18   :  { %p6343_p5 = scmp.ne.s32.totalorder %s81_s18, %s6342_s20  ;;  %p6347_p6 = scmp.lt.s32.totalorder %s81_s18, %s81_s18 }
  0x19   :  { %p6348_p7 = scmp.lt.s32.totalorder %s6346_s21, %s6342_s20 }
  0x1b   :  { %p6349_p8 = por %p6348_p7, %p6347_p6 }
  0x1d   :  { %p6350_p9 = pnand %p6349_p8, %p6343_p5 }
  0x1f   :  { %6353 = shalt.err (!%p6350_p9)
}
  0x20   :  { %83 = dma.hbm_to_vmem [thread:$0]  %s8519_s8, 16, %s81_s18, [#allocation9]  }
  0x21   :  { %s6362_s24 = scalar_lea.vmem %s101_s1, 16  ;;  %s6366_s2 = scalar_lea.vmem %s101_s1, 32 }
  0x22   :  { %p6363_p10 = scmp.ne.s32.totalorder %s101_s1, %s6362_s24  ;;  %p6367_p11 = scmp.lt.s32.totalorder %s101_s1, %s101_s1 }
  0x23   :  { %p6368_p12 = scmp.lt.s32.totalorder %s6366_s2, %s6362_s24 }
  0x25   :  { %p6369_p13 = por %p6368_p12, %p6367_p11 }
  0x27   :  { %p6370_p0 = pnand %p6369_p13, %p6363_p10 }
  0x29   :  { %6373 = shalt.err (!%p6370_p0)
}
  0x2a   :  { %103 = dma.hbm_to_vmem [thread:$0]  %s8521_s10, 16, %s101_s1, [#allocation12]  }
  0x2b   :  { %s6573_s27 = smov [#allocation14]   ;;  %s6574_s29 = smov [#allocation17]  }
  0x2c   :  { %s120_s28 = sshll.u32 %s6573_s27, 4  ;;  %s140_s0 = sshll.u32 %s6574_s29, 4  ;;  %s121_s28 = int_to_ptr.vmem [resolvable:$true] %s120_s28  ;;  %s141_s0 = int_to_ptr.vmem [resolvable:$true] %s140_s0 }
  0x2d   :  { %s6382_s30 = scalar_lea.vmem %s121_s28, 16  ;;  %s6386_s8 = scalar_lea.vmem %s121_s28, 32 }
  0x2e   :  { %p6383_p1 = scmp.ne.s32.totalorder %s121_s28, %s6382_s30  ;;  %p6387_p2 = scmp.lt.s32.totalorder %s121_s28, %s121_s28 }
  0x2f   :  { %p6388_p3 = scmp.lt.s32.totalorder %s6386_s8, %s6382_s30 }
  0x31   :  { %p6389_p4 = por %p6388_p3, %p6387_p2 }
  0x33   :  { %p6390_p5 = pnand %p6389_p4, %p6383_p1 }
  0x35   :  { %6393 = shalt.err (!%p6390_p5)
}
  0x36   :  { %123 = dma.hbm_to_vmem [thread:$0]  %s8523_s12, 16, %s121_s28, [#allocation15]  }
  0x37   :  { %s6402_s20 = scalar_lea.vmem %s141_s0, 16  ;;  %s6406_s10 = scalar_lea.vmem %s141_s0, 32 }
  0x38   :  { %p6403_p6 = scmp.ne.s32.totalorder %s141_s0, %s6402_s20  ;;  %p6407_p7 = scmp.lt.s32.totalorder %s141_s0, %s141_s0 }
  0x39   :  { %p6408_p8 = scmp.lt.s32.totalorder %s6406_s10, %s6402_s20 }
  0x3b   :  { %p6409_p9 = por %p6408_p8, %p6407_p7 }
  0x3d   :  { %p6410_p10 = pnand %p6409_p9, %p6403_p6 }
  0x3f   :  { %6413 = shalt.err (!%p6410_p10)
}
  0x40   :  { %143 = dma.hbm_to_vmem [thread:$0]  %s8525_s14, 16, %s141_s0, [#allocation18]  }
  0x41   :  { %s6575_s22 = smov [#allocation2]  }
  0x42   :  { %s37_s23 = sshll.u32 %s6575_s22, 4  ;;  %s38_s23 = int_to_ptr.vmem [resolvable:$true] %s37_s23 }
  0x43   :  { %s6422_s24 = scalar_lea.vmem %s38_s23, 51200  ;;  %p6427_p12 = scmp.lt.s32.totalorder %s38_s23, %s38_s23 }
  0x44   :  { %p6423_p11 = scmp.ne.s32.totalorder %s38_s23, %s6422_s24  ;;  %p6428_p13 = scmp.lt.s32.totalorder %s6422_s24, %s6422_s24 }
  0x46   :  { %p6429_p0 = por %p6428_p13, %p6427_p12 }
  0x48   :  { %p6430_p1 = pnand %p6429_p0, %p6423_p11 }
  0x4a   :  { %6433 = shalt.err (!%p6430_p1)
}
  0x4b   :  { %s6576_s12 = smov 2048   ;;  %s6577_s2 = smov 128  }
  0x4c   :  { %s8703_s27 = sld [smem:[#allocation82_spill]]  ;;  %s6578_s28 = smov [#allocation7]  }
  0x4d   :  { %s70_s29 = sshll.u32 %s6578_s28, 4  ;;  %s6579_s30 = smov [#allocation10]   ;;  %s71_s29 = int_to_ptr.vmem [resolvable:$true] %s70_s29 }
  0x4e   :  { %s90_s14 = sshll.u32 %s6579_s30, 4  ;;  %s6442_s0 = scalar_lea.vmem %s71_s29, 16  ;;  %s91_s14 = int_to_ptr.vmem [resolvable:$true] %s90_s14 }
  0x4f   :  { %p6443_p2 = scmp.ne.s32.totalorder %s71_s29, %s6442_s0  ;;  %s6446_s8 = scalar_lea.vmem %s71_s29, 32 }
  0x50   :  { %p6447_p3 = scmp.lt.s32.totalorder %s71_s29, %s71_s29  ;;  %p6448_p4 = scmp.lt.s32.totalorder %s6446_s8, %s6442_s0 }
  0x52   :  { %43 = dma.hbm_to_vmem [thread:$0]  %s8703_s27, 51200, %s38_s23, [#allocation3], %s6576_s12, %s6576_s12, %s6577_s2  }
  0x53   :  { %p6449_p5 = por %p6448_p4, %p6447_p3 }
  0x55   :  { %p6450_p6 = pnand %p6449_p5, %p6443_p2 }
  0x57   :  { %6453 = shalt.err (!%p6450_p6)
}
  0x58   :  { %73 = dma.hbm_to_vmem [thread:$0]  %s8518_s7, 16, %s71_s29, [#allocation6]  }
  0x59   :  { %s6462_s20 = scalar_lea.vmem %s91_s14, 16  ;;  %s6466_s10 = scalar_lea.vmem %s91_s14, 32 }
  0x5a   :  { %p6463_p7 = scmp.ne.s32.totalorder %s91_s14, %s6462_s20  ;;  %p6467_p8 = scmp.lt.s32.totalorder %s91_s14, %s91_s14 }
  0x5b   :  { %p6468_p9 = scmp.lt.s32.totalorder %s6466_s10, %s6462_s20 }
  0x5d   :  { %p6469_p10 = por %p6468_p9, %p6467_p8 }
  0x5f   :  { %p6470_p11 = pnand %p6469_p10, %p6463_p7 }
  0x61   :  { %6473 = shalt.err (!%p6470_p11)
}
  0x62   :  { %93 = dma.hbm_to_vmem [thread:$0]  %s8520_s9, 16, %s91_s14, [#allocation9]  }
  0x63   :  { %s6580_s22 = smov [#allocation13]   ;;  %s6581_s24 = smov [#allocation16]  }
  0x64   :  { %s110_s23 = sshll.u32 %s6580_s22, 4  ;;  %s130_s12 = sshll.u32 %s6581_s24, 4  ;;  %s111_s23 = int_to_ptr.vmem [resolvable:$true] %s110_s23  ;;  %s131_s12 = int_to_ptr.vmem [resolvable:$true] %s130_s12 }
  0x65   :  { %s6482_s2 = scalar_lea.vmem %s111_s23, 16  ;;  %s6486_s7 = scalar_lea.vmem %s111_s23, 32 }
  0x66   :  { %p6483_p12 = scmp.ne.s32.totalorder %s111_s23, %s6482_s2  ;;  %p6487_p13 = scmp.lt.s32.totalorder %s111_s23, %s111_s23 }
  0x67   :  { %p6488_p0 = scmp.lt.s32.totalorder %s6486_s7, %s6482_s2 }
  0x69   :  { %p6489_p1 = por %p6488_p0, %p6487_p13 }
  0x6b   :  { %p6490_p2 = pnand %p6489_p1, %p6483_p12 }
  0x6d   :  { %6493 = shalt.err (!%p6490_p2)
}
  0x6e   :  { %113 = dma.hbm_to_vmem [thread:$0]  %s8522_s11, 16, %s111_s23, [#allocation12]  }
  0x6f   :  { %s6502_s27 = scalar_lea.vmem %s131_s12, 16  ;;  %s6506_s9 = scalar_lea.vmem %s131_s12, 32 }
  0x70   :  { %p6503_p3 = scmp.ne.s32.totalorder %s131_s12, %s6502_s27  ;;  %p6507_p4 = scmp.lt.s32.totalorder %s131_s12, %s131_s12 }
  0x71   :  { %p6508_p5 = scmp.lt.s32.totalorder %s6506_s9, %s6502_s27 }
  0x73   :  { %p6509_p6 = por %p6508_p5, %p6507_p4 }
  0x75   :  { %p6510_p7 = pnand %p6509_p6, %p6503_p3 }
  0x77   :  { %6513 = shalt.err (!%p6510_p7)
}
  0x78   :  { %133 = dma.hbm_to_vmem [thread:$0]  %s8524_s13, 16, %s131_s12, [#allocation15]  }
  0x79   :  { %s6582_s30 = smov [#allocation19]  }
  0x7a   :  { %s150_s14 = sshll.u32 %s6582_s30, 4  ;;  %s151_s14 = int_to_ptr.vmem [resolvable:$true] %s150_s14 }
  0x7b   :  { %s6522_s0 = scalar_lea.vmem %s151_s14, 16  ;;  %s6526_s8 = scalar_lea.vmem %s151_s14, 32 }
  0x7c   :  { %p6523_p8 = scmp.ne.s32.totalorder %s151_s14, %s6522_s0  ;;  %p6527_p9 = scmp.lt.s32.totalorder %s151_s14, %s151_s14 }
  0x7d   :  { %p6528_p10 = scmp.lt.s32.totalorder %s6526_s8, %s6522_s0 }
  0x7f   :  { %p6529_p11 = por %p6528_p10, %p6527_p9 }
  0x81   :  { %p6530_p12 = pnand %p6529_p11, %p6523_p8 }
  0x83   :  { %6533 = shalt.err (!%p6530_p12)
}
  0x84   :  { %153 = dma.hbm_to_vmem [thread:$0]  %s8526_s15, 16, %s151_s14, [#allocation18]  }
  0x85   :  { %6554 = dma.done.wait [#allocation3], 51200  }
  0x86   :  { %6555 = vsyncadd [#allocation3], 4294916096 }
  0x87   :  { %6556 = dma.done.wait [#allocation6], 65552  }
  0x88   :  { %6557 = vsyncadd [#allocation6], 4294901744 }
  0x89   :  { %6558 = dma.done.wait [#allocation9], 32  }
  0x8a   :  { %6559 = vsyncadd [#allocation9], 4294967264 }
  0x8b   :  { %6560 = dma.done.wait [#allocation12], 32  }
  0x8c   :  { %6561 = vsyncadd [#allocation12], 4294967264 }
  0x8d   :  { %6562 = dma.done.wait [#allocation15], 32  }
  0x8e   :  { %6563 = vsyncadd [#allocation15], 4294967264 }
  0x8f   :  { %6564 = dma.done.wait [#allocation18], 32  }
  0x90   :  { %6565 = vsyncadd [#allocation18], 4294967264  ;;  %v787_v0 = vld [vmem:[#allocation2 + $0x788] sm:$0xff]  ;;  %v789_v1 = vld [vmem:[#allocation2 + $0x798] sm:$0xff]  ;;  %vm8531_vm0 = vcmask 1043456   ;;  %s8704_s19 = sld [smem:[#allocation81_spill]] }
  0x91   :  { %v786_v2 = vld [vmem:[#allocation2 + $0x780] sm:$0xff]  ;;  %1000 = vmatprep.subr.mxu0 %v787_v0  ;;  %1071 = vmatprep.subr.mxu1 %v789_v1  ;;  %v788_v3 = vld [vmem:[#allocation2 + $0x790] sm:$0xff]  ;;  %v771_v4 = vld [vmem:[#allocation2 + $0x708] sm:$0xff]  ;;  %vm948_vm1 = vcmask 556032   ;;  %vm8530_vm6 = vcmask 64512  }
  0x92   :  { %v773_v5 = vld [vmem:[#allocation2 + $0x718] sm:$0xff]  ;;  %1001 = vmatpush1.msra.mxu0 %v786_v2  ;;  %1072 = vmatpush1.msra.mxu1 %v788_v3  ;;  %v770_v6 = vld [vmem:[#allocation2 + $0x700] sm:$0xff]  ;;  %v772_v7 = vld [vmem:[#allocation2 + $0x710] sm:$0xff] }
  0x93   :  { %v755_v8 = vld [vmem:[#allocation2 + $0x688] sm:$0xff]  ;;  %1002 = vmatprep.subr.mxu0 %v771_v4  ;;  %1073 = vmatprep.subr.mxu1 %v773_v5  ;;  %v757_v9 = vld [vmem:[#allocation2 + $0x698] sm:$0xff]  ;;  %v754_v10 = vld [vmem:[#allocation2 + $0x680] sm:$0xff] }
  0x94   :  { %v756_v11 = vld [vmem:[#allocation2 + $0x690] sm:$0xff]  ;;  %1003 = vmatpush1.msra.mxu0 %v770_v6  ;;  %1074 = vmatpush1.msra.mxu1 %v772_v7  ;;  %v739_v12 = vld [vmem:[#allocation2 + $0x608] sm:$0xff]  ;;  %v741_v13 = vld [vmem:[#allocation2 + $0x618] sm:$0xff] }
  0x95   :  { %1004 = vmatprep.subr.mxu0 %v755_v8  ;;  %1075 = vmatprep.subr.mxu1 %v757_v9  ;;  %v738_v14 = vld [vmem:[#allocation2 + $0x600] sm:$0xff]  ;;  %v740_v15 = vld [vmem:[#allocation2 + $0x610] sm:$0xff]  ;;  %v723_v16 = vld [vmem:[#allocation2 + $0x588] sm:$0xff] }
  0x96   :  { %1005 = vmatpush1.msra.mxu0 %v754_v10  ;;  %1076 = vmatpush1.msra.mxu1 %v756_v11  ;;  %v725_v17 = vld [vmem:[#allocation2 + $0x598] sm:$0xff]  ;;  %v722_v18 = vld [vmem:[#allocation2 + $0x580] sm:$0xff]  ;;  %v724_v19 = vld [vmem:[#allocation2 + $0x590] sm:$0xff] }
  0x97   :  { %1006 = vmatprep.subr.mxu0 %v739_v12  ;;  %1077 = vmatprep.subr.mxu1 %v741_v13  ;;  %v707_v20 = vld [vmem:[#allocation2 + $0x508] sm:$0xff]  ;;  %v709_v21 = vld [vmem:[#allocation2 + $0x518] sm:$0xff]  ;;  %v706_v22 = vld [vmem:[#allocation2 + $0x500] sm:$0xff] }
  0x98   :  { %1007 = vmatpush1.msra.mxu0 %v738_v14  ;;  %1078 = vmatpush1.msra.mxu1 %v740_v15  ;;  %v708_v23 = vld [vmem:[#allocation2 + $0x510] sm:$0xff]  ;;  %v691_v24 = vld [vmem:[#allocation2 + $0x488] sm:$0xff]  ;;  %v693_v25 = vld [vmem:[#allocation2 + $0x498] sm:$0xff] }
  0x99   :  { %1008 = vmatprep.subr.mxu0 %v723_v16  ;;  %1079 = vmatprep.subr.mxu1 %v725_v17  ;;  %v690_v26 = vld [vmem:[#allocation2 + $0x480] sm:$0xff]  ;;  %v692_v27 = vld [vmem:[#allocation2 + $0x490] sm:$0xff]  ;;  %v675_v28 = vld [vmem:[#allocation2 + $0x408] sm:$0xff] }
  0x9a   :  { %1009 = vmatpush1.msra.mxu0 %v722_v18  ;;  %1080 = vmatpush1.msra.mxu1 %v724_v19  ;;  %v677_v29 = vld [vmem:[#allocation2 + $0x418] sm:$0xff]  ;;  %v674_v30 = vld [vmem:[#allocation2 + $0x400] sm:$0xff]  ;;  %v676_v31 = vld [vmem:[#allocation2 + $0x410] sm:$0xff] }
  0x9b   :  { %1010 = vmatprep.subr.mxu0 %v707_v20  ;;  %1081 = vmatprep.subr.mxu1 %v709_v21  ;;  %v659_v32 = vld [vmem:[#allocation2 + $0x388] sm:$0xff]  ;;  %v661_v33 = vld [vmem:[#allocation2 + $0x398] sm:$0xff]  ;;  %v658_v34 = vld [vmem:[#allocation2 + $0x380] sm:$0xff] }
  0x9c   :  { %1011 = vmatpush1.msra.mxu0 %v706_v22  ;;  %1082 = vmatpush1.msra.mxu1 %v708_v23  ;;  %v660_v35 = vld [vmem:[#allocation2 + $0x390] sm:$0xff]  ;;  %v643_v36 = vld [vmem:[#allocation2 + $0x308] sm:$0xff]  ;;  %v645_v37 = vld [vmem:[#allocation2 + $0x318] sm:$0xff] }
  0x9d   :  { %1012 = vmatprep.subr.mxu0 %v691_v24  ;;  %1083 = vmatprep.subr.mxu1 %v693_v25  ;;  %v642_v38 = vld [vmem:[#allocation2 + $0x300] sm:$0xff]  ;;  %v644_v39 = vld [vmem:[#allocation2 + $0x310] sm:$0xff]  ;;  %v627_v40 = vld [vmem:[#allocation2 + $0x288] sm:$0xff] }
  0x9e   :  { %1013 = vmatpush1.msra.mxu0 %v690_v26  ;;  %1084 = vmatpush1.msra.mxu1 %v692_v27  ;;  %v629_v41 = vld [vmem:[#allocation2 + $0x298] sm:$0xff]  ;;  %v626_v42 = vld [vmem:[#allocation2 + $0x280] sm:$0xff]  ;;  %v628_v43 = vld [vmem:[#allocation2 + $0x290] sm:$0xff] }
  0x9f   :  { %1014 = vmatprep.subr.mxu0 %v675_v28  ;;  %1085 = vmatprep.subr.mxu1 %v677_v29  ;;  %v611_v44 = vld [vmem:[#allocation2 + $0x208] sm:$0xff]  ;;  %v613_v45 = vld [vmem:[#allocation2 + $0x218] sm:$0xff]  ;;  %v610_v46 = vld [vmem:[#allocation2 + $0x200] sm:$0xff] }
  0xa0   :  { %1015 = vmatpush1.msra.mxu0 %v674_v30  ;;  %1086 = vmatpush1.msra.mxu1 %v676_v31  ;;  %v612_v47 = vld [vmem:[#allocation2 + $0x210] sm:$0xff]  ;;  %v595_v48 = vld [vmem:[#allocation2 + $0x188] sm:$0xff]  ;;  %v597_v49 = vld [vmem:[#allocation2 + $0x198] sm:$0xff] }
  0xa1   :  { %1016 = vmatprep.subr.mxu0 %v659_v32  ;;  %1087 = vmatprep.subr.mxu1 %v661_v33  ;;  %v594_v50 = vld [vmem:[#allocation2 + $0x180] sm:$0xff]  ;;  %v596_v51 = vld [vmem:[#allocation2 + $0x190] sm:$0xff]  ;;  %v579_v52 = vld [vmem:[#allocation2 + $0x108] sm:$0xff] }
  0xa2   :  { %1017 = vmatpush1.msra.mxu0 %v658_v34  ;;  %1088 = vmatpush1.msra.mxu1 %v660_v35  ;;  %v581_v53 = vld [vmem:[#allocation2 + $0x118] sm:$0xff]  ;;  %v578_v54 = vld [vmem:[#allocation2 + $0x100] sm:$0xff]  ;;  %v580_v55 = vld [vmem:[#allocation2 + $0x110] sm:$0xff] }
  0xa3   :  { %1018 = vmatprep.subr.mxu0 %v643_v36  ;;  %1089 = vmatprep.subr.mxu1 %v645_v37  ;;  %v563_v56 = vld [vmem:[#allocation2 + $0x88] sm:$0xff]  ;;  %v565_v57 = vld [vmem:[#allocation2 + $0x98] sm:$0xff]  ;;  %v562_v58 = vld [vmem:[#allocation2 + $0x80] sm:$0xff] }
  0xa4   :  { %1019 = vmatpush1.msra.mxu0 %v642_v38  ;;  %1090 = vmatpush1.msra.mxu1 %v644_v39  ;;  %v564_v59 = vld [vmem:[#allocation2 + $0x90] sm:$0xff]  ;;  %v547_v60 = vld [vmem:[#allocation2 + $0x8] sm:$0xff]  ;;  %v549_v61 = vld [vmem:[#allocation2 + $0x18] sm:$0xff] }
  0xa5   :  { %1020 = vmatprep.subr.mxu0 %v627_v40  ;;  %1091 = vmatprep.subr.mxu1 %v629_v41  ;;  %v546_v62 = vld [vmem:[#allocation2] sm:$0xff]  ;;  %v548_v63 = vld [vmem:[#allocation2 + $0x10] sm:$0xff]  ;;  %v931_v0 = vld [vmem:[#allocation2 + $0xc08] sm:$0xf] }
  0xa6   :  { %1021 = vmatpush1.msra.mxu0 %v626_v42  ;;  %1092 = vmatpush1.msra.mxu1 %v628_v43  ;;  %v933_v1 = vld [vmem:[#allocation2 + $0xc18] sm:$0xf]  ;;  %v930_v2 = vld [vmem:[#allocation2 + $0xc00] sm:$0xf]  ;;  %v932_v3 = vld [vmem:[#allocation2 + $0xc10] sm:$0xf] }
  0xa7   :  { %1022 = vmatprep.subr.mxu0 %v611_v44  ;;  %1093 = vmatprep.subr.mxu1 %v613_v45  ;;  %v915_v4 = vld [vmem:[#allocation2 + $0xb88] sm:$0xff]  ;;  %v917_v5 = vld [vmem:[#allocation2 + $0xb98] sm:$0xff]  ;;  %v914_v6 = vld [vmem:[#allocation2 + $0xb80] sm:$0xff] }
  0xa8   :  { %1023 = vmatpush1.msra.mxu0 %v610_v46  ;;  %1094 = vmatpush1.msra.mxu1 %v612_v47  ;;  %v916_v7 = vld [vmem:[#allocation2 + $0xb90] sm:$0xff]  ;;  %v899_v8 = vld [vmem:[#allocation2 + $0xb08] sm:$0xff]  ;;  %v901_v9 = vld [vmem:[#allocation2 + $0xb18] sm:$0xff] }
  0xa9   :  { %1024 = vmatprep.subr.mxu0 %v595_v48  ;;  %1095 = vmatprep.subr.mxu1 %v597_v49  ;;  %v898_v10 = vld [vmem:[#allocation2 + $0xb00] sm:$0xff]  ;;  %v900_v11 = vld [vmem:[#allocation2 + $0xb10] sm:$0xff]  ;;  %v883_v12 = vld [vmem:[#allocation2 + $0xa88] sm:$0xff] }
  0xaa   :  { %1025 = vmatpush1.msra.mxu0 %v594_v50  ;;  %1096 = vmatpush1.msra.mxu1 %v596_v51  ;;  %v885_v13 = vld [vmem:[#allocation2 + $0xa98] sm:$0xff]  ;;  %v882_v14 = vld [vmem:[#allocation2 + $0xa80] sm:$0xff]  ;;  %v884_v15 = vld [vmem:[#allocation2 + $0xa90] sm:$0xff] }
  0xab   :  { %1026 = vmatprep.subr.mxu0 %v579_v52  ;;  %1097 = vmatprep.subr.mxu1 %v581_v53  ;;  %v867_v16 = vld [vmem:[#allocation2 + $0xa08] sm:$0xff]  ;;  %v869_v17 = vld [vmem:[#allocation2 + $0xa18] sm:$0xff]  ;;  %v866_v18 = vld [vmem:[#allocation2 + $0xa00] sm:$0xff] }
  0xac   :  { %1027 = vmatpush1.msra.mxu0 %v578_v54  ;;  %1098 = vmatpush1.msra.mxu1 %v580_v55  ;;  %v868_v19 = vld [vmem:[#allocation2 + $0xa10] sm:$0xff]  ;;  %v851_v20 = vld [vmem:[#allocation2 + $0x988] sm:$0xff]  ;;  %v853_v21 = vld [vmem:[#allocation2 + $0x998] sm:$0xff] }
  0xad   :  { %1028 = vmatprep.subr.mxu0 %v563_v56  ;;  %1099 = vmatprep.subr.mxu1 %v565_v57  ;;  %v850_v22 = vld [vmem:[#allocation2 + $0x980] sm:$0xff]  ;;  %v852_v23 = vld [vmem:[#allocation2 + $0x990] sm:$0xff]  ;;  %v835_v24 = vld [vmem:[#allocation2 + $0x908] sm:$0xff] }
  0xae   :  { %1029 = vmatpush1.msra.mxu0 %v562_v58  ;;  %1100 = vmatpush1.msra.mxu1 %v564_v59  ;;  %v837_v25 = vld [vmem:[#allocation2 + $0x918] sm:$0xff]  ;;  %v834_v26 = vld [vmem:[#allocation2 + $0x900] sm:$0xff]  ;;  %v836_v27 = vld [vmem:[#allocation2 + $0x910] sm:$0xff] }
  0xaf   :  { %1030 = vmatprep.subr.mxu0 %v547_v60  ;;  %1101 = vmatprep.subr.mxu1 %v549_v61  ;;  %v6717_v28 = vld [vmem:[%s8704_s19] sm:$0xff]  ;;  %v819_v29 = vld [vmem:[#allocation2 + $0x888] sm:$0xff]  ;;  %v821_v30 = vld [vmem:[#allocation2 + $0x898] sm:$0xff] }
  0xb0   :  { %1031 = vmatpush1.msra.mxu0 %v546_v62  ;;  %1102 = vmatpush1.msra.mxu1 %v548_v63  ;;  %v818_v31 = vld [vmem:[#allocation2 + $0x880] sm:$0xff]  ;;  %v820_v32 = vld [vmem:[#allocation2 + $0x890] sm:$0xff]  ;;  %v803_v33 = vld [vmem:[#allocation2 + $0x808] sm:$0xff]  ;;  %v6721_v35 = vcombine.high %v6717_v28, %v6717_v28 }
  0xb1   :  { %5609 = vmatprep.subr.msk.mxu0 %vm8531_vm0, %v931_v0  ;;  %5612 = vmatprep.subr.msk.mxu1 %vm8531_vm0, %v933_v1  ;;  %v805_v34 = vld [vmem:[#allocation2 + $0x818] sm:$0xff]  ;;  %v802_v36 = vld [vmem:[#allocation2 + $0x800] sm:$0xff]  ;;  %v804_v37 = vld [vmem:[#allocation2 + $0x810] sm:$0xff] }
  0xb2   :  { %5610 = vmatpush2.msk.msra.mxu0 %vm8531_vm0, %v930_v2  ;;  %5613 = vmatpush2.msk.msra.mxu1 %vm8531_vm0, %v932_v3  ;;  %v791_v38 = vld [vmem:[#allocation2 + $0x7a8] sm:$0xff]  ;;  %v793_v39 = vld [vmem:[#allocation2 + $0x7b8] sm:$0xff]  ;;  %v790_v40 = vld [vmem:[#allocation2 + $0x7a0] sm:$0xff] }
  0xb3   :  { %1048 = vmatprep.subr.mxu0 %v915_v4  ;;  %1119 = vmatprep.subr.mxu1 %v917_v5  ;;  %v792_v41 = vld [vmem:[#allocation2 + $0x7b0] sm:$0xff]  ;;  %v775_v42 = vld [vmem:[#allocation2 + $0x728] sm:$0xff]  ;;  %v777_v43 = vld [vmem:[#allocation2 + $0x738] sm:$0xff] }
  0xb4   :  { %1049 = vmatpush2.msra.mxu0 %v914_v6  ;;  %1120 = vmatpush2.msra.mxu1 %v916_v7  ;;  %v774_v44 = vld [vmem:[#allocation2 + $0x720] sm:$0xff]  ;;  %v776_v45 = vld [vmem:[#allocation2 + $0x730] sm:$0xff]  ;;  %v759_v46 = vld [vmem:[#allocation2 + $0x6a8] sm:$0xff] }
  0xb5   :  { %1050 = vmatprep.subr.mxu0 %v899_v8  ;;  %1121 = vmatprep.subr.mxu1 %v901_v9  ;;  %v761_v47 = vld [vmem:[#allocation2 + $0x6b8] sm:$0xff]  ;;  %v758_v48 = vld [vmem:[#allocation2 + $0x6a0] sm:$0xff]  ;;  %v760_v49 = vld [vmem:[#allocation2 + $0x6b0] sm:$0xff] }
  0xb6   :  { %1051 = vmatpush2.msra.mxu0 %v898_v10  ;;  %1122 = vmatpush2.msra.mxu1 %v900_v11  ;;  %v743_v50 = vld [vmem:[#allocation2 + $0x628] sm:$0xff]  ;;  %v745_v51 = vld [vmem:[#allocation2 + $0x638] sm:$0xff]  ;;  %v742_v52 = vld [vmem:[#allocation2 + $0x620] sm:$0xff] }
  0xb7   :  { %1052 = vmatprep.subr.mxu0 %v883_v12  ;;  %1123 = vmatprep.subr.mxu1 %v885_v13  ;;  %v744_v53 = vld [vmem:[#allocation2 + $0x630] sm:$0xff]  ;;  %v727_v54 = vld [vmem:[#allocation2 + $0x5a8] sm:$0xff]  ;;  %v729_v55 = vld [vmem:[#allocation2 + $0x5b8] sm:$0xff] }
  0xb8   :  { %1053 = vmatpush2.msra.mxu0 %v882_v14  ;;  %1124 = vmatpush2.msra.mxu1 %v884_v15  ;;  %v726_v56 = vld [vmem:[#allocation2 + $0x5a0] sm:$0xff]  ;;  %v728_v57 = vld [vmem:[#allocation2 + $0x5b0] sm:$0xff]  ;;  %v711_v58 = vld [vmem:[#allocation2 + $0x528] sm:$0xff] }
  0xb9   :  { %1054 = vmatprep.subr.mxu0 %v867_v16  ;;  %1125 = vmatprep.subr.mxu1 %v869_v17  ;;  %v713_v59 = vld [vmem:[#allocation2 + $0x538] sm:$0xff]  ;;  %v710_v60 = vld [vmem:[#allocation2 + $0x520] sm:$0xff]  ;;  %v712_v61 = vld [vmem:[#allocation2 + $0x530] sm:$0xff] }
  0xba   :  { %1055 = vmatpush2.msra.mxu0 %v866_v18  ;;  %1126 = vmatpush2.msra.mxu1 %v868_v19  ;;  %v695_v62 = vld [vmem:[#allocation2 + $0x4a8] sm:$0xff]  ;;  %v697_v63 = vld [vmem:[#allocation2 + $0x4b8] sm:$0xff]  ;;  %v694_v0 = vld [vmem:[#allocation2 + $0x4a0] sm:$0xff] }
  0xbb   :  { %1056 = vmatprep.subr.mxu0 %v851_v20  ;;  %1127 = vmatprep.subr.mxu1 %v853_v21  ;;  %v696_v1 = vld [vmem:[#allocation2 + $0x4b0] sm:$0xff]  ;;  %v679_v2 = vld [vmem:[#allocation2 + $0x428] sm:$0xff]  ;;  %v681_v3 = vld [vmem:[#allocation2 + $0x438] sm:$0xff] }
  0xbc   :  { %1057 = vmatpush2.msra.mxu0 %v850_v22  ;;  %1128 = vmatpush2.msra.mxu1 %v852_v23  ;;  %v678_v4 = vld [vmem:[#allocation2 + $0x420] sm:$0xff]  ;;  %v680_v5 = vld [vmem:[#allocation2 + $0x430] sm:$0xff]  ;;  %v663_v6 = vld [vmem:[#allocation2 + $0x3a8] sm:$0xff] }
  0xbd   :  { %1058 = vmatprep.subr.mxu0 %v835_v24  ;;  %1129 = vmatprep.subr.mxu1 %v837_v25  ;;  %v665_v7 = vld [vmem:[#allocation2 + $0x3b8] sm:$0xff]  ;;  %v662_v8 = vld [vmem:[#allocation2 + $0x3a0] sm:$0xff]  ;;  %v664_v9 = vld [vmem:[#allocation2 + $0x3b0] sm:$0xff] }
  0xbe   :  { %1059 = vmatpush2.msra.mxu0 %v834_v26  ;;  %1130 = vmatpush2.msra.mxu1 %v836_v27  ;;  %v647_v10 = vld [vmem:[#allocation2 + $0x328] sm:$0xff]  ;;  %v649_v11 = vld [vmem:[#allocation2 + $0x338] sm:$0xff]  ;;  %v646_v12 = vld [vmem:[#allocation2 + $0x320] sm:$0xff] }
  0xbf   :  { %1060 = vmatprep.subr.mxu0 %v819_v29  ;;  %1131 = vmatprep.subr.mxu1 %v821_v30  ;;  %v648_v13 = vld [vmem:[#allocation2 + $0x330] sm:$0xff]  ;;  %v631_v14 = vld [vmem:[#allocation2 + $0x2a8] sm:$0xff]  ;;  %v633_v15 = vld [vmem:[#allocation2 + $0x2b8] sm:$0xff] }
  0xc0   :  { %1061 = vmatpush2.msra.mxu0 %v818_v31  ;;  %1132 = vmatpush2.msra.mxu1 %v820_v32  ;;  %v630_v16 = vld [vmem:[#allocation2 + $0x2a0] sm:$0xff]  ;;  %v632_v17 = vld [vmem:[#allocation2 + $0x2b0] sm:$0xff]  ;;  %v615_v18 = vld [vmem:[#allocation2 + $0x228] sm:$0xff] }
  0xc1   :  { %1062 = vmatprep.subr.mxu0 %v803_v33  ;;  %1133 = vmatprep.subr.mxu1 %v805_v34  ;;  %v617_v19 = vld [vmem:[#allocation2 + $0x238] sm:$0xff]  ;;  %v614_v20 = vld [vmem:[#allocation2 + $0x220] sm:$0xff]  ;;  %v616_v21 = vld [vmem:[#allocation2 + $0x230] sm:$0xff] }
  0xc2   :  { %1063 = vmatpush2.msra.mxu0 %v802_v36  ;;  %5611 = vmatprep.mubr.msk.f32.mxu0 %vm948_vm1, %v6721_v35  ;;  %v599_v22 = vld [vmem:[#allocation2 + $0x1a8] sm:$0xff]  ;;  %v601_v23 = vld [vmem:[#allocation2 + $0x1b8] sm:$0xff]  ;;  %v598_v24 = vld [vmem:[#allocation2 + $0x1a0] sm:$0xff] }
  0xc3   :  { %1134 = vmatpush2.msra.mxu1 %v804_v37  ;;  %5614 = vmatprep.mubr.msk.f32.mxu1 %vm948_vm1, %v6721_v35  ;;  %v600_v25 = vld [vmem:[#allocation2 + $0x1b0] sm:$0xff]  ;;  %v583_v26 = vld [vmem:[#allocation2 + $0x128] sm:$0xff]  ;;  %v585_v27 = vld [vmem:[#allocation2 + $0x138] sm:$0xff] }
  0xc4   :  { %1065 = vmatmul.mubr.f32.vlgmr.msra.gmra.mxu0 %v6717_v28  ;;  %1136 = vmatmul.mubr.f32.vlgmr.msra.gmra.mxu1 %v6717_v28  ;;  %v582_v29 = vld [vmem:[#allocation2 + $0x120] sm:$0xff]  ;;  %v584_v30 = vld [vmem:[#allocation2 + $0x130] sm:$0xff]  ;;  %v567_v31 = vld [vmem:[#allocation2 + $0xa8] sm:$0xff] }
  0xc5   :  { %1142 = vmatprep.subr.mxu0 %v791_v38  ;;  %1213 = vmatprep.subr.mxu1 %v793_v39  ;;  %v569_v32 = vld [vmem:[#allocation2 + $0xb8] sm:$0xff]  ;;  %v566_v33 = vld [vmem:[#allocation2 + $0xa0] sm:$0xff]  ;;  %v568_v34 = vld [vmem:[#allocation2 + $0xb0] sm:$0xff] }
  0xc6   :  { %1143 = vmatpush1.msra.mxu0 %v790_v40  ;;  %1214 = vmatpush1.msra.mxu1 %v792_v41  ;;  %v551_v36 = vld [vmem:[#allocation2 + $0x28] sm:$0xff]  ;;  %v553_v37 = vld [vmem:[#allocation2 + $0x38] sm:$0xff]  ;;  %v550_v38 = vld [vmem:[#allocation2 + $0x20] sm:$0xff] }
  0xc7   :  { %1144 = vmatprep.subr.mxu0 %v775_v42  ;;  %1215 = vmatprep.subr.mxu1 %v777_v43  ;;  %v552_v39 = vld [vmem:[#allocation2 + $0x30] sm:$0xff]  ;;  %v935_v40 = vld [vmem:[#allocation2 + $0xc28] sm:$0xf]  ;;  %v937_v41 = vld [vmem:[#allocation2 + $0xc38] sm:$0xf] }
  0xc8   :  { %1145 = vmatpush1.msra.mxu0 %v774_v44  ;;  %1216 = vmatpush1.msra.mxu1 %v776_v45  ;;  %v934_v42 = vld [vmem:[#allocation2 + $0xc20] sm:$0xf]  ;;  %v936_v43 = vld [vmem:[#allocation2 + $0xc30] sm:$0xf]  ;;  %v919_v44 = vld [vmem:[#allocation2 + $0xba8] sm:$0xff] }
  0xc9   :  { %1146 = vmatprep.subr.mxu0 %v759_v46  ;;  %1217 = vmatprep.subr.mxu1 %v761_v47  ;;  %v921_v45 = vld [vmem:[#allocation2 + $0xbb8] sm:$0xff]  ;;  %v918_v46 = vld [vmem:[#allocation2 + $0xba0] sm:$0xff]  ;;  %v920_v47 = vld [vmem:[#allocation2 + $0xbb0] sm:$0xff] }
  0xca   :  { %1147 = vmatpush1.msra.mxu0 %v758_v48  ;;  %1218 = vmatpush1.msra.mxu1 %v760_v49  ;;  %v903_v48 = vld [vmem:[#allocation2 + $0xb28] sm:$0xff]  ;;  %v905_v49 = vld [vmem:[#allocation2 + $0xb38] sm:$0xff] }
  0xcb   :  { %1148 = vmatprep.subr.mxu0 %v743_v50  ;;  %1219 = vmatprep.subr.mxu1 %v745_v51  ;;  %v902_v50 = vld [vmem:[#allocation2 + $0xb20] sm:$0xff]  ;;  %v904_v51 = vld [vmem:[#allocation2 + $0xb30] sm:$0xff] }
  0xcc   :  { %1149 = vmatpush1.msra.mxu0 %v742_v52  ;;  %1220 = vmatpush1.msra.mxu1 %v744_v53  ;;  %v887_v52 = vld [vmem:[#allocation2 + $0xaa8] sm:$0xff]  ;;  %v889_v53 = vld [vmem:[#allocation2 + $0xab8] sm:$0xff] }
  0xcd   :  { %1150 = vmatprep.subr.mxu0 %v727_v54  ;;  %1221 = vmatprep.subr.mxu1 %v729_v55  ;;  %v886_v54 = vld [vmem:[#allocation2 + $0xaa0] sm:$0xff]  ;;  %v888_v55 = vld [vmem:[#allocation2 + $0xab0] sm:$0xff] }
  0xce   :  { %1151 = vmatpush1.msra.mxu0 %v726_v56  ;;  %1222 = vmatpush1.msra.mxu1 %v728_v57  ;;  %v871_v56 = vld [vmem:[#allocation2 + $0xa28] sm:$0xff]  ;;  %v873_v57 = vld [vmem:[#allocation2 + $0xa38] sm:$0xff] }
  0xcf   :  { %1152 = vmatprep.subr.mxu0 %v711_v58  ;;  %1223 = vmatprep.subr.mxu1 %v713_v59  ;;  %v870_v58 = vld [vmem:[#allocation2 + $0xa20] sm:$0xff]  ;;  %v872_v59 = vld [vmem:[#allocation2 + $0xa30] sm:$0xff] }
  0xd0   :  { %1153 = vmatpush1.msra.mxu0 %v710_v60  ;;  %1224 = vmatpush1.msra.mxu1 %v712_v61  ;;  %v855_v60 = vld [vmem:[#allocation2 + $0x9a8] sm:$0xff]  ;;  %v857_v61 = vld [vmem:[#allocation2 + $0x9b8] sm:$0xff] }
  0xd1   :  { %1154 = vmatprep.subr.mxu0 %v695_v62  ;;  %1225 = vmatprep.subr.mxu1 %v697_v63  ;;  %v854_v62 = vld [vmem:[#allocation2 + $0x9a0] sm:$0xff]  ;;  %v856_v63 = vld [vmem:[#allocation2 + $0x9b0] sm:$0xff] }
  0xd2   :  { %1155 = vmatpush1.msra.mxu0 %v694_v0  ;;  %1226 = vmatpush1.msra.mxu1 %v696_v1  ;;  %v839_v0 = vld [vmem:[#allocation2 + $0x928] sm:$0xff]  ;;  %v841_v1 = vld [vmem:[#allocation2 + $0x938] sm:$0xff] }
  0xd3   :  { %1156 = vmatprep.subr.mxu0 %v679_v2  ;;  %1227 = vmatprep.subr.mxu1 %v681_v3  ;;  %v838_v2 = vld [vmem:[#allocation2 + $0x920] sm:$0xff]  ;;  %v840_v3 = vld [vmem:[#allocation2 + $0x930] sm:$0xff] }
  0xd4   :  { %1157 = vmatpush1.msra.mxu0 %v678_v4  ;;  %1228 = vmatpush1.msra.mxu1 %v680_v5  ;;  %v823_v4 = vld [vmem:[#allocation2 + $0x8a8] sm:$0xff]  ;;  %v825_v5 = vld [vmem:[#allocation2 + $0x8b8] sm:$0xff] }
  0xd5   :  { %1158 = vmatprep.subr.mxu0 %v663_v6  ;;  %1229 = vmatprep.subr.mxu1 %v665_v7  ;;  %v822_v6 = vld [vmem:[#allocation2 + $0x8a0] sm:$0xff]  ;;  %v824_v7 = vld [vmem:[#allocation2 + $0x8b0] sm:$0xff] }
  0xd6   :  { %1159 = vmatpush1.msra.mxu0 %v662_v8  ;;  %1230 = vmatpush1.msra.mxu1 %v664_v9  ;;  %v807_v8 = vld [vmem:[#allocation2 + $0x828] sm:$0xff]  ;;  %v809_v9 = vld [vmem:[#allocation2 + $0x838] sm:$0xff] }
  0xd7   :  { %1160 = vmatprep.subr.mxu0 %v647_v10  ;;  %1231 = vmatprep.subr.mxu1 %v649_v11  ;;  %v806_v10 = vld [vmem:[#allocation2 + $0x820] sm:$0xff]  ;;  %v808_v11 = vld [vmem:[#allocation2 + $0x830] sm:$0xff] }
  0xd8   :  { %1161 = vmatpush1.msra.mxu0 %v646_v12  ;;  %1232 = vmatpush1.msra.mxu1 %v648_v13  ;;  %v795_v12 = vld [vmem:[#allocation2 + $0x7c8] sm:$0xff]  ;;  %v797_v13 = vld [vmem:[#allocation2 + $0x7d8] sm:$0xff] }
  0xd9   :  { %1162 = vmatprep.subr.mxu0 %v631_v14  ;;  %1233 = vmatprep.subr.mxu1 %v633_v15  ;;  %v794_v14 = vld [vmem:[#allocation2 + $0x7c0] sm:$0xff]  ;;  %v796_v15 = vld [vmem:[#allocation2 + $0x7d0] sm:$0xff] }
  0xda   :  { %1163 = vmatpush1.msra.mxu0 %v630_v16  ;;  %1234 = vmatpush1.msra.mxu1 %v632_v17  ;;  %v779_v16 = vld [vmem:[#allocation2 + $0x748] sm:$0xff]  ;;  %v781_v17 = vld [vmem:[#allocation2 + $0x758] sm:$0xff] }
  0xdb   :  { %1164 = vmatprep.subr.mxu0 %v615_v18  ;;  %1235 = vmatprep.subr.mxu1 %v617_v19  ;;  %v778_v18 = vld [vmem:[#allocation2 + $0x740] sm:$0xff]  ;;  %v780_v19 = vld [vmem:[#allocation2 + $0x750] sm:$0xff] }
  0xdc   :  { %1165 = vmatpush1.msra.mxu0 %v614_v20  ;;  %1236 = vmatpush1.msra.mxu1 %v616_v21  ;;  %v763_v20 = vld [vmem:[#allocation2 + $0x6c8] sm:$0xff]  ;;  %v765_v21 = vld [vmem:[#allocation2 + $0x6d8] sm:$0xff] }
  0xdd   :  { %1166 = vmatprep.subr.mxu0 %v599_v22  ;;  %1237 = vmatprep.subr.mxu1 %v601_v23  ;;  %v762_v22 = vld [vmem:[#allocation2 + $0x6c0] sm:$0xff]  ;;  %v764_v23 = vld [vmem:[#allocation2 + $0x6d0] sm:$0xff] }
  0xde   :  { %1167 = vmatpush1.msra.mxu0 %v598_v24  ;;  %1238 = vmatpush1.msra.mxu1 %v600_v25  ;;  %v747_v24 = vld [vmem:[#allocation2 + $0x648] sm:$0xff]  ;;  %v749_v25 = vld [vmem:[#allocation2 + $0x658] sm:$0xff] }
  0xdf   :  { %1168 = vmatprep.subr.mxu0 %v583_v26  ;;  %1239 = vmatprep.subr.mxu1 %v585_v27  ;;  %v746_v26 = vld [vmem:[#allocation2 + $0x640] sm:$0xff]  ;;  %v748_v27 = vld [vmem:[#allocation2 + $0x650] sm:$0xff] }
  0xe0   :  { %1169 = vmatpush1.msra.mxu0 %v582_v29  ;;  %1240 = vmatpush1.msra.mxu1 %v584_v30  ;;  %v731_v29 = vld [vmem:[#allocation2 + $0x5c8] sm:$0xff]  ;;  %v733_v30 = vld [vmem:[#allocation2 + $0x5d8] sm:$0xff] }
  0xe1   :  { %1170 = vmatprep.subr.mxu0 %v567_v31  ;;  %1241 = vmatprep.subr.mxu1 %v569_v32  ;;  %v730_v31 = vld [vmem:[#allocation2 + $0x5c0] sm:$0xff]  ;;  %v732_v32 = vld [vmem:[#allocation2 + $0x5d0] sm:$0xff] }
  0xe2   :  { %1171 = vmatpush1.msra.mxu0 %v566_v33  ;;  %1242 = vmatpush1.msra.mxu1 %v568_v34  ;;  %v715_v33 = vld [vmem:[#allocation2 + $0x548] sm:$0xff]  ;;  %v717_v34 = vld [vmem:[#allocation2 + $0x558] sm:$0xff] }
  0xe3   :  { %1172 = vmatprep.subr.mxu0 %v551_v36  ;;  %1243 = vmatprep.subr.mxu1 %v553_v37  ;;  %v714_v36 = vld [vmem:[#allocation2 + $0x540] sm:$0xff]  ;;  %v716_v37 = vld [vmem:[#allocation2 + $0x550] sm:$0xff] }
  0xe4   :  { %1173 = vmatpush1.msra.mxu0 %v550_v38  ;;  %1244 = vmatpush1.msra.mxu1 %v552_v39  ;;  %v699_v38 = vld [vmem:[#allocation2 + $0x4c8] sm:$0xff]  ;;  %v701_v39 = vld [vmem:[#allocation2 + $0x4d8] sm:$0xff] }
  0xe5   :  { %5615 = vmatprep.subr.msk.mxu0 %vm8531_vm0, %v935_v40  ;;  %5618 = vmatprep.subr.msk.mxu1 %vm8531_vm0, %v937_v41  ;;  %v698_v40 = vld [vmem:[#allocation2 + $0x4c0] sm:$0xff]  ;;  %v700_v41 = vld [vmem:[#allocation2 + $0x4d0] sm:$0xff] }
  0xe6   :  { %5616 = vmatpush2.msk.msra.mxu0 %vm8531_vm0, %v934_v42  ;;  %5619 = vmatpush2.msk.msra.mxu1 %vm8531_vm0, %v936_v43  ;;  %v683_v42 = vld [vmem:[#allocation2 + $0x448] sm:$0xff]  ;;  %v685_v43 = vld [vmem:[#allocation2 + $0x458] sm:$0xff] }
  0xe7   :  { %1190 = vmatprep.subr.mxu0 %v919_v44  ;;  %1261 = vmatprep.subr.mxu1 %v921_v45  ;;  %v682_v44 = vld [vmem:[#allocation2 + $0x440] sm:$0xff]  ;;  %v684_v45 = vld [vmem:[#allocation2 + $0x450] sm:$0xff] }
  0xe8   :  { %1191 = vmatpush2.msra.mxu0 %v918_v46  ;;  %1262 = vmatpush2.msra.mxu1 %v920_v47  ;;  %v667_v46 = vld [vmem:[#allocation2 + $0x3c8] sm:$0xff]  ;;  %v669_v47 = vld [vmem:[#allocation2 + $0x3d8] sm:$0xff] }
  0xe9   :  { %1192 = vmatprep.subr.mxu0 %v903_v48  ;;  %1263 = vmatprep.subr.mxu1 %v905_v49  ;;  %v666_v48 = vld [vmem:[#allocation2 + $0x3c0] sm:$0xff]  ;;  %v668_v49 = vld [vmem:[#allocation2 + $0x3d0] sm:$0xff] }
  0xea   :  { %1193 = vmatpush2.msra.mxu0 %v902_v50  ;;  %1264 = vmatpush2.msra.mxu1 %v904_v51  ;;  %v651_v50 = vld [vmem:[#allocation2 + $0x348] sm:$0xff]  ;;  %v653_v51 = vld [vmem:[#allocation2 + $0x358] sm:$0xff] }
  0xeb   :  { %1194 = vmatprep.subr.mxu0 %v887_v52  ;;  %1265 = vmatprep.subr.mxu1 %v889_v53  ;;  %v650_v52 = vld [vmem:[#allocation2 + $0x340] sm:$0xff]  ;;  %v652_v53 = vld [vmem:[#allocation2 + $0x350] sm:$0xff] }
  0xec   :  { %1195 = vmatpush2.msra.mxu0 %v886_v54  ;;  %1266 = vmatpush2.msra.mxu1 %v888_v55  ;;  %v635_v54 = vld [vmem:[#allocation2 + $0x2c8] sm:$0xff]  ;;  %v637_v55 = vld [vmem:[#allocation2 + $0x2d8] sm:$0xff] }
  0xed   :  { %1196 = vmatprep.subr.mxu0 %v871_v56  ;;  %1267 = vmatprep.subr.mxu1 %v873_v57  ;;  %v634_v56 = vld [vmem:[#allocation2 + $0x2c0] sm:$0xff]  ;;  %v636_v57 = vld [vmem:[#allocation2 + $0x2d0] sm:$0xff] }
  0xee   :  { %1197 = vmatpush2.msra.mxu0 %v870_v58  ;;  %1268 = vmatpush2.msra.mxu1 %v872_v59  ;;  %v619_v58 = vld [vmem:[#allocation2 + $0x248] sm:$0xff]  ;;  %v621_v59 = vld [vmem:[#allocation2 + $0x258] sm:$0xff] }
  0xef   :  { %1198 = vmatprep.subr.mxu0 %v855_v60  ;;  %1269 = vmatprep.subr.mxu1 %v857_v61  ;;  %v618_v60 = vld [vmem:[#allocation2 + $0x240] sm:$0xff]  ;;  %v620_v61 = vld [vmem:[#allocation2 + $0x250] sm:$0xff] }
  0xf0   :  { %1199 = vmatpush2.msra.mxu0 %v854_v62  ;;  %1270 = vmatpush2.msra.mxu1 %v856_v63  ;;  %v603_v62 = vld [vmem:[#allocation2 + $0x1c8] sm:$0xff]  ;;  %v605_v63 = vld [vmem:[#allocation2 + $0x1d8] sm:$0xff] }
  0xf1   :  { %1200 = vmatprep.subr.mxu0 %v839_v0  ;;  %1271 = vmatprep.subr.mxu1 %v841_v1  ;;  %v602_v0 = vld [vmem:[#allocation2 + $0x1c0] sm:$0xff]  ;;  %v604_v1 = vld [vmem:[#allocation2 + $0x1d0] sm:$0xff] }
  0xf2   :  { %1201 = vmatpush2.msra.mxu0 %v838_v2  ;;  %1272 = vmatpush2.msra.mxu1 %v840_v3  ;;  %v587_v2 = vld [vmem:[#allocation2 + $0x148] sm:$0xff]  ;;  %v589_v3 = vld [vmem:[#allocation2 + $0x158] sm:$0xff] }
  0xf3   :  { %1202 = vmatprep.subr.mxu0 %v823_v4  ;;  %1273 = vmatprep.subr.mxu1 %v825_v5  ;;  %v586_v4 = vld [vmem:[#allocation2 + $0x140] sm:$0xff]  ;;  %v588_v5 = vld [vmem:[#allocation2 + $0x150] sm:$0xff] }
  0xf4   :  { %1203 = vmatpush2.msra.mxu0 %v822_v6  ;;  %1274 = vmatpush2.msra.mxu1 %v824_v7  ;;  %v571_v6 = vld [vmem:[#allocation2 + $0xc8] sm:$0xff]  ;;  %v573_v7 = vld [vmem:[#allocation2 + $0xd8] sm:$0xff] }
  0xf5   :  { %1204 = vmatprep.subr.mxu0 %v807_v8  ;;  %1275 = vmatprep.subr.mxu1 %v809_v9  ;;  %v570_v8 = vld [vmem:[#allocation2 + $0xc0] sm:$0xff]  ;;  %v572_v9 = vld [vmem:[#allocation2 + $0xd0] sm:$0xff] }
  0xf6   :  { %1205 = vmatpush2.msra.mxu0 %v806_v10  ;;  %5617 = vmatprep.mubr.msk.f32.mxu0 %vm948_vm1, %v6721_v35  ;;  %v555_v10 = vld [vmem:[#allocation2 + $0x48] sm:$0xff] }
  0xf7   :  { %1276 = vmatpush2.msra.mxu1 %v808_v11  ;;  %5620 = vmatprep.mubr.msk.f32.mxu1 %vm948_vm1, %v6721_v35  ;;  %v557_v11 = vld [vmem:[#allocation2 + $0x58] sm:$0xff] }
  0xf8   :  { %1207 = vmatmul.mubr.f32.vlgmr.msra.gmra.mxu0 %v6717_v28  ;;  %1278 = vmatmul.mubr.f32.vlgmr.msra.gmra.mxu1 %v6717_v28 }
  0xf9   :  { %1284 = vmatprep.subr.mxu0 %v795_v12  ;;  %1355 = vmatprep.subr.mxu1 %v797_v13  ;;  %v554_v12 = vld [vmem:[#allocation2 + $0x40] sm:$0xff]  ;;  %v556_v13 = vld [vmem:[#allocation2 + $0x50] sm:$0xff] }
  0xfa   :  { %1285 = vmatpush1.msra.mxu0 %v794_v14  ;;  %1356 = vmatpush1.msra.mxu1 %v796_v15  ;;  %v939_v14 = vld [vmem:[#allocation2 + $0xc48] sm:$0xf]  ;;  %v941_v15 = vld [vmem:[#allocation2 + $0xc58] sm:$0xf] }
  0xfb   :  { %1286 = vmatprep.subr.mxu0 %v779_v16  ;;  %1357 = vmatprep.subr.mxu1 %v781_v17  ;;  %v938_v16 = vld [vmem:[#allocation2 + $0xc40] sm:$0xf]  ;;  %v940_v17 = vld [vmem:[#allocation2 + $0xc50] sm:$0xf] }
  0xfc   :  { %1287 = vmatpush1.msra.mxu0 %v778_v18  ;;  %1358 = vmatpush1.msra.mxu1 %v780_v19  ;;  %v923_v18 = vld [vmem:[#allocation2 + $0xbc8] sm:$0xff]  ;;  %v925_v19 = vld [vmem:[#allocation2 + $0xbd8] sm:$0xff] }
  0xfd   :  { %1288 = vmatprep.subr.mxu0 %v763_v20  ;;  %1359 = vmatprep.subr.mxu1 %v765_v21  ;;  %v922_v20 = vld [vmem:[#allocation2 + $0xbc0] sm:$0xff]  ;;  %v924_v21 = vld [vmem:[#allocation2 + $0xbd0] sm:$0xff] }
  0xfe   :  { %1289 = vmatpush1.msra.mxu0 %v762_v22  ;;  %1360 = vmatpush1.msra.mxu1 %v764_v23  ;;  %v907_v22 = vld [vmem:[#allocation2 + $0xb48] sm:$0xff]  ;;  %v909_v23 = vld [vmem:[#allocation2 + $0xb58] sm:$0xff] }
  0xff   :  { %1290 = vmatprep.subr.mxu0 %v747_v24  ;;  %1361 = vmatprep.subr.mxu1 %v749_v25  ;;  %v906_v24 = vld [vmem:[#allocation2 + $0xb40] sm:$0xff]  ;;  %v908_v25 = vld [vmem:[#allocation2 + $0xb50] sm:$0xff] }
 0x100   :  { %1291 = vmatpush1.msra.mxu0 %v746_v26  ;;  %1362 = vmatpush1.msra.mxu1 %v748_v27  ;;  %v891_v26 = vld [vmem:[#allocation2 + $0xac8] sm:$0xff]  ;;  %v893_v27 = vld [vmem:[#allocation2 + $0xad8] sm:$0xff] }
 0x101   :  { %1292 = vmatprep.subr.mxu0 %v731_v29  ;;  %1363 = vmatprep.subr.mxu1 %v733_v30  ;;  %v890_v29 = vld [vmem:[#allocation2 + $0xac0] sm:$0xff]  ;;  %v892_v30 = vld [vmem:[#allocation2 + $0xad0] sm:$0xff] }
 0x102   :  { %1293 = vmatpush1.msra.mxu0 %v730_v31  ;;  %1364 = vmatpush1.msra.mxu1 %v732_v32  ;;  %v875_v31 = vld [vmem:[#allocation2 + $0xa48] sm:$0xff]  ;;  %v877_v32 = vld [vmem:[#allocation2 + $0xa58] sm:$0xff] }
 0x103   :  { %1294 = vmatprep.subr.mxu0 %v715_v33  ;;  %1365 = vmatprep.subr.mxu1 %v717_v34  ;;  %v874_v33 = vld [vmem:[#allocation2 + $0xa40] sm:$0xff]  ;;  %v876_v34 = vld [vmem:[#allocation2 + $0xa50] sm:$0xff] }
 0x104   :  { %1295 = vmatpush1.msra.mxu0 %v714_v36  ;;  %1366 = vmatpush1.msra.mxu1 %v716_v37  ;;  %v859_v36 = vld [vmem:[#allocation2 + $0x9c8] sm:$0xff]  ;;  %v861_v37 = vld [vmem:[#allocation2 + $0x9d8] sm:$0xff] }
 0x105   :  { %1296 = vmatprep.subr.mxu0 %v699_v38  ;;  %1367 = vmatprep.subr.mxu1 %v701_v39  ;;  %v858_v38 = vld [vmem:[#allocation2 + $0x9c0] sm:$0xff]  ;;  %v860_v39 = vld [vmem:[#allocation2 + $0x9d0] sm:$0xff] }
 0x106   :  { %1297 = vmatpush1.msra.mxu0 %v698_v40  ;;  %1368 = vmatpush1.msra.mxu1 %v700_v41  ;;  %v843_v40 = vld [vmem:[#allocation2 + $0x948] sm:$0xff]  ;;  %v845_v41 = vld [vmem:[#allocation2 + $0x958] sm:$0xff] }
 0x107   :  { %1298 = vmatprep.subr.mxu0 %v683_v42  ;;  %1369 = vmatprep.subr.mxu1 %v685_v43  ;;  %v842_v42 = vld [vmem:[#allocation2 + $0x940] sm:$0xff]  ;;  %v844_v43 = vld [vmem:[#allocation2 + $0x950] sm:$0xff] }
 0x108   :  { %1299 = vmatpush1.msra.mxu0 %v682_v44  ;;  %1370 = vmatpush1.msra.mxu1 %v684_v45  ;;  %v827_v44 = vld [vmem:[#allocation2 + $0x8c8] sm:$0xff]  ;;  %v829_v45 = vld [vmem:[#allocation2 + $0x8d8] sm:$0xff] }
 0x109   :  { %1300 = vmatprep.subr.mxu0 %v667_v46  ;;  %1371 = vmatprep.subr.mxu1 %v669_v47  ;;  %v826_v46 = vld [vmem:[#allocation2 + $0x8c0] sm:$0xff]  ;;  %v828_v47 = vld [vmem:[#allocation2 + $0x8d0] sm:$0xff] }
 0x10a   :  { %1301 = vmatpush1.msra.mxu0 %v666_v48  ;;  %1372 = vmatpush1.msra.mxu1 %v668_v49  ;;  %v811_v48 = vld [vmem:[#allocation2 + $0x848] sm:$0xff]  ;;  %v813_v49 = vld [vmem:[#allocation2 + $0x858] sm:$0xff] }
 0x10b   :  { %1302 = vmatprep.subr.mxu0 %v651_v50  ;;  %1373 = vmatprep.subr.mxu1 %v653_v51  ;;  %v810_v50 = vld [vmem:[#allocation2 + $0x840] sm:$0xff]  ;;  %v812_v51 = vld [vmem:[#allocation2 + $0x850] sm:$0xff] }
 0x10c   :  { %1303 = vmatpush1.msra.mxu0 %v650_v52  ;;  %1374 = vmatpush1.msra.mxu1 %v652_v53  ;;  %v799_v52 = vld [vmem:[#allocation2 + $0x7e8] sm:$0xff]  ;;  %v801_v53 = vld [vmem:[#allocation2 + $0x7f8] sm:$0xff] }
 0x10d   :  { %1304 = vmatprep.subr.mxu0 %v635_v54  ;;  %1375 = vmatprep.subr.mxu1 %v637_v55  ;;  %v798_v54 = vld [vmem:[#allocation2 + $0x7e0] sm:$0xff]  ;;  %v800_v55 = vld [vmem:[#allocation2 + $0x7f0] sm:$0xff] }
 0x10e   :  { %1305 = vmatpush1.msra.mxu0 %v634_v56  ;;  %1376 = vmatpush1.msra.mxu1 %v636_v57  ;;  %v783_v56 = vld [vmem:[#allocation2 + $0x768] sm:$0xff]  ;;  %v785_v57 = vld [vmem:[#allocation2 + $0x778] sm:$0xff] }
 0x10f   :  { %1306 = vmatprep.subr.mxu0 %v619_v58  ;;  %1377 = vmatprep.subr.mxu1 %v621_v59  ;;  %v782_v58 = vld [vmem:[#allocation2 + $0x760] sm:$0xff]  ;;  %v784_v59 = vld [vmem:[#allocation2 + $0x770] sm:$0xff] }
 0x110   :  { %1307 = vmatpush1.msra.mxu0 %v618_v60  ;;  %1378 = vmatpush1.msra.mxu1 %v620_v61  ;;  %v767_v60 = vld [vmem:[#allocation2 + $0x6e8] sm:$0xff]  ;;  %v769_v61 = vld [vmem:[#allocation2 + $0x6f8] sm:$0xff] }
 0x111   :  { %1308 = vmatprep.subr.mxu0 %v603_v62  ;;  %1379 = vmatprep.subr.mxu1 %v605_v63  ;;  %v766_v62 = vld [vmem:[#allocation2 + $0x6e0] sm:$0xff]  ;;  %v768_v63 = vld [vmem:[#allocation2 + $0x6f0] sm:$0xff] }
 0x112   :  { %1309 = vmatpush1.msra.mxu0 %v602_v0  ;;  %1380 = vmatpush1.msra.mxu1 %v604_v1  ;;  %v751_v0 = vld [vmem:[#allocation2 + $0x668] sm:$0xff]  ;;  %v753_v1 = vld [vmem:[#allocation2 + $0x678] sm:$0xff] }
 0x113   :  { %1310 = vmatprep.subr.mxu0 %v587_v2  ;;  %1381 = vmatprep.subr.mxu1 %v589_v3  ;;  %v752_v2 = vld [vmem:[#allocation2 + $0x670] sm:$0xff]  ;;  %v735_v3 = vld [vmem:[#allocation2 + $0x5e8] sm:$0xff] }
 0x114   :  { %1311 = vmatpush1.msra.mxu0 %v586_v4  ;;  %1382 = vmatpush1.msra.mxu1 %v588_v5  ;;  %v737_v4 = vld [vmem:[#allocation2 + $0x5f8] sm:$0xff]  ;;  %v734_v5 = vld [vmem:[#allocation2 + $0x5e0] sm:$0xff] }
 0x115   :  { %1312 = vmatprep.subr.mxu0 %v571_v6  ;;  %1383 = vmatprep.subr.mxu1 %v573_v7  ;;  %v736_v6 = vld [vmem:[#allocation2 + $0x5f0] sm:$0xff]  ;;  %v719_v7 = vld [vmem:[#allocation2 + $0x568] sm:$0xff] }
 0x116   :  { %1313 = vmatpush1.msra.mxu0 %v570_v8  ;;  %1384 = vmatpush1.msra.mxu1 %v572_v9  ;;  %v721_v8 = vld [vmem:[#allocation2 + $0x578] sm:$0xff]  ;;  %v718_v9 = vld [vmem:[#allocation2 + $0x560] sm:$0xff] }
 0x117   :  { %1314 = vmatprep.subr.mxu0 %v555_v10  ;;  %1385 = vmatprep.subr.mxu1 %v557_v11  ;;  %v720_v10 = vld [vmem:[#allocation2 + $0x570] sm:$0xff]  ;;  %v703_v11 = vld [vmem:[#allocation2 + $0x4e8] sm:$0xff] }
 0x118   :  { %1315 = vmatpush1.msra.mxu0 %v554_v12  ;;  %1386 = vmatpush1.msra.mxu1 %v556_v13  ;;  %v705_v12 = vld [vmem:[#allocation2 + $0x4f8] sm:$0xff]  ;;  %v702_v13 = vld [vmem:[#allocation2 + $0x4e0] sm:$0xff] }
 0x119   :  { %5621 = vmatprep.subr.msk.mxu0 %vm8531_vm0, %v939_v14  ;;  %5624 = vmatprep.subr.msk.mxu1 %vm8531_vm0, %v941_v15  ;;  %v704_v14 = vld [vmem:[#allocation2 + $0x4f0] sm:$0xff]  ;;  %v687_v15 = vld [vmem:[#allocation2 + $0x468] sm:$0xff] }
 0x11a   :  { %5622 = vmatpush2.msk.msra.mxu0 %vm8531_vm0, %v938_v16  ;;  %5625 = vmatpush2.msk.msra.mxu1 %vm8531_vm0, %v940_v17  ;;  %v689_v16 = vld [vmem:[#allocation2 + $0x478] sm:$0xff]  ;;  %v686_v17 = vld [vmem:[#allocation2 + $0x460] sm:$0xff] }
 0x11b   :  { %1332 = vmatprep.subr.mxu0 %v923_v18  ;;  %1403 = vmatprep.subr.mxu1 %v925_v19  ;;  %v688_v18 = vld [vmem:[#allocation2 + $0x470] sm:$0xff]  ;;  %v671_v19 = vld [vmem:[#allocation2 + $0x3e8] sm:$0xff] }
 0x11c   :  { %1333 = vmatpush2.msra.mxu0 %v922_v20  ;;  %1404 = vmatpush2.msra.mxu1 %v924_v21  ;;  %v673_v20 = vld [vmem:[#allocation2 + $0x3f8] sm:$0xff]  ;;  %v670_v21 = vld [vmem:[#allocation2 + $0x3e0] sm:$0xff] }
 0x11d   :  { %1334 = vmatprep.subr.mxu0 %v907_v22  ;;  %1405 = vmatprep.subr.mxu1 %v909_v23  ;;  %v672_v22 = vld [vmem:[#allocation2 + $0x3f0] sm:$0xff]  ;;  %v655_v23 = vld [vmem:[#allocation2 + $0x368] sm:$0xff] }
 0x11e   :  { %1335 = vmatpush2.msra.mxu0 %v906_v24  ;;  %1406 = vmatpush2.msra.mxu1 %v908_v25  ;;  %v657_v24 = vld [vmem:[#allocation2 + $0x378] sm:$0xff]  ;;  %v654_v25 = vld [vmem:[#allocation2 + $0x360] sm:$0xff] }
 0x11f   :  { %1336 = vmatprep.subr.mxu0 %v891_v26  ;;  %1407 = vmatprep.subr.mxu1 %v893_v27  ;;  %v656_v26 = vld [vmem:[#allocation2 + $0x370] sm:$0xff]  ;;  %v639_v27 = vld [vmem:[#allocation2 + $0x2e8] sm:$0xff] }
 0x120   :  { %1337 = vmatpush2.msra.mxu0 %v890_v29  ;;  %1408 = vmatpush2.msra.mxu1 %v892_v30  ;;  %v641_v29 = vld [vmem:[#allocation2 + $0x2f8] sm:$0xff]  ;;  %v638_v30 = vld [vmem:[#allocation2 + $0x2e0] sm:$0xff] }
 0x121   :  { %1338 = vmatprep.subr.mxu0 %v875_v31  ;;  %1409 = vmatprep.subr.mxu1 %v877_v32  ;;  %v640_v31 = vld [vmem:[#allocation2 + $0x2f0] sm:$0xff]  ;;  %v623_v32 = vld [vmem:[#allocation2 + $0x268] sm:$0xff] }
 0x122   :  { %1339 = vmatpush2.msra.mxu0 %v874_v33  ;;  %1410 = vmatpush2.msra.mxu1 %v876_v34  ;;  %v625_v33 = vld [vmem:[#allocation2 + $0x278] sm:$0xff]  ;;  %v622_v34 = vld [vmem:[#allocation2 + $0x260] sm:$0xff] }
 0x123   :  { %1340 = vmatprep.subr.mxu0 %v859_v36  ;;  %1411 = vmatprep.subr.mxu1 %v861_v37  ;;  %v624_v36 = vld [vmem:[#allocation2 + $0x270] sm:$0xff]  ;;  %v607_v37 = vld [vmem:[#allocation2 + $0x1e8] sm:$0xff] }
 0x124   :  { %1341 = vmatpush2.msra.mxu0 %v858_v38  ;;  %1412 = vmatpush2.msra.mxu1 %v860_v39  ;;  %v609_v38 = vld [vmem:[#allocation2 + $0x1f8] sm:$0xff]  ;;  %v606_v39 = vld [vmem:[#allocation2 + $0x1e0] sm:$0xff] }
 0x125   :  { %1342 = vmatprep.subr.mxu0 %v843_v40  ;;  %1413 = vmatprep.subr.mxu1 %v845_v41  ;;  %v608_v40 = vld [vmem:[#allocation2 + $0x1f0] sm:$0xff]  ;;  %v591_v41 = vld [vmem:[#allocation2 + $0x168] sm:$0xff] }
 0x126   :  { %1343 = vmatpush2.msra.mxu0 %v842_v42  ;;  %1414 = vmatpush2.msra.mxu1 %v844_v43  ;;  %v593_v42 = vld [vmem:[#allocation2 + $0x178] sm:$0xff]  ;;  %v590_v43 = vld [vmem:[#allocation2 + $0x160] sm:$0xff] }
 0x127   :  { %1344 = vmatprep.subr.mxu0 %v827_v44  ;;  %1415 = vmatprep.subr.mxu1 %v829_v45  ;;  %v592_v44 = vld [vmem:[#allocation2 + $0x170] sm:$0xff]  ;;  %v575_v45 = vld [vmem:[#allocation2 + $0xe8] sm:$0xff] }
 0x128   :  { %1345 = vmatpush2.msra.mxu0 %v826_v46  ;;  %1416 = vmatpush2.msra.mxu1 %v828_v47  ;;  %v577_v46 = vld [vmem:[#allocation2 + $0xf8] sm:$0xff]  ;;  %v574_v47 = vld [vmem:[#allocation2 + $0xe0] sm:$0xff] }
 0x129   :  { %1346 = vmatprep.subr.mxu0 %v811_v48  ;;  %1417 = vmatprep.subr.mxu1 %v813_v49  ;;  %v576_v48 = vld [vmem:[#allocation2 + $0xf0] sm:$0xff]  ;;  %v559_v49 = vld [vmem:[#allocation2 + $0x68] sm:$0xff] }
 0x12a   :  { %1347 = vmatpush2.msra.mxu0 %v810_v50  ;;  %5623 = vmatprep.mubr.msk.f32.mxu0 %vm948_vm1, %v6721_v35  ;;  %v561_v50 = vld [vmem:[#allocation2 + $0x78] sm:$0xff] }
 0x12b   :  { %1418 = vmatpush2.msra.mxu1 %v812_v51  ;;  %5626 = vmatprep.mubr.msk.f32.mxu1 %vm948_vm1, %v6721_v35  ;;  %v558_v51 = vld [vmem:[#allocation2 + $0x60] sm:$0xff] }
 0x12c   :  { %1349 = vmatmul.mubr.f32.vlgmr.msra.gmra.mxu0 %v6717_v28  ;;  %1420 = vmatmul.mubr.f32.vlgmr.msra.gmra.mxu1 %v6717_v28  ;;  %v750_v28 = vld [vmem:[#allocation2 + $0x660] sm:$0xff] }
 0x12d   :  { %1426 = vmatprep.subr.mxu0 %v799_v52  ;;  %1497 = vmatprep.subr.mxu1 %v801_v53  ;;  %v560_v52 = vld [vmem:[#allocation2 + $0x70] sm:$0xff]  ;;  %v943_v53 = vld [vmem:[#allocation2 + $0xc68] sm:$0xf] }
 0x12e   :  { %1427 = vmatpush1.msra.mxu0 %v798_v54  ;;  %1498 = vmatpush1.msra.mxu1 %v800_v55  ;;  %v945_v54 = vld [vmem:[#allocation2 + $0xc78] sm:$0xf]  ;;  %v942_v55 = vld [vmem:[#allocation2 + $0xc60] sm:$0xf] }
 0x12f   :  { %1428 = vmatprep.subr.mxu0 %v783_v56  ;;  %1499 = vmatprep.subr.mxu1 %v785_v57  ;;  %v944_v56 = vld [vmem:[#allocation2 + $0xc70] sm:$0xf]  ;;  %v927_v57 = vld [vmem:[#allocation2 + $0xbe8] sm:$0xff] }
 0x130   :  { %1429 = vmatpush1.msra.mxu0 %v782_v58  ;;  %1500 = vmatpush1.msra.mxu1 %v784_v59  ;;  %v929_v58 = vld [vmem:[#allocation2 + $0xbf8] sm:$0xff]  ;;  %v926_v59 = vld [vmem:[#allocation2 + $0xbe0] sm:$0xff] }
 0x131   :  { %1430 = vmatprep.subr.mxu0 %v767_v60  ;;  %1501 = vmatprep.subr.mxu1 %v769_v61  ;;  %v928_v60 = vld [vmem:[#allocation2 + $0xbf0] sm:$0xff]  ;;  %v911_v61 = vld [vmem:[#allocation2 + $0xb68] sm:$0xff] }
 0x132   :  { %1431 = vmatpush1.msra.mxu0 %v766_v62  ;;  %1502 = vmatpush1.msra.mxu1 %v768_v63  ;;  %v913_v62 = vld [vmem:[#allocation2 + $0xb78] sm:$0xff]  ;;  %v187_v63 = vlaneseq }
 0x133   :  { %1432 = vmatprep.subr.mxu0 %v751_v0  ;;  %1503 = vmatprep.subr.mxu1 %v753_v1  ;;  %v910_v0 = vld [vmem:[#allocation2 + $0xb60] sm:$0xff]  ;;  %v912_v1 = vld [vmem:[#allocation2 + $0xb70] sm:$0xff] }
 0x134   :  { %1433 = vmatpush1.msra.mxu0 %v750_v28  ;;  %1504 = vmatpush1.msra.mxu1 %v752_v2  ;;  %v895_v28 = vld [vmem:[#allocation2 + $0xae8] sm:$0xff]  ;;  %v897_v2 = vld [vmem:[#allocation2 + $0xaf8] sm:$0xff] }
 0x135   :  { %1434 = vmatprep.subr.mxu0 %v735_v3  ;;  %1505 = vmatprep.subr.mxu1 %v737_v4  ;;  %v894_v3 = vld [vmem:[#allocation2 + $0xae0] sm:$0xff]  ;;  %v896_v4 = vld [vmem:[#allocation2 + $0xaf0] sm:$0xff] }
 0x136   :  { %1435 = vmatpush1.msra.mxu0 %v734_v5  ;;  %1506 = vmatpush1.msra.mxu1 %v736_v6  ;;  %v879_v5 = vld [vmem:[#allocation2 + $0xa68] sm:$0xff]  ;;  %v881_v6 = vld [vmem:[#allocation2 + $0xa78] sm:$0xff] }
 0x137   :  { %1436 = vmatprep.subr.mxu0 %v719_v7  ;;  %1507 = vmatprep.subr.mxu1 %v721_v8  ;;  %v6753_v7 = vand.u32 127, %v187_v63  ;;  %v878_v8 = vld [vmem:[#allocation2 + $0xa60] sm:$0xff] }
 0x138   :  { %1437 = vmatpush1.msra.mxu0 %v718_v9  ;;  %1508 = vmatpush1.msra.mxu1 %v720_v10  ;;  %v880_v9 = vld [vmem:[#allocation2 + $0xa70] sm:$0xff]  ;;  %v863_v10 = vld [vmem:[#allocation2 + $0x9e8] sm:$0xff] }
 0x139   :  { %1438 = vmatprep.subr.mxu0 %v703_v11  ;;  %1509 = vmatprep.subr.mxu1 %v705_v12  ;;  %8705 = vst [vmem:[#allocation28_spill] sm:$0xff] %v6753_v7  ;;  %v865_v11 = vld [vmem:[#allocation2 + $0x9f8] sm:$0xff]  ;;  %v862_v12 = vld [vmem:[#allocation2 + $0x9e0] sm:$0xff] }
 0x13a   :  { %1439 = vmatpush1.msra.mxu0 %v702_v13  ;;  %1510 = vmatpush1.msra.mxu1 %v704_v14  ;;  %v864_v13 = vld [vmem:[#allocation2 + $0x9f0] sm:$0xff]  ;;  %v847_v14 = vld [vmem:[#allocation2 + $0x968] sm:$0xff] }
 0x13b   :  { %1440 = vmatprep.subr.mxu0 %v687_v15  ;;  %1511 = vmatprep.subr.mxu1 %v689_v16  ;;  %v849_v15 = vld [vmem:[#allocation2 + $0x978] sm:$0xff]  ;;  %v6756_v16 = vadd.s32 128, %v6753_v7 }
 0x13c   :  { %1441 = vmatpush1.msra.mxu0 %v686_v17  ;;  %1512 = vmatpush1.msra.mxu1 %v688_v18  ;;  %v528_v17 = vadd.s32 384, %v6753_v7  ;;  %v846_v18 = vld [vmem:[#allocation2 + $0x960] sm:$0xff] }
 0x13d   :  { %1442 = vmatprep.subr.mxu0 %v671_v19  ;;  %1513 = vmatprep.subr.mxu1 %v673_v20  ;;  %8706 = vst [vmem:[#allocation29_spill] sm:$0xff] %v6756_v16  ;;  %v848_v19 = vld [vmem:[#allocation2 + $0x970] sm:$0xff]  ;;  %v831_v20 = vld [vmem:[#allocation2 + $0x8e8] sm:$0xff] }
 0x13e   :  { %1443 = vmatpush1.msra.mxu0 %v670_v21  ;;  %1514 = vmatpush1.msra.mxu1 %v672_v22  ;;  %v833_v21 = vld [vmem:[#allocation2 + $0x8f8] sm:$0xff]  ;;  %v527_v22 = vadd.s32 256, %v6753_v7 }
 0x13f   :  { %1444 = vmatprep.subr.mxu0 %v655_v23  ;;  %1515 = vmatprep.subr.mxu1 %v657_v24  ;;  %v830_v23 = vld [vmem:[#allocation2 + $0x8e0] sm:$0xff]  ;;  %v832_v24 = vld [vmem:[#allocation2 + $0x8f0] sm:$0xff] }
 0x140   :  { %1445 = vmatpush1.msra.mxu0 %v654_v25  ;;  %1516 = vmatpush1.msra.mxu1 %v656_v26  ;;  %v815_v25 = vld [vmem:[#allocation2 + $0x868] sm:$0xff]  ;;  %v817_v26 = vld [vmem:[#allocation2 + $0x878] sm:$0xff] }
 0x141   :  { %1446 = vmatprep.subr.mxu0 %v639_v27  ;;  %1517 = vmatprep.subr.mxu1 %v641_v29  ;;  %v6760_v27 = vshrl.u32 %v187_v63, 7  ;;  %v530_v29 = vand.u32 7, %v6756_v16 }
 0x142   :  { %1447 = vmatpush1.msra.mxu0 %v638_v30  ;;  %1518 = vmatpush1.msra.mxu1 %v640_v31  ;;  %v532_v30 = vand.u32 7, %v528_v17  ;;  %v814_v31 = vld [vmem:[#allocation2 + $0x860] sm:$0xff] }
 0x143   :  { %1448 = vmatprep.subr.mxu0 %v623_v32  ;;  %1519 = vmatprep.subr.mxu1 %v625_v33  ;;  %8707 = vst [vmem:[#allocation30_spill] sm:$0xff] %v6760_v27  ;;  %v529_v32 = vand.u32 7, %v6753_v7  ;;  %v816_v33 = vld [vmem:[#allocation2 + $0x870] sm:$0xff]  ;;  %vm6767_vm2 = vcmp.eq.s32.totalorder %v530_v29, %v6760_v27  ;;  %v257_v16 = vadd.s32 408, %v6760_v27 }
 0x144   :  { %1449 = vmatpush1.msra.mxu0 %v622_v34  ;;  %1520 = vmatpush1.msra.mxu1 %v624_v36  ;;  %v531_v34 = vand.u32 7, %v527_v22  ;;  %v8708_v36 = vmov 0  ;;  %vm6772_vm3 = vcmp.eq.s32.totalorder %v532_v30, %v6760_v27 }
 0x145   :  { %1450 = vmatprep.subr.mxu0 %v607_v37  ;;  %1521 = vmatprep.subr.mxu1 %v609_v38  ;;  %v8709_v36 = vsel %vm6767_vm2, 4294967295, %v8708_v36  ;;  %v8711_v37 = vmov 0  ;;  %vm6779_vm4 = vcmp.eq.s32.totalorder %v529_v32, %v6760_v27  ;;  %v8714_v38 = vmov 0 }
 0x146   :  { %1451 = vmatpush1.msra.mxu0 %v606_v39  ;;  %1522 = vmatpush1.msra.mxu1 %v608_v40  ;;  %8710 = vst [vmem:[#allocation31_spill] sm:$0xff] %v8709_v36  ;;  %v8712_v37 = vsel %vm6772_vm3, 4294967295, %v8711_v37  ;;  %v8715_v38 = vsel %vm6779_vm4, 4294967295, %v8714_v38  ;;  %v6313_v39 = vld [vmem:[%s8704_s19] sm:$0xff]  ;;  %vm6787_vm5 = vcmp.eq.s32.totalorder %v531_v34, %v6760_v27  ;;  %v8717_v40 = vmov 0 }
 0x147   :  { %1452 = vmatprep.subr.mxu0 %v591_v41  ;;  %1523 = vmatprep.subr.mxu1 %v593_v42  ;;  %8713 = vst [vmem:[#allocation32_spill] sm:$0xff] %v8712_v37  ;;  %8716 = vst [vmem:[#allocation33_spill] sm:$0xff] %v8715_v38  ;;  %v8718_v40 = vsel %vm6787_vm5, 4294967295, %v8717_v40  ;;  %v8682_v41 = vmov 1.0   ;;  %v8548_v42 = vmov 0.0   ;;  %v6833_v34 = vadd.s32 248, %v6760_v27 }
 0x148   :  { %1453 = vmatpush1.msra.mxu0 %v590_v43  ;;  %1524 = vmatpush1.msra.mxu1 %v592_v44  ;;  %8719 = vst [vmem:[#allocation34_spill] sm:$0xff] %v8718_v40  ;;  %v7314_v38 = vadd.s32 24, %v6760_v27  ;;  %v7334_v37 = vadd.s32 144, %v6760_v27  ;;  %v256_v36 = vadd.s32 400, %v6760_v27 }
 0x149   :  { %1454 = vmatprep.subr.mxu0 %v575_v45  ;;  %1525 = vmatprep.subr.mxu1 %v577_v46  ;;  %8721 = vst [vmem:[#allocation36_spill] sm:$0xff] %v6833_v34 }
 0x14a   :  { %1455 = vmatpush1.msra.mxu0 %v574_v47  ;;  %1526 = vmatpush1.msra.mxu1 %v576_v48  ;;  %8857 = vst [vmem:[#allocation73_spill] sm:$0xff] %v7314_v38  ;;  %8862 = vst [vmem:[#allocation74_spill] sm:$0xff] %v7334_v37 }
 0x14b   :  { %1456 = vmatprep.subr.mxu0 %v559_v49  ;;  %1527 = vmatprep.subr.mxu1 %v561_v50 }
 0x14c   :  { %1457 = vmatpush1.msra.mxu0 %v558_v51  ;;  %1528 = vmatpush1.msra.mxu1 %v560_v52 }
 0x14d   :  { %5627 = vmatprep.subr.msk.mxu0 %vm8531_vm0, %v943_v53  ;;  %5630 = vmatprep.subr.msk.mxu1 %vm8531_vm0, %v945_v54 }
 0x14e   :  { %5628 = vmatpush2.msk.msra.mxu0 %vm8531_vm0, %v942_v55  ;;  %5631 = vmatpush2.msk.msra.mxu1 %vm8531_vm0, %v944_v56 }
 0x14f   :  { %1474 = vmatprep.subr.mxu0 %v927_v57  ;;  %1545 = vmatprep.subr.mxu1 %v929_v58 }
 0x150   :  { %1475 = vmatpush2.msra.mxu0 %v926_v59  ;;  %1546 = vmatpush2.msra.mxu1 %v928_v60  ;;  %v6810_v59 = vsub.s32 0, %v6760_v27 }
 0x151   :  { %1476 = vmatprep.subr.mxu0 %v911_v61  ;;  %1547 = vmatprep.subr.mxu1 %v913_v62 }
 0x152   :  { %1477 = vmatpush2.msra.mxu0 %v910_v0  ;;  %1548 = vmatpush2.msra.mxu1 %v912_v1  ;;  %8720 = vst [vmem:[#allocation35_spill] sm:$0xff] %v6810_v59 }
 0x153   :  { %1478 = vmatprep.subr.mxu0 %v895_v28  ;;  %1549 = vmatprep.subr.mxu1 %v897_v2 }
 0x154   :  { %1479 = vmatpush2.msra.mxu0 %v894_v3  ;;  %1550 = vmatpush2.msra.mxu1 %v896_v4 }
 0x155   :  { %1480 = vmatprep.subr.mxu0 %v879_v5  ;;  %1551 = vmatprep.subr.mxu1 %v881_v6 }
 0x156   :  { %1481 = vmatpush2.msra.mxu0 %v878_v8  ;;  %1552 = vmatpush2.msra.mxu1 %v880_v9 }
 0x157   :  { %1482 = vmatprep.subr.mxu0 %v863_v10  ;;  %1553 = vmatprep.subr.mxu1 %v865_v11 }
 0x158   :  { %1483 = vmatpush2.msra.mxu0 %v862_v12  ;;  %1554 = vmatpush2.msra.mxu1 %v864_v13  ;;  %v193_v12 = vadd.s32 1, %v6760_v27 }
 0x159   :  { %1484 = vmatprep.subr.mxu0 %v847_v14  ;;  %1555 = vmatprep.subr.mxu1 %v849_v15 }
 0x15a   :  { %1485 = vmatpush2.msra.mxu0 %v846_v18  ;;  %1556 = vmatpush2.msra.mxu1 %v848_v19  ;;  %v194_v29 = vmul.u32 2, %v193_v12 }
 0x15b   :  { %1486 = vmatprep.subr.mxu0 %v831_v20  ;;  %1557 = vmatprep.subr.mxu1 %v833_v21 }
 0x15c   :  { %1487 = vmatpush2.msra.mxu0 %v830_v23  ;;  %1558 = vmatpush2.msra.mxu1 %v832_v24  ;;  %vm195_vm8 = vcmp.lt.s32.totalorder %v6753_v7, %v194_v29  ;;  %v8732_v29 = vmov 0 }
 0x15d   :  { %1488 = vmatprep.subr.mxu0 %v815_v25  ;;  %1559 = vmatprep.subr.mxu1 %v817_v26  ;;  %v191_v26 = vmul.u32 2, %v6760_v27 }
 0x15e   :  { %1489 = vmatpush2.msra.mxu0 %v814_v31  ;;  %5629 = vmatprep.mubr.msk.f32.mxu0 %vm948_vm1, %v6721_v35 }
 0x15f   :  { %1560 = vmatpush2.msra.mxu1 %v816_v33  ;;  %5632 = vmatprep.mubr.msk.f32.mxu1 %vm948_vm1, %v6721_v35  ;;  %v1580_v35 = vld [vmem:[#allocation7] sm:$0x1]  ;;  %vm192_vm7 = vcmp.ge.s32.totalorder %v6753_v7, %v191_v26 }
 0x160   :  { %1491 = vmatmul.mubr.f32.vlgmr.msra.gmra.mxu0 %v6313_v39  ;;  %1562 = vmatmul.mubr.f32.vlgmr.msra.gmra.mxu1 %v6313_v39  ;;  %v269_v39 = vadd.s32 504, %v6760_v27  ;;  %vm196_vm9 = vmand %vm192_vm7, %vm195_vm8 }
 0x161   :  { %5633 = vmatprep.subr.msk.mxu0 %vm6767_vm2, %v8682_v41  ;;  %5636 = vmatprep.subr.msk.mxu1 %vm6772_vm3, %v8682_v41  ;;  %vm8767_vm2 = vcmask 1043456  }
 0x162   :  { %5634 = vmatpush1.msk.msra.mxu0 %vm6779_vm4, %v8682_v41  ;;  %1649 = vmatprep.mubr.f32.mxu0 %v8548_v42 }
 0x163   :  { %5637 = vmatpush1.msk.msra.mxu1 %vm6787_vm5, %v8682_v41  ;;  %1720 = vmatprep.mubr.f32.mxu1 %v8548_v42 }
 0x164   :  { %5635 = vmatmul.mubr.msk.f32.vlgmr.msra.gmra.mxu0 %vm8530_vm6, %v1580_v35  ;;  %5638 = vmatmul.mubr.msk.f32.vlgmr.msra.gmra.mxu1 %vm8530_vm6, %v1580_v35  ;;  %v6837_v35 = vadd.s32 120, %v6760_v27 }
 0x165   :  { %1861 = vmatprep.mubr.f32.mxu0 %v8548_v42  ;;  %1932 = vmatprep.mubr.f32.mxu1 %v8548_v42 }
 0x166   :  { %8722 = vst [vmem:[#allocation37_spill] sm:$0xff] %v6837_v35 }
 0x184   :  { %v1066_v43 = vpop.f32.mrf.mxu0  ;;  %v1137_v44 = vpop.f32.mrf.mxu1 }
 0x186   :  { %v1068_v45 = vpop.f32.mrf.mxu0  ;;  %v1139_v46 = vpop.f32.mrf.mxu1 }
 0x1b8   :  { %v1208_v47 = vpop.f32.mrf.mxu0  ;;  %v1279_v48 = vpop.f32.mrf.mxu1 }
 0x1b9   :  { %v1568_v62 = vmax.f32 %v1066_v43, %v1208_v47  ;;  %v1570_v63 = vmax.f32 %v1137_v44, %v1279_v48  ;;  %v253_v43 = vadd.s32 376, %v6760_v27  ;;  %v6841_v44 = vadd.s32 240, %v6760_v27 }
 0x1ba   :  { %v1210_v49 = vpop.f32.mrf.mxu0  ;;  %v1281_v50 = vpop.f32.mrf.mxu1  ;;  %v301_v47 = vand.u32 7, %v6833_v34  ;;  %v6849_v48 = vadd.s32 368, %v6760_v27 }
 0x1bb   :  { %v1569_v8 = vmax.f32 %v1068_v45, %v1210_v49  ;;  %v1571_v9 = vmax.f32 %v1139_v46, %v1281_v50  ;;  %8723 = vst [vmem:[#allocation38_spill] sm:$0xff] %v6841_v44  ;;  %v268_v45 = vadd.s32 496, %v6760_v27  ;;  %v6845_v46 = vadd.s32 112, %v6760_v27 }
 0x1bc   :  { %v6852_v49 = vsel %vm196_vm9, 1.0, %v8548_v42  ;;  %v333_v50 = vand.u32 7, %v269_v39  ;;  %vm6909_vm11 = vcmp.eq.s32.totalorder %v301_v47, %v6753_v7  ;;  %v8736_v47 = vmov 0 }
 0x1bd   :  { %8724 = vst [vmem:[#allocation39_spill] sm:$0xff] %v6845_v46  ;;  %v8733_v29 = vsel %vm6909_vm11, 4294967295, %v8732_v29  ;;  %v246_v42 = vadd.s32 320, %v6760_v27 }
 0x1be   :  { %vm6917_vm12 = vcmp.eq.s32.totalorder %v333_v50, %v6753_v7  ;;  %v8740_v50 = vmov 0 }
 0x1ec   :  { %v1350_v51 = vpop.f32.mrf.mxu0  ;;  %v1421_v52 = vpop.f32.mrf.mxu1 }
 0x1ee   :  { %v1352_v53 = vpop.f32.mrf.mxu0  ;;  %v1423_v54 = vpop.f32.mrf.mxu1 }
 0x220   :  { %v1492_v55 = vpop.f32.mrf.mxu0  ;;  %v1563_v56 = vpop.f32.mrf.mxu1 }
 0x221   :  { %v1572_v57 = vmax.f32 %v1350_v51, %v1492_v55  ;;  %v1574_v58 = vmax.f32 %v1421_v52, %v1563_v56  ;;  %v285_v51 = vand.u32 7, %v6837_v35  ;;  %v6856_v52 = vadd.s32 232, %v6760_v27 }
 0x222   :  { %v1494_v60 = vpop.f32.mrf.mxu0  ;;  %v1565_v61 = vpop.f32.mrf.mxu1  ;;  %v6860_v55 = vadd.s32 488, %v6760_v27  ;;  %v6863_v56 = vadd.s32 104, %v6760_v27  ;;  %v8824_v35 = vmov 0 }
 0x223   :  { %v1573_v0 = vmax.f32 %v1352_v53, %v1494_v60  ;;  %v1575_v1 = vmax.f32 %v1423_v54, %v1565_v61  ;;  %v1576_v3 = vmax.f32 %v1568_v62, %v1572_v57  ;;  %v1578_v4 = vmax.f32 %v1570_v63, %v1574_v58  ;;  %8725 = vst [vmem:[#allocation40_spill] sm:$0xff] %v6856_v52 }
 0x224   :  { %v1651_v28 = vpop.f32.mrf.mxu0  ;;  %v1722_v2 = vpop.f32.mrf.mxu1  ;;  %v317_v53 = vand.u32 7, %v253_v43  ;;  %v300_v54 = vand.u32 7, %v6841_v44  ;;  %8726 = vst [vmem:[#allocation41_spill] sm:$0xff] %v6863_v56  ;;  %v332_v57 = vand.u32 7, %v268_v45  ;;  %v284_v58 = vand.u32 7, %v6845_v46 }
 0x225   :  { %v1730_v5 = vrot.slane %v1651_v28, %v6810_v59  ;;  %v1738_v6 = vrot.slane %v1722_v2, %v6810_v59  ;;  %v1577_v18 = vmax.f32 %v1569_v8, %v1573_v0  ;;  %v1579_v19 = vmax.f32 %v1571_v9, %v1575_v1 }
 0x226   :  { %v1653_v10 = vpop.f32.mrf.mxu0  ;;  %v1724_v11 = vpop.f32.mrf.mxu1  ;;  %v6867_v60 = vadd.s32 360, %v6760_v27  ;;  %v6870_v61 = vadd.s32 224, %v6760_v27  ;;  %v316_v62 = vand.u32 7, %v6849_v48  ;;  %v6874_v63 = vadd.s32 480, %v6760_v27 }
 0x227   :  { %v6815_v13 = vadd.f32 %v1730_v5, %v1576_v3  ;;  %v6817_v14 = vadd.f32 %v1738_v6, %v1578_v4  ;;  %v1734_v15 = vrot.slane %v1653_v10, %v6810_v59  ;;  %v1742_v17 = vrot.slane %v1724_v11, %v6810_v59 }
 0x228   :  { %8727 = vst [vmem:[#allocation42_spill] sm:$0xff] %v6870_v61  ;;  %v6877_v0 = vadd.s32 96, %v6760_v27  ;;  %v6880_v1 = vadd.s32 352, %v6760_v27  ;;  %v299_v28 = vand.u32 7, %v6856_v52  ;;  %v6884_v2 = vadd.s32 216, %v6760_v27 }
 0x229   :  { %v1751_v20 = vmin.f32 %v6815_v13, 0.0  ;;  %v1753_v21 = vmin.f32 %v6817_v14, 0.0  ;;  %v6823_v22 = vadd.f32 %v1734_v15, %v1577_v18  ;;  %v6825_v23 = vadd.f32 %v1742_v17, %v1579_v19 }
 0x22a   :  { %8728 = vst [vmem:[#allocation43_spill] sm:$0xff] %v6877_v0  ;;  %8729 = vst [vmem:[#allocation44_spill] sm:$0xff] %v6884_v2  ;;  %v6887_v3 = vadd.s32 472, %v6760_v27  ;;  %v6890_v4 = vadd.s32 88, %v6760_v27  ;;  %v331_v6 = vand.u32 7, %v6860_v55  ;;  %v283_v8 = vand.u32 7, %v6863_v56 }
 0x22b   :  { %v1755_v24 = vmul.f32 1.442695, %v1751_v20  ;;  %v1759_v25 = vmul.f32 1.442695, %v1753_v21  ;;  %v1752_v30 = vmin.f32 %v6823_v22, 0.0  ;;  %v1754_v31 = vmin.f32 %v6825_v23, 0.0 }
 0x22c   :  { %8730 = vst [vmem:[#allocation45_spill] sm:$0xff] %v6890_v4  ;;  %v6895_v9 = vadd.s32 344, %v6760_v27  ;;  %v6898_v10 = vadd.s32 208, %v6760_v27  ;;  %v315_v15 = vand.u32 7, %v6867_v60  ;;  %v298_v17 = vand.u32 7, %v6870_v61 }
 0x22d   :  { %6297 = vpow2.f32 %v1755_v24  ;;  %v1757_v32 = vmul.f32 1.442695, %v1752_v30  ;;  %v1761_v33 = vmul.f32 1.442695, %v1754_v31  ;;  %v6903_v18 = vadd.s32 464, %v6760_v27 }
 0x22e   :  { %6299 = vpow2.f32 %v1759_v25  ;;  %8731 = vst [vmem:[#allocation46_spill] sm:$0xff] %v6898_v10  ;;  %v330_v20 = vand.u32 7, %v6874_v63  ;;  %v282_v21 = vand.u32 7, %v6877_v0  ;;  %v314_v24 = vand.u32 7, %v6880_v1 }
 0x22f   :  { %6301 = vpow2.f32 %v1757_v32  ;;  %v297_v30 = vand.u32 7, %v6884_v2  ;;  %v329_v31 = vand.u32 7, %v6887_v3  ;;  %v281_v32 = vand.u32 7, %v6890_v4 }
 0x230   :  { %6303 = vpow2.f32 %v1761_v33  ;;  %v8734_v45 = vmov 0  ;;  %vm6922_vm13 = vcmp.eq.s32.totalorder %v285_v51, %v6753_v7  ;;  %v313_v48 = vand.u32 7, %v6895_v9 }
 0x231   :  { %v8735_v45 = vsel %vm6917_vm12, 4294967295, %v8734_v45  ;;  %v8737_v47 = vsel %vm6922_vm13, 4294967295, %v8736_v47  ;;  %v296_v55 = vand.u32 7, %v6898_v10  ;;  %vm6929_vm14 = vcmp.eq.s32.totalorder %v317_v53, %v6753_v7 }
 0x232   :  { %v8738_v63 = vmov 0  ;;  %vm6934_vm15 = vcmp.eq.s32.totalorder %v300_v54, %v6753_v7  ;;  %v328_v51 = vand.u32 7, %v6903_v18  ;;  %v6940_v1 = vadd.s32 80, %v6760_v27 }
 0x233   :  { %v8739_v63 = vsel %vm6929_vm14, 4294967295, %v8738_v63  ;;  %v8741_v50 = vsel %vm6934_vm15, 4294967295, %v8740_v50  ;;  %v248_v3 = vadd.s32 336, %v6760_v27  ;;  %vm1747_vm1 = vcmp.gt.f32.partialorder %v6815_v13, 0.0 }
 0x234   :  { %8742 = vst [vmem:[#allocation47_spill] sm:$0xff] %v6940_v1  ;;  %vm6945_vm7 = vcmp.eq.s32.totalorder %v332_v57, %v6753_v7  ;;  %v8743_v53 = vmov 0  ;;  %vm6950_vm8 = vcmp.eq.s32.totalorder %v284_v58, %v6753_v7  ;;  %v8745_v54 = vmov 0 }
 0x235   :  { %v8744_v53 = vsel %vm6945_vm7, 4294967295, %v8743_v53  ;;  %v8746_v54 = vsel %vm6950_vm8, 4294967295, %v8745_v54  ;;  %v6955_v9 = vadd.s32 200, %v6760_v27  ;;  %vm1749_vm9 = vcmp.gt.f32.partialorder %v6817_v14, 0.0 }
 0x236   :  { %vm1748_vm6 = vcmp.gt.f32.partialorder %v6823_v22, 0.0  ;;  %vm6962_vm10 = vcmp.eq.s32.totalorder %v316_v62, %v6753_v7  ;;  %v8748_v18 = vmov 0  ;;  %vm6967_vm0 = vcmp.eq.s32.totalorder %v299_v28, %v6753_v7 }
 0x237   :  { %8747 = vst [vmem:[#allocation48_spill] sm:$0xff] %v6955_v9  ;;  %v8749_v18 = vsel %vm6962_vm10, 4294967295, %v8748_v18  ;;  %v8750_v58 = vmov 0  ;;  %vm6975_vm5 = vcmp.eq.s32.totalorder %v331_v6, %v6753_v7  ;;  %vm6980_vm4 = vcmp.eq.s32.totalorder %v283_v8, %v6753_v7 }
 0x238   :  { %v8751_v58 = vsel %vm6967_vm0, 4294967295, %v8750_v58  ;;  %v8754_v62 = vmov 0  ;;  %v6985_v28 = vadd.s32 72, %v6760_v27  ;;  %v8760_v6 = vmov 0 }
 0x239   :  { %v8755_v62 = vsel %vm6980_vm4, 4294967295, %v8754_v62  ;;  %v247_v8 = vadd.s32 328, %v6760_v27  ;;  %vm7014_vm3 = vcmp.eq.s32.totalorder %v282_v21, %v6753_v7  ;;  %v8770_v21 = vmov 0 }
 0x23a   :  { %v6298_v5 = vpop.eup %6297  ;;  %8756 = vst [vmem:[#allocation49_spill] sm:$0xff] %v6985_v28  ;;  %v261_v59 = vadd.s32 440, %v6760_v27  ;;  %v7157_v10 = vadd.s32 48, %v6760_v27  ;;  %v244_v2 = vadd.s32 304, %v6760_v27  ;;  %v8810_v0 = vmov 0 }
 0x23b   :  { %v6300_v11 = vpop.eup %6299  ;;  %v5639_v12 = vadd.f32 -1.0, %v6298_v5  ;;  %v7184_v61 = vadd.s32 40, %v6760_v27  ;;  %v243_v52 = vadd.s32 296, %v6760_v27  ;;  %v8819_v46 = vmov 0 }
 0x23c   :  { %v5641_v19 = vadd.f32 -1.0, %v6300_v11  ;;  %v6302_v25 = vpop.eup %6301  ;;  %v263_v11 = vadd.s32 456, %v6760_v27  ;;  %8806 = vst [vmem:[#allocation56_spill] sm:$0xff] %v7157_v10  ;;  %v258_v44 = vadd.s32 416, %v6760_v27 }
 0x23d   :  { %v1767_v26 = vmul.f32 1.6732632, %v5639_v12  ;;  %v6304_v33 = vpop.eup %6303  ;;  %v5640_v43 = vadd.f32 -1.0, %v6302_v25  ;;  %8813 = vst [vmem:[#allocation59_spill] sm:$0xff] %v7184_v61  ;;  %v275_v34 = vand.u32 7, %v7184_v61  ;;  %v307_v61 = vand.u32 7, %v243_v52 }
 0x23e   :  { %v1769_v39 = vmul.f32 1.6732632, %v5641_v19  ;;  %v5642_v60 = vadd.f32 -1.0, %v6304_v33  ;;  %v7002_v33 = vadd.s32 192, %v6760_v27  ;;  %v322_v52 = vand.u32 7, %v258_v44 }
 0x23f   :  { %v1768_v5 = vmul.f32 1.6732632, %v5640_v43  ;;  %v1771_v12 = vsel %vm1747_vm1, %v6815_v13, %v1767_v26  ;;  %vm1750_vm1 = vcmp.gt.f32.partialorder %v6825_v23, 0.0  ;;  %v8752_v13 = vmov 0 }
 0x240   :  { %v1770_v57 = vmul.f32 1.6732632, %v5642_v60  ;;  %v1773_v19 = vsel %vm1749_vm9, %v6817_v14, %v1769_v39  ;;  %v8753_v13 = vsel %vm6975_vm5, 4294967295, %v8752_v13  ;;  %vm6996_vm9 = vcmp.eq.s32.totalorder %v298_v17, %v6753_v7  ;;  %8762 = vst [vmem:[#allocation51_spill] sm:$0xff] %v7002_v33 }
 0x241   :  { %v1772_v25 = vsel %vm1748_vm6, %v6823_v22, %v1768_v5  ;;  %vm6991_vm6 = vcmp.eq.s32.totalorder %v315_v15, %v6753_v7  ;;  %v8758_v22 = vmov 0  ;;  %v8761_v6 = vsel %vm6996_vm9, 4294967295, %v8760_v6 }
 0x242   :  { %v6987_v26 = vmul.f32 1.050701, %v1772_v25  ;;  %v1774_v14 = vsel %vm1750_vm1, %v6825_v23, %v1770_v57  ;;  %v8759_v22 = vsel %vm6991_vm6, 4294967295, %v8758_v22  ;;  %v7004_v39 = vmul.f32 1.050701, %v1771_v12  ;;  %vm8773_vm6 = vmmov %vm8767_vm2 }
 0x243   :  { %v7006_v43 = vmul.f32 1.050701, %v1774_v14  ;;  %vm7009_vm1 = vcmp.eq.s32.totalorder %v330_v20, %v6753_v7  ;;  %v8763_v23 = vmov 0  ;;  %v8765_v15 = vmov 0 }
 0x244   :  { %8757 = vst [vmem:[#allocation50_spill] sm:$0xff] %v6987_v26  ;;  %v8764_v23 = vsel %vm7009_vm1, 4294967295, %v8763_v23  ;;  %v8766_v15 = vsel %vm7014_vm3, 4294967295, %v8765_v15  ;;  %v280_v17 = vand.u32 7, %v6940_v1  ;;  %v262_v60 = vadd.s32 448, %v6760_v27  ;;  %5643 = vmatprep.subr.msk.mxu0 %vm8767_vm2, %v6987_v26  ;;  %vm8772_vm3 = vmmov %vm8767_vm2 }
 0x245   :  { %v7020_v5 = vmul.f32 1.050701, %v1773_v19  ;;  %vm7025_vm9 = vcmp.eq.s32.totalorder %v314_v24, %v6753_v7  ;;  %v8768_v20 = vmov 0  ;;  %vm7030_vm1 = vcmp.eq.s32.totalorder %v297_v30, %v6753_v7  ;;  %5646 = vmatprep.subr.msk.mxu1 %vm8772_vm3, %v7006_v43  ;;  %5644 = vmatpush1.msk.msra.mxu0 %vm8773_vm6, %v7004_v39 }
 0x246   :  { %v8769_v20 = vsel %vm7025_vm9, 4294967295, %v8768_v20  ;;  %v8771_v21 = vsel %vm7030_vm1, 4294967295, %v8770_v21  ;;  %v312_v12 = vand.u32 7, %v248_v3  ;;  %v295_v57 = vand.u32 7, %v6955_v9  ;;  %5955 = vmatprep.subr.msk.mxu0 %vm6909_vm11, %v8682_v41 }
 0x247   :  { %vm7040_vm2 = vcmp.eq.s32.totalorder %v329_v31, %v6753_v7  ;;  %v8774_v24 = vmov 0  ;;  %vm7045_vm9 = vcmp.eq.s32.totalorder %v281_v32, %v6753_v7  ;;  %v8776_v30 = vmov 0  ;;  %5647 = vmatpush1.msk.msra.mxu1 %vm8772_vm3, %v7020_v5 }
 0x248   :  { %v8775_v24 = vsel %vm7040_vm2, 4294967295, %v8774_v24  ;;  %v8777_v30 = vsel %vm7045_vm9, 4294967295, %v8776_v30  ;;  %v327_v19 = vand.u32 7, %v263_v11  ;;  %v279_v3 = vand.u32 7, %v6985_v28  ;;  %5990 = vmatprep.subr.msk.mxu1 %vm6917_vm12, %v8682_v41 }
 0x249   :  { %v7051_v25 = vadd.s32 64, %v6760_v27  ;;  %vm8779_vm6 = vcmask 31744   ;;  %vm7058_vm1 = vcmp.eq.s32.totalorder %v313_v48, %v6753_v7  ;;  %v8780_v31 = vmov 0 }
 0x24a   :  { %5645 = vmatmul.mubr.msk.f32.vlgmr.msra.gmra.mxu0 %vm8779_vm6, %v6852_v49  ;;  %v8781_v31 = vsel %vm7058_vm1, 4294967295, %v8780_v31  ;;  %vm7063_vm2 = vcmp.eq.s32.totalorder %v296_v55, %v6753_v7  ;;  %v8782_v32 = vmov 0  ;;  %v311_v11 = vand.u32 7, %v247_v8  ;;  %vm8784_vm9 = vmmov %vm8779_vm6 }
 0x24b   :  { %8778 = vst [vmem:[#allocation52_spill] sm:$0xff] %v7051_v25  ;;  %v8783_v32 = vsel %vm7063_vm2, 4294967295, %v8782_v32  ;;  %v294_v14 = vand.u32 7, %v7002_v33  ;;  %5648 = vmatmul.mubr.msk.f32.vlgmr.msra.gmra.mxu1 %vm8784_vm9, %v6852_v49  ;;  %vm7074_vm3 = vcmp.eq.s32.totalorder %v328_v51, %v6753_v7  ;;  %v8785_v48 = vmov 0  ;;  %5956 = vmatpush3.msk.msra.mxu0 %vm6922_vm13, %v8682_v41 }
 0x24c   :  { %v8786_v48 = vsel %vm7074_vm3, 4294967295, %v8785_v48  ;;  %vm7079_vm6 = vcmp.eq.s32.totalorder %v280_v17, %v6753_v7  ;;  %v8787_v55 = vmov 0  ;;  %v326_v8 = vand.u32 7, %v262_v60  ;;  %5991 = vmatpush3.msk.msra.mxu1 %vm6929_vm14, %v8682_v41  ;;  %5957 = vmatprep.subr.msk.mxu0 %vm6934_vm15, %v8682_v41 }
 0x24d   :  { %v8788_v55 = vsel %vm7079_vm6, 4294967295, %v8787_v55  ;;  %vm7091_vm9 = vcmp.eq.s32.totalorder %v312_v12, %v6753_v7  ;;  %v8789_v51 = vmov 0  ;;  %vm7096_vm11 = vcmp.eq.s32.totalorder %v295_v57, %v6753_v7  ;;  %5992 = vmatprep.subr.msk.mxu1 %vm6945_vm7, %v8682_v41  ;;  %5958 = vmatpush3.msk.msra.mxu0 %vm6950_vm8, %v8682_v41 }
 0x24e   :  { %v8790_v51 = vsel %vm7091_vm9, 4294967295, %v8789_v51  ;;  %v8791_v17 = vmov 0  ;;  %v7101_v60 = vadd.s32 184, %v6760_v27  ;;  %vm7111_vm13 = vcmp.eq.s32.totalorder %v327_v19, %v6753_v7  ;;  %5993 = vmatpush3.msk.msra.mxu1 %vm6962_vm10, %v8682_v41  ;;  %5959 = vmatprep.subr.msk.mxu0 %vm6967_vm0, %v8682_v41 }
 0x24f   :  { %v8792_v17 = vsel %vm7096_vm11, 4294967295, %v8791_v17  ;;  %v8794_v12 = vmov 0  ;;  %vm7116_vm12 = vcmp.eq.s32.totalorder %v279_v3, %v6753_v7  ;;  %v8796_v57 = vmov 0  ;;  %5994 = vmatprep.subr.msk.mxu1 %vm6975_vm5, %v8682_v41  ;;  %5960 = vmatpush3.msk.msra.mxu0 %vm6980_vm4, %v8682_v41 }
 0x250   :  { %8793 = vst [vmem:[#allocation53_spill] sm:$0xff] %v7101_v60  ;;  %v8795_v12 = vsel %vm7111_vm13, 4294967295, %v8794_v12  ;;  %v8797_v57 = vsel %vm7116_vm12, 4294967295, %v8796_v57  ;;  %v278_v33 = vand.u32 7, %v7051_v25  ;;  %v7122_v28 = vadd.s32 56, %v6760_v27 }
 0x251   :  { %vm7131_vm15 = vcmp.eq.s32.totalorder %v311_v11, %v6753_v7  ;;  %v8799_v19 = vmov 0  ;;  %vm7136_vm14 = vcmp.eq.s32.totalorder %v294_v14, %v6753_v7  ;;  %v8801_v3 = vmov 0 }
 0x252   :  { %8798 = vst [vmem:[#allocation54_spill] sm:$0xff] %v7122_v28  ;;  %v8800_v19 = vsel %vm7131_vm15, 4294967295, %v8799_v19  ;;  %v8802_v3 = vsel %vm7136_vm14, 4294967295, %v8801_v3  ;;  %v245_v25 = vadd.s32 312, %v6760_v27  ;;  %v7142_v9 = vadd.s32 176, %v6760_v27 }
 0x253   :  { %vm7151_vm8 = vcmp.eq.s32.totalorder %v326_v8, %v6753_v7  ;;  %v8804_v11 = vmov 0  ;;  %v310_v14 = vand.u32 7, %v246_v42  ;;  %v260_v1 = vadd.s32 432, %v6760_v27 }
 0x254   :  { %8803 = vst [vmem:[#allocation55_spill] sm:$0xff] %v7142_v9  ;;  %v8805_v11 = vsel %vm7151_vm8, 4294967295, %v8804_v11  ;;  %v293_v4 = vand.u32 7, %v7101_v60  ;;  %v325_v8 = vand.u32 7, %v261_v59  ;;  %v7168_v42 = vadd.s32 168, %v6760_v27 }
 0x255   :  { %vm8808_vm0 = vnez %v8759_v22  ;;  %vm8809_vm10 = vnez %v8761_v6  ;;  %vm7177_vm5 = vcmp.eq.s32.totalorder %v278_v33, %v6753_v7  ;;  %v277_v59 = vand.u32 7, %v7122_v28 }
 0x256   :  { %8807 = vst [vmem:[#allocation57_spill] sm:$0xff] %v7168_v42  ;;  %5995 = vmatpush3.msk.msra.mxu1 %vm8808_vm0, %v8682_v41  ;;  %5961 = vmatprep.subr.msk.mxu0 %vm8809_vm10, %v8682_v41  ;;  %v8811_v0 = vsel %vm7177_vm5, 4294967295, %v8810_v0  ;;  %v259_v60 = vadd.s32 424, %v6760_v27  ;;  %vm8814_vm4 = vnez %v8764_v23  ;;  %vm8815_vm0 = vnez %v8766_v15 }
 0x257   :  { %8812 = vst [vmem:[#allocation58_spill] sm:$0xff] %v8811_v0  ;;  %5996 = vmatprep.subr.msk.mxu1 %vm8814_vm4, %v8682_v41  ;;  %5962 = vmatpush3.msk.msra.mxu0 %vm8815_vm0, %v8682_v41  ;;  %v309_v56 = vand.u32 7, %v245_v25  ;;  %v292_v33 = vand.u32 7, %v7142_v9  ;;  %v7195_v28 = vadd.s32 160, %v6760_v27  ;;  %vm8817_vm10 = vnez %v8769_v20 }
 0x258   :  { %5997 = vmatpush3.msk.msra.mxu1 %vm8817_vm10, %v8682_v41  ;;  %vm8818_vm7 = vnez %v8771_v21  ;;  %vm7204_vm4 = vcmp.eq.s32.totalorder %v310_v14, %v6753_v7  ;;  %v324_v25 = vand.u32 7, %v260_v1  ;;  %v276_v9 = vand.u32 7, %v7157_v10 }
 0x259   :  { %8816 = vst [vmem:[#allocation60_spill] sm:$0xff] %v7195_v28  ;;  %5963 = vmatprep.subr.msk.mxu0 %vm8818_vm7, %v8682_v41  ;;  %v8820_v46 = vsel %vm7204_vm4, 4294967295, %v8819_v46  ;;  %vm8822_vm0 = vnez %v8775_v24  ;;  %vm8823_vm10 = vnez %v8777_v30  ;;  %vm7217_vm7 = vcmp.eq.s32.totalorder %v293_v4, %v6753_v7 }
 0x25a   :  { %8821 = vst [vmem:[#allocation61_spill] sm:$0xff] %v8820_v46  ;;  %5998 = vmatprep.subr.msk.mxu1 %vm8822_vm0, %v8682_v41  ;;  %5964 = vmatpush3.msk.msra.mxu0 %vm8823_vm10, %v8682_v41  ;;  %v8825_v35 = vsel %vm7217_vm7, 4294967295, %v8824_v35  ;;  %vm7222_vm4 = vcmp.eq.s32.totalorder %v325_v8, %v6753_v7  ;;  %v8827_v1 = vmov 0  ;;  %v308_v14 = vand.u32 7, %v244_v2 }
 0x25b   :  { %8826 = vst [vmem:[#allocation62_spill] sm:$0xff] %v8825_v35  ;;  %v8828_v1 = vsel %vm7222_vm4, 4294967295, %v8827_v1  ;;  %v291_v10 = vand.u32 7, %v7168_v42  ;;  %5999 = vmatpush3.msk.msra.mxu1 %vm7058_vm1, %v8682_v41  ;;  %5965 = vmatprep.subr.msk.mxu0 %vm7063_vm2, %v8682_v41  ;;  %vm7234_vm10 = vcmp.eq.s32.totalorder %v277_v59, %v6753_v7  ;;  %v8830_v4 = vmov 0 }
 0x25c   :  { %8829 = vst [vmem:[#allocation63_spill] sm:$0xff] %v8828_v1  ;;  %v8831_v4 = vsel %vm7234_vm10, 4294967295, %v8830_v4  ;;  %v323_v8 = vand.u32 7, %v259_v60  ;;  %v7240_v2 = vadd.s32 32, %v6760_v27  ;;  %6000 = vmatprep.subr.msk.mxu1 %vm7074_vm3, %v8682_v41  ;;  %5966 = vmatpush3.msk.msra.mxu0 %vm7079_vm6, %v8682_v41  ;;  %vm7249_vm2 = vcmp.eq.s32.totalorder %v309_v56, %v6753_v7 }
 0x25d   :  { %8832 = vst [vmem:[#allocation64_spill] sm:$0xff] %v8831_v4  ;;  %v8834_v59 = vmov 0  ;;  %vm7254_vm1 = vcmp.eq.s32.totalorder %v292_v33, %v6753_v7  ;;  %v8837_v60 = vmov 0  ;;  %v290_v42 = vand.u32 7, %v7195_v28  ;;  %6001 = vmatpush3.msk.msra.mxu1 %vm7091_vm9, %v8682_v41  ;;  %5967 = vmatprep.subr.msk.mxu0 %vm7096_vm11, %v8682_v41 }
 0x25e   :  { %8833 = vst [vmem:[#allocation65_spill] sm:$0xff] %v7240_v2  ;;  %v8835_v59 = vsel %vm7249_vm2, 4294967295, %v8834_v59  ;;  %v8838_v60 = vsel %vm7254_vm1, 4294967295, %v8837_v60  ;;  %vm7266_vm6 = vcmp.eq.s32.totalorder %v324_v25, %v6753_v7  ;;  %v8840_v56 = vmov 0  ;;  %6002 = vmatprep.subr.msk.mxu1 %vm7111_vm13, %v8682_v41  ;;  %5968 = vmatpush3.msk.msra.mxu0 %vm7116_vm12, %v8682_v41 }
 0x25f   :  { %8836 = vst [vmem:[#allocation66_spill] sm:$0xff] %v8835_v59  ;;  %8839 = vst [vmem:[#allocation67_spill] sm:$0xff] %v8838_v60  ;;  %v8841_v56 = vsel %vm7266_vm6, 4294967295, %v8840_v56  ;;  %vm7271_vm3 = vcmp.eq.s32.totalorder %v276_v9, %v6753_v7  ;;  %v8843_v33 = vmov 0  ;;  %v242_v28 = vadd.s32 288, %v6760_v27  ;;  %6003 = vmatpush3.msk.msra.mxu1 %vm7131_vm15, %v8682_v41  ;;  %5969 = vmatprep.subr.msk.mxu0 %vm7136_vm14, %v8682_v41 }
 0x260   :  { %8842 = vst [vmem:[#allocation68_spill] sm:$0xff] %v8841_v56  ;;  %v8844_v33 = vsel %vm7271_vm3, 4294967295, %v8843_v33  ;;  %vm7283_vm11 = vcmp.eq.s32.totalorder %v308_v14, %v6753_v7  ;;  %vm7288_vm9 = vcmp.eq.s32.totalorder %v291_v10, %v6753_v7  ;;  %v8848_v9 = vmov 0  ;;  %6004 = vmatprep.subr.msk.mxu1 %vm7151_vm8, %v8682_v41  ;;  %5970 = vmatpush3.msk.msra.mxu0 %vm7177_vm5, %v8682_v41 }
 0x261   :  { %8845 = vst [vmem:[#allocation69_spill] sm:$0xff] %v8844_v33  ;;  %v8849_v9 = vsel %vm7288_vm9, 4294967295, %v8848_v9  ;;  %v7293_v44 = vadd.s32 152, %v6760_v27  ;;  %vm7303_vm12 = vcmp.eq.s32.totalorder %v323_v8, %v6753_v7  ;;  %v8852_v14 = vmov 0  ;;  %5971 = vmatprep.subr.msk.mxu0 %vm7217_vm7, %v8682_v41 }
 0x262   :  { %8850 = vst [vmem:[#allocation70_spill] sm:$0xff] %v8849_v9  ;;  %v8853_v14 = vsel %vm7303_vm12, 4294967295, %v8852_v14  ;;  %vm7308_vm13 = vcmp.eq.s32.totalorder %v275_v34, %v6753_v7  ;;  %v8854_v10 = vmov 0  ;;  %v274_v40 = vand.u32 7, %v7240_v2  ;;  %5972 = vmatpush3.msk.msra.mxu0 %vm7234_vm10, %v8682_v41 }
 0x263   :  { %8851 = vst [vmem:[#allocation71_spill] sm:$0xff] %v7293_v44  ;;  %v8855_v10 = vsel %vm7308_vm13, 4294967295, %v8854_v10  ;;  %vm7323_vm14 = vcmp.eq.s32.totalorder %v307_v61, %v6753_v7  ;;  %v8858_v8 = vmov 0  ;;  %vm7328_vm15 = vcmp.eq.s32.totalorder %v290_v42, %v6753_v7  ;;  %5973 = vmatprep.subr.msk.mxu0 %vm7254_vm1, %v8682_v41 }
 0x264   :  { %8856 = vst [vmem:[#allocation72_spill] sm:$0xff] %v8855_v10  ;;  %v8859_v8 = vsel %vm7323_vm14, 4294967295, %v8858_v8  ;;  %v8860_v34 = vmov 0  ;;  %v241_v2 = vadd.s32 280, %v6760_v27  ;;  %vm8863_vm8 = vnez %v8820_v46  ;;  %5974 = vmatpush3.msk.msra.mxu0 %vm7271_vm3, %v8682_v41 }
 0x265   :  { %v8861_v34 = vsel %vm7328_vm15, 4294967295, %v8860_v34  ;;  %6005 = vmatpush3.msk.msra.mxu1 %vm8863_vm8, %v8682_v41  ;;  %vm7343_vm5 = vcmp.eq.s32.totalorder %v322_v52, %v6753_v7  ;;  %v8864_v61 = vmov 0  ;;  %v306_v42 = vand.u32 7, %v242_v28  ;;  %5975 = vmatprep.subr.msk.mxu0 %vm7288_vm9, %v8682_v41 }
 0x266   :  { %v8865_v61 = vsel %vm7343_vm5, 4294967295, %v8864_v61  ;;  %v7349_v0 = vadd.s32 16, %v6760_v27  ;;  %6006 = vmatprep.subr.msk.mxu1 %vm7222_vm4, %v8682_v41  ;;  %v289_v35 = vand.u32 7, %v7293_v44  ;;  %v321_v52 = vand.u32 7, %v257_v16  ;;  %5976 = vmatpush3.msk.msra.mxu0 %vm7308_vm13, %v8682_v41 }
 0x267   :  { %v240_v46 = vadd.s32 272, %v6760_v27  ;;  %v7360_v28 = vadd.s32 136, %v6760_v27  ;;  %6007 = vmatpush3.msk.msra.mxu1 %vm7249_vm2, %v8682_v41  ;;  %vm7369_vm4 = vcmp.eq.s32.totalorder %v274_v40, %v6753_v7  ;;  %v8868_v4 = vmov 0  ;;  %5977 = vmatprep.subr.msk.mxu0 %vm7328_vm15, %v8682_v41 }
 0x268   :  { %8866 = vst [vmem:[#allocation75_spill] sm:$0xff] %v7349_v0  ;;  %v8869_v4 = vsel %vm7369_vm4, 4294967295, %v8868_v4  ;;  %v273_v16 = vand.u32 7, %v7314_v38  ;;  %v255_v44 = vadd.s32 392, %v6760_v27  ;;  %v7376_v1 = vadd.s32 8, %v6760_v27  ;;  %6008 = vmatprep.subr.msk.mxu1 %vm7266_vm6, %v8682_v41  ;;  %5978 = vmatpush3.msk.msra.mxu0 %vm7369_vm4, %v8682_v41 }
 0x269   :  { %8867 = vst [vmem:[#allocation76_spill] sm:$0xff] %v7360_v28  ;;  %v305_v60 = vand.u32 7, %v241_v2  ;;  %v288_v40 = vand.u32 7, %v7334_v37  ;;  %v239_v59 = vadd.s32 264, %v6760_v27  ;;  %v7387_v38 = vadd.s32 128, %v6760_v27  ;;  %6009 = vmatpush3.msk.msra.mxu1 %vm7283_vm11, %v8682_v41 }
 0x26a   :  { %8870 = vst [vmem:[#allocation77_spill] sm:$0xff] %v7376_v1  ;;  %vm7396_vm6 = vcmp.eq.s32.totalorder %v306_v42, %v6753_v7  ;;  %v8872_v33 = vmov 0  ;;  %v320_v2 = vand.u32 7, %v256_v36  ;;  %v272_v37 = vand.u32 7, %v7349_v0  ;;  %6010 = vmatprep.subr.msk.mxu1 %vm7303_vm12, %v8682_v41 }
 0x26b   :  { %8871 = vst [vmem:[#allocation78_spill] sm:$0xff] %v7387_v38  ;;  %v8873_v33 = vsel %vm7396_vm6, 4294967295, %v8872_v33  ;;  %v254_v56 = vadd.s32 384, %v6760_v27  ;;  %vm7409_vm9 = vcmp.eq.s32.totalorder %v289_v35, %v6753_v7  ;;  %v8874_v9 = vmov 0  ;;  %6011 = vmatpush3.msk.msra.mxu1 %vm7323_vm14, %v8682_v41 }
 0x26c   :  { %v8875_v9 = vsel %vm7409_vm9, 4294967295, %v8874_v9  ;;  %v304_v42 = vand.u32 7, %v240_v46  ;;  %v287_v36 = vand.u32 7, %v7360_v28  ;;  %v238_v0 = vadd.s32 256, %v6760_v27  ;;  %6012 = vmatprep.subr.msk.mxu1 %vm7343_vm5, %v8682_v41  ;;  %5979 = vmatprep.subr.msk.mxu0 %vm7409_vm9, %v8682_v41 }
 0x26d   :  { %vm7422_vm13 = vcmp.eq.s32.totalorder %v321_v52, %v6753_v7  ;;  %v8876_v10 = vmov 0  ;;  %vm7427_vm12 = vcmp.eq.s32.totalorder %v273_v16, %v6753_v7  ;;  %v8878_v35 = vmov 0  ;;  %6013 = vmatpush3.msk.msra.mxu1 %vm7396_vm6, %v8682_v41 }
 0x26e   :  { %v8877_v10 = vsel %vm7422_vm13, 4294967295, %v8876_v10  ;;  %v8879_v35 = vsel %vm7427_vm12, 4294967295, %v8878_v35  ;;  %v319_v46 = vand.u32 7, %v255_v44  ;;  %v271_v28 = vand.u32 7, %v7376_v1  ;;  %6014 = vmatprep.subr.msk.mxu1 %vm7422_vm13, %v8682_v41  ;;  %5980 = vmatpush3.msk.msra.mxu0 %vm7427_vm12, %v8682_v41 }
 0x26f   :  { %vm7439_vm15 = vcmp.eq.s32.totalorder %v305_v60, %v6753_v7  ;;  %v8880_v52 = vmov 0  ;;  %vm7444_vm14 = vcmp.eq.s32.totalorder %v288_v40, %v6753_v7  ;;  %v8882_v16 = vmov 0 }
 0x270   :  { %v8881_v52 = vsel %vm7439_vm15, 4294967295, %v8880_v52  ;;  %v8883_v16 = vsel %vm7444_vm14, 4294967295, %v8882_v16  ;;  %v303_v44 = vand.u32 7, %v239_v59  ;;  %v286_v1 = vand.u32 7, %v7387_v38  ;;  %6015 = vmatpush3.msk.msra.mxu1 %vm7439_vm15, %v8682_v41  ;;  %5981 = vmatprep.subr.msk.mxu0 %vm7444_vm14, %v8682_v41 }
 0x271   :  { %vm7456_vm4 = vcmp.eq.s32.totalorder %v320_v2, %v6753_v7  ;;  %v8884_v60 = vmov 0  ;;  %vm7461_vm5 = vcmp.eq.s32.totalorder %v272_v37, %v6753_v7  ;;  %v8886_v40 = vmov 0  ;;  %v8993_v2 = vld [vmem:[#allocation30_spill] sm:$0xff] }
 0x272   :  { %v8885_v60 = vsel %vm7456_vm4, 4294967295, %v8884_v60  ;;  %v8887_v40 = vsel %vm7461_vm5, 4294967295, %v8886_v40  ;;  %v318_v59 = vand.u32 7, %v254_v56  ;;  %v270_v38 = vand.u32 7, %v6760_v27  ;;  %6016 = vmatprep.subr.msk.mxu1 %vm7456_vm4, %v8682_v41  ;;  %5982 = vmatpush3.msk.msra.mxu0 %vm7461_vm5, %v8682_v41 }
 0x273   :  { %vm7473_vm9 = vcmp.eq.s32.totalorder %v304_v42, %v6753_v7  ;;  %vm7478_vm6 = vcmp.eq.s32.totalorder %v287_v36, %v6753_v7  ;;  %v8890_v37 = vmov 0  ;;  %v302_v56 = vand.u32 7, %v238_v0 }
 0x274   :  { %v8891_v37 = vsel %vm7478_vm6, 4294967295, %v8890_v37  ;;  %vm7489_vm12 = vcmp.eq.s32.totalorder %v319_v46, %v6753_v7  ;;  %vm7494_vm13 = vcmp.eq.s32.totalorder %v271_v28, %v6753_v7  ;;  %v8894_v36 = vmov 0  ;;  %6017 = vmatpush3.msk.msra.mxu1 %vm7473_vm9, %v8682_v41  ;;  %5983 = vmatprep.subr.msk.mxu0 %vm7478_vm6, %v8682_v41 }
 0x275   :  { %v8895_v36 = vsel %vm7494_vm13, 4294967295, %v8894_v36  ;;  %vm7505_vm14 = vcmp.eq.s32.totalorder %v303_v44, %v6753_v7  ;;  %v8896_v0 = vmov 0  ;;  %vm7510_vm15 = vcmp.eq.s32.totalorder %v286_v1, %v6753_v7  ;;  %6018 = vmatprep.subr.msk.mxu1 %vm7489_vm12, %v8682_v41  ;;  %5984 = vmatpush3.msk.msra.mxu0 %vm7494_vm13, %v8682_v41 }
 0x276   :  { %v8897_v0 = vsel %vm7505_vm14, 4294967295, %v8896_v0  ;;  %v8898_v46 = vmov 0  ;;  %vm7521_vm5 = vcmp.eq.s32.totalorder %v318_v59, %v6753_v7  ;;  %v8900_v28 = vmov 0  ;;  %6019 = vmatpush3.msk.msra.mxu1 %vm7505_vm14, %v8682_v41  ;;  %5985 = vmatprep.subr.msk.mxu0 %vm7510_vm15, %v8682_v41 }
 0x277   :  { %v8899_v46 = vsel %vm7510_vm15, 4294967295, %v8898_v46  ;;  %v8901_v28 = vsel %vm7521_vm5, 4294967295, %v8900_v28  ;;  %vm7526_vm4 = vcmp.eq.s32.totalorder %v270_v38, %v6753_v7  ;;  %v8903_v44 = vmov 0  ;;  %6020 = vmatprep.subr.msk.mxu1 %vm7521_vm5, %v8682_v41 }
 0x278   :  { %8902 = vst [vmem:[#allocation79_spill] sm:$0xff] %v8901_v28  ;;  %v8904_v44 = vsel %vm7526_vm4, 4294967295, %v8903_v44  ;;  %vm7537_vm6 = vcmp.eq.s32.totalorder %v302_v56, %v6753_v7  ;;  %v8906_v1 = vmov 0  ;;  %v2081_v38 = vmul.f32 %v6987_v26, %v6987_v26  ;;  %5986 = vmatpush3.msk.msra.mxu0 %vm7526_vm4, %v8682_v41 }
 0x279   :  { %8905 = vst [vmem:[#allocation80_spill] sm:$0xff] %v8904_v44  ;;  %v8907_v1 = vsel %vm7537_vm6, 4294967295, %v8906_v1  ;;  %v2083_v59 = vmul.f32 %v7006_v43, %v7006_v43  ;;  %6021 = vmatpush3.msk.msra.mxu1 %vm7537_vm6, %v8682_v41  ;;  %vm8908_vm14 = vcmask 1043456   ;;  %v2080_v7 = vmul.f32 %v7004_v39, %v7004_v39 }
 0x27a   :  { %5713 = vmatprep.subr.msk.mxu0 %vm8908_vm14, %v2081_v38  ;;  %vm8909_vm15 = vmmov %vm8908_vm14  ;;  %v2082_v44 = vmul.f32 %v7020_v5, %v7020_v5  ;;  %v8912_v38 = vmov 0.0   ;;  %vm8915_vm5 = vnez %v8735_v45  ;;  %v8948_v45 = vld [vmem:[#allocation63_spill] sm:$0xff] }
 0x27b   :  { %5716 = vmatprep.subr.msk.mxu1 %vm8909_vm15, %v2083_v59  ;;  %vm8910_vm4 = vmmov %vm8908_vm14  ;;  %vm8913_vm14 = vnez %v8733_v29  ;;  %vm8914_vm15 = vcmask 31744  }
 0x27c   :  { %vm8911_vm6 = vmmov %vm8910_vm4 }
 0x27d   :  { %vm8916_vm13 = vmmov %vm8914_vm15 }
 0x30a   :  { %v1863_v56 = vpop.f32.mrf.mxu0 }
 0x30b   :  { %v1934_v26 = vpop.f32.mrf.mxu1 }
 0x30c   :  { %v1865_v27 = vpop.f32.mrf.mxu0 }
 0x30d   :  { %v1936_v28 = vpop.f32.mrf.mxu1  ;;  %2003 = vmatprep.mubr.f32.mxu0 %v1865_v27 }
 0x30e   :  { %2073 = vmatprep.mubr.f32.mxu1 %v1936_v28  ;;  %2004 = vmatmul.mubr.f32.vlgmr.msra.gmra.mxu0 %v1863_v56 }
 0x30f   :  { %2074 = vmatmul.mubr.f32.vlgmr.msra.gmra.mxu1 %v1934_v26  ;;  %5714 = vmatpush1.msk.msra.mxu0 %vm8910_vm4, %v2080_v7  ;;  %vm8917_vm4 = vnez %v8737_v47  ;;  %v8944_v7 = vld [vmem:[#allocation58_spill] sm:$0xff]  ;;  %v8982_v26 = vld [vmem:[#allocation31_spill] sm:$0xff] }
 0x310   :  { %5717 = vmatpush1.msk.msra.mxu1 %vm8911_vm6, %v2082_v44  ;;  %2160 = vmatprep.mubr.f32.mxu0 %v8912_v38  ;;  %vm8918_vm6 = vnez %v8739_v63  ;;  %v5784_v44 = vld [vmem:[#allocation10] ss:$0 sm:$0xff] }
 0x311   :  { %2231 = vmatprep.mubr.f32.mxu1 %v8912_v38  ;;  %6025 = vmatprep.subr.msk.mxu0 %vm8913_vm14, %v8682_v41  ;;  %vm8919_vm14 = vnez %v8741_v50  ;;  %v3272_v50 = vld [vmem:[#allocation5 + $0x3c8] sm:$0xff] }
 0x312   :  { %5715 = vmatmul.mubr.msk.f32.vlgmr.msra.gmra.mxu0 %vm8914_vm15, %v6852_v49  ;;  %6060 = vmatprep.subr.msk.mxu1 %vm8915_vm5, %v8682_v41  ;;  %vm8920_vm15 = vnez %v8744_v53  ;;  %vm8921_vm5 = vnez %v8746_v54  ;;  %v8953_v53 = vld [vmem:[#allocation68_spill] sm:$0xff]  ;;  %v3271_v54 = vld [vmem:[#allocation5 + $0x3c0] sm:$0xff] }
 0x313   :  { %5718 = vmatmul.mubr.msk.f32.vlgmr.msra.gmra.mxu1 %vm8916_vm13, %v6852_v49  ;;  %6026 = vmatpush3.msk.msra.mxu0 %vm8917_vm4, %v8682_v41  ;;  %vm8922_vm13 = vnez %v8749_v18  ;;  %vm8923_vm4 = vnez %v8751_v58  ;;  %v8956_v18 = vld [vmem:[#allocation70_spill] sm:$0xff]  ;;  %v8959_v58 = vld [vmem:[#allocation72_spill] sm:$0xff] }
 0x314   :  { %6061 = vmatpush3.msk.msra.mxu1 %vm8918_vm6, %v8682_v41  ;;  %6027 = vmatprep.subr.msk.mxu0 %vm8919_vm14, %v8682_v41  ;;  %vm8924_vm6 = vnez %v8753_v13  ;;  %vm8925_vm14 = vnez %v8755_v62  ;;  %v8977_v13 = vld [vmem:[#allocation79_spill] sm:$0xff]  ;;  %v8979_v62 = vld [vmem:[#allocation80_spill] sm:$0xff] }
 0x315   :  { %6062 = vmatprep.subr.msk.mxu1 %vm8920_vm15, %v8682_v41  ;;  %6028 = vmatpush3.msk.msra.mxu0 %vm8921_vm5, %v8682_v41  ;;  %vm8926_vm15 = vnez %v8759_v22  ;;  %vm8927_vm5 = vnez %v8761_v6  ;;  %v8984_v22 = vld [vmem:[#allocation32_spill] sm:$0xff] }
 0x316   :  { %6063 = vmatpush3.msk.msra.mxu1 %vm8922_vm13, %v8682_v41  ;;  %6029 = vmatprep.subr.msk.mxu0 %vm8923_vm4, %v8682_v41  ;;  %vm8928_vm13 = vnez %v8764_v23  ;;  %vm8929_vm4 = vnez %v8766_v15 }
 0x317   :  { %6064 = vmatprep.subr.msk.mxu1 %vm8924_vm6, %v8682_v41  ;;  %6030 = vmatpush3.msk.msra.mxu0 %vm8925_vm14, %v8682_v41  ;;  %vm8930_vm6 = vnez %v8769_v20  ;;  %vm8931_vm14 = vnez %v8771_v21 }
 0x318   :  { %6065 = vmatpush3.msk.msra.mxu1 %vm8926_vm15, %v8682_v41  ;;  %6031 = vmatprep.subr.msk.mxu0 %vm8927_vm5, %v8682_v41  ;;  %vm8932_vm15 = vnez %v8777_v30  ;;  %vm8933_vm5 = vnez %v8781_v31 }
 0x319   :  { %6066 = vmatprep.subr.msk.mxu1 %vm8928_vm13, %v8682_v41  ;;  %6032 = vmatpush3.msk.msra.mxu0 %vm8929_vm4, %v8682_v41  ;;  %vm8934_vm13 = vnez %v8783_v32  ;;  %vm8935_vm4 = vnez %v8786_v48 }
 0x31a   :  { %6067 = vmatpush3.msk.msra.mxu1 %vm8930_vm6, %v8682_v41  ;;  %6033 = vmatprep.subr.msk.mxu0 %vm8931_vm14, %v8682_v41  ;;  %vm8936_vm6 = vnez %v8788_v55  ;;  %vm8938_vm14 = vnez %v8792_v17  ;;  %v8988_v17 = vld [vmem:[#allocation34_spill] sm:$0xff] }
 0x31b   :  { %6068 = vmatprep.subr.msk.mxu1 %vm8822_vm0, %v8682_v41  ;;  %6034 = vmatpush3.msk.msra.mxu0 %vm8932_vm15, %v8682_v41  ;;  %vm8937_vm0 = vnez %v8790_v51  ;;  %vm8939_vm15 = vnez %v8795_v12  ;;  %v8986_v51 = vld [vmem:[#allocation33_spill] sm:$0xff] }
 0x31c   :  { %6069 = vmatpush3.msk.msra.mxu1 %vm8933_vm5, %v8682_v41  ;;  %6035 = vmatprep.subr.msk.mxu0 %vm8934_vm13, %v8682_v41  ;;  %vm8940_vm5 = vnez %v8797_v57  ;;  %vm8941_vm13 = vnez %v8800_v19 }
 0x31d   :  { %6070 = vmatprep.subr.msk.mxu1 %vm8935_vm4, %v8682_v41  ;;  %6036 = vmatpush3.msk.msra.mxu0 %vm8936_vm6, %v8682_v41  ;;  %vm8942_vm4 = vnez %v8802_v3  ;;  %vm8943_vm6 = vnez %v8805_v11 }
 0x31e   :  { %6071 = vmatpush3.msk.msra.mxu1 %vm8937_vm0, %v8682_v41  ;;  %6037 = vmatprep.subr.msk.mxu0 %vm8938_vm14, %v8682_v41  ;;  %vm8945_vm0 = vnez %v8944_v7  ;;  %vm8949_vm14 = vnez %v8948_v45 }
 0x31f   :  { %6072 = vmatprep.subr.msk.mxu1 %vm8939_vm15, %v8682_v41  ;;  %6038 = vmatpush3.msk.msra.mxu0 %vm8940_vm5, %v8682_v41  ;;  %vm8964_vm15 = vnez %v8869_v4  ;;  %vm8965_vm5 = vnez %v8873_v33 }
 0x320   :  { %6073 = vmatpush3.msk.msra.mxu1 %vm8941_vm13, %v8682_v41  ;;  %6039 = vmatprep.subr.msk.mxu0 %vm8942_vm4, %v8682_v41  ;;  %vm8966_vm13 = vnez %v8875_v9  ;;  %vm8967_vm4 = vnez %v8877_v10 }
 0x321   :  { %6074 = vmatprep.subr.msk.mxu1 %vm8943_vm6, %v8682_v41  ;;  %6040 = vmatpush3.msk.msra.mxu0 %vm8945_vm0, %v8682_v41  ;;  %vm8968_vm6 = vnez %v8879_v35  ;;  %vm8969_vm0 = vnez %v8881_v52  ;;  %v8992_v52 = vld [vmem:[#allocation28_spill] sm:$0xff] }
 0x322   :  { %6075 = vmatpush3.msk.msra.mxu1 %vm8863_vm8, %v8682_v41  ;;  %6041 = vmatprep.subr.msk.mxu0 %vm7217_vm7, %v8682_v41  ;;  %vm8954_vm8 = vnez %v8953_v53  ;;  %vm8958_vm7 = vnez %v8853_v14  ;;  %v3528_v53 = vld [vmem:[#allocation5 + $0xbc8] sm:$0xff] }
 0x323   :  { %6076 = vmatprep.subr.msk.mxu1 %vm8949_vm14, %v8682_v41  ;;  %6042 = vmatpush3.msk.msra.mxu0 %vm7234_vm10, %v8682_v41  ;;  %vm8957_vm10 = vnez %v8956_v18  ;;  %vm8970_vm14 = vnez %v8883_v16  ;;  %v201_v16 = vadd.s32 1, %v8992_v52  ;;  %v3527_v18 = vld [vmem:[#allocation5 + $0xbc0] sm:$0xff] }
 0x324   :  { %6077 = vmatpush3.msk.msra.mxu1 %vm7249_vm2, %v8682_v41  ;;  %6043 = vmatprep.subr.msk.mxu0 %vm7254_vm1, %v8682_v41  ;;  %vm8960_vm1 = vnez %v8959_v58  ;;  %vm8961_vm2 = vnez %v8859_v8  ;;  %v3264_v58 = vld [vmem:[#allocation5 + $0x388] sm:$0xff] }
 0x325   :  { %6078 = vmatprep.subr.msk.mxu1 %vm8954_vm8, %v8682_v41  ;;  %6044 = vmatpush3.msk.msra.mxu0 %vm7271_vm3, %v8682_v41  ;;  %vm8962_vm3 = vnez %v8861_v34  ;;  %vm8971_vm8 = vnez %v8885_v60  ;;  %v5783_v34 = vld [vmem:[#allocation8] ss:$0 sm:$0xff]  ;;  %v199_v60 = vmul.u32 2, %v8992_v52 }
 0x326   :  { %6079 = vmatpush3.msk.msra.mxu1 %vm7283_vm11, %v8682_v41  ;;  %6045 = vmatprep.subr.msk.mxu0 %vm8957_vm10, %v8682_v41  ;;  %vm8963_vm11 = vnez %v8865_v61  ;;  %vm8972_vm10 = vnez %v8887_v40  ;;  %v202_v40 = vmul.u32 2, %v201_v16  ;;  %v3456_v16 = vld [vmem:[#allocation5 + $0x988] sm:$0xff] }
 0x327   :  { %6080 = vmatprep.subr.msk.mxu1 %vm8958_vm7, %v8682_v41  ;;  %6046 = vmatpush3.msk.msra.mxu0 %vm8960_vm1, %v8682_v41  ;;  %vm8973_vm7 = vnez %v8891_v37  ;;  %vm8974_vm1 = vnez %v8895_v36 }
 0x328   :  { %6081 = vmatpush3.msk.msra.mxu1 %vm8961_vm2, %v8682_v41  ;;  %6047 = vmatprep.subr.msk.mxu0 %vm8962_vm3, %v8682_v41  ;;  %vm8975_vm2 = vnez %v8897_v0  ;;  %vm8976_vm3 = vnez %v8899_v46 }
 0x329   :  { %6082 = vmatprep.subr.msk.mxu1 %vm8963_vm11, %v8682_v41  ;;  %6048 = vmatpush3.msk.msra.mxu0 %vm8964_vm15, %v8682_v41  ;;  %vm8980_vm11 = vnez %v8979_v62  ;;  %vm8983_vm15 = vnez %v8982_v26  ;;  %v3263_v62 = vld [vmem:[#allocation5 + $0x380] sm:$0xff] }
 0x32a   :  { %6083 = vmatpush3.msk.msra.mxu1 %vm8965_vm5, %v8682_v41  ;;  %6049 = vmatprep.subr.msk.mxu0 %vm8966_vm13, %v8682_v41  ;;  %vm8985_vm5 = vnez %v8984_v22  ;;  %vm8987_vm13 = vnez %v8986_v51  ;;  %v3519_v26 = vld [vmem:[#allocation5 + $0xb80] sm:$0xff]  ;;  %v3256_v22 = vld [vmem:[#allocation5 + $0x348] sm:$0xff] }
 0x32b   :  { %6084 = vmatprep.subr.msk.mxu1 %vm8967_vm4, %v8682_v41  ;;  %6050 = vmatpush3.msk.msra.mxu0 %vm8968_vm6, %v8682_v41  ;;  %vm8989_vm4 = vnez %v8988_v17  ;;  %vm8990_vm6 = vcmask 64512   ;;  %v3232_v51 = vld [vmem:[#allocation5 + $0x288] sm:$0xff] }
 0x32c   :  { %6085 = vmatpush3.msk.msra.mxu1 %vm8969_vm0, %v8682_v41  ;;  %6051 = vmatprep.subr.msk.mxu0 %vm8970_vm14, %v8682_v41  ;;  %vm8991_vm0 = vmmov %vm8990_vm6  ;;  %vm200_vm14 = vcmp.ge.s32.totalorder %v8993_v2, %v199_v60  ;;  %v3488_v17 = vld [vmem:[#allocation5 + $0xa88] sm:$0xff]  ;;  %v3199_v60 = vld [vmem:[#allocation5 + $0x180] sm:$0xff] }
 0x32d   :  { %6086 = vmatprep.subr.msk.mxu1 %vm8971_vm8, %v8682_v41  ;;  %6052 = vmatpush3.msk.msra.mxu0 %vm8972_vm10, %v8682_v41  ;;  %vm203_vm8 = vcmp.lt.s32.totalorder %v8993_v2, %v202_v40  ;;  %v3455_v40 = vld [vmem:[#allocation5 + $0x980] sm:$0xff] }
 0x32e   :  { %6087 = vmatpush3.msk.msra.mxu1 %vm7473_vm9, %v8682_v41  ;;  %6053 = vmatprep.subr.msk.mxu0 %vm8973_vm7, %v8682_v41  ;;  %vm8978_vm9 = vnez %v8977_v13  ;;  %vm204_vm10 = vmand %vm200_vm14, %vm203_vm8  ;;  %vm8660_vm7 = vcmask 1041408   ;;  %v3520_v13 = vld [vmem:[#allocation5 + $0xb88] sm:$0xff] }
 0x32f   :  { %6088 = vmatprep.subr.msk.mxu1 %vm7489_vm12, %v8682_v41  ;;  %6054 = vmatpush3.msk.msra.mxu0 %vm8974_vm1, %v8682_v41  ;;  %vm8981_vm12 = vnez %v8907_v1  ;;  %v7789_v46 = vsel %vm204_vm10, 1.0, %v8912_v38  ;;  %vm8659_vm1 = vcmask 15360  }
 0x330   :  { %6089 = vmatpush3.msk.msra.mxu1 %vm8975_vm2, %v8682_v41  ;;  %6055 = vmatprep.subr.msk.mxu0 %vm8976_vm3, %v8682_v41  ;;  %8994 = vst [vmem:[#allocation58_spill] sm:$0xff] %v7789_v46  ;;  %vm8995_vm2 = vmmov %vm8991_vm0 }
 0x331   :  { %6090 = vmatprep.subr.msk.mxu1 %vm8978_vm9, %v8682_v41  ;;  %6056 = vmatpush3.msk.msra.mxu0 %vm8980_vm11, %v8682_v41  ;;  %vm8996_vm3 = vmmov %vm8991_vm0 }
 0x332   :  { %6091 = vmatpush3.msk.msra.mxu1 %vm8981_vm12, %v8682_v41  ;;  %5785 = vmatprep.subr.msk.mxu0 %vm8983_vm15, %v8682_v41 }
 0x333   :  { %5788 = vmatprep.subr.msk.mxu1 %vm8985_vm5, %v8682_v41 }
 0x3ce   :  { %v5987_v6 = vpop.f32.mrf.mxu0 }
 0x3cf   :  { %v6022_v23 = vpop.f32.mrf.mxu1 }
 0x3d0   :  { %v5988_v15 = vpop.f32.mrf.mxu0 }
 0x3d1   :  { %v5989_v20 = vadd.f32 %v5988_v15, %v5987_v6  ;;  %v6023_v21 = vpop.f32.mrf.mxu1  ;;  %v3512_v6 = vld [vmem:[#allocation5 + $0xb48] sm:$0xff]  ;;  %v3511_v15 = vld [vmem:[#allocation5 + $0xb40] sm:$0xff] }
 0x3d2   :  { %v6024_v24 = vadd.f32 %v6023_v21, %v6022_v23  ;;  %v2162_v30 = vpop.f32.mrf.mxu0  ;;  %v3255_v23 = vld [vmem:[#allocation5 + $0x340] sm:$0xff]  ;;  %v3504_v21 = vld [vmem:[#allocation5 + $0xb08] sm:$0xff] }
 0x3d3   :  { %v2233_v31 = vpop.f32.mrf.mxu1 }
 0x3d4   :  { %v2076_v32 = vadd.f32 %v6024_v24, %v5989_v20  ;;  %v2164_v48 = vpop.f32.mrf.mxu0  ;;  %v3248_v20 = vld [vmem:[#allocation5 + $0x308] sm:$0xff]  ;;  %v3247_v24 = vld [vmem:[#allocation5 + $0x300] sm:$0xff] }
 0x3d5   :  { %v2235_v55 = vpop.f32.mrf.mxu1  ;;  %2302 = vmatprep.mubr.f32.mxu0 %v2164_v48  ;;  %v3239_v48 = vld [vmem:[#allocation5 + $0x2c0] sm:$0xff] }
 0x3d6   :  { %2372 = vmatprep.mubr.f32.mxu1 %v2235_v55  ;;  %2303 = vmatmul.mubr.f32.vlgmr.msra.gmra.mxu0 %v2162_v30  ;;  %v2079_v4 = vmul.f32 0.0078125, %v2076_v32  ;;  %v3503_v30 = vld [vmem:[#allocation5 + $0xb00] sm:$0xff]  ;;  %v3496_v32 = vld [vmem:[#allocation5 + $0xac8] sm:$0xff] }
 0x3d7   :  { %2373 = vmatmul.mubr.f32.vlgmr.msra.gmra.mxu1 %v2233_v31  ;;  %5786 = vmatpush1.msk.msra.mxu0 %vm8987_vm13, %v8682_v41  ;;  %v3240_v31 = vld [vmem:[#allocation5 + $0x2c8] sm:$0xff]  ;;  %v3495_v55 = vld [vmem:[#allocation5 + $0xac0] sm:$0xff] }
 0x3d8   :  { %2465 = vmatprep.mubr.f32.mxu0 %v8912_v38  ;;  %5789 = vmatpush1.msk.msra.mxu1 %vm8989_vm4, %v8682_v41  ;;  %v2379_v9 = vmul.f32 %v2079_v4, %v2079_v4 }
 0x3d9   :  { %2536 = vmatprep.mubr.f32.mxu1 %v8912_v38 }
 0x496   :  { %v6057_v12 = vpop.f32.mrf.mxu0 }
 0x497   :  { %v6092_v57 = vpop.f32.mrf.mxu1 }
 0x498   :  { %v6058_v19 = vpop.f32.mrf.mxu0 }
 0x499   :  { %v6059_v3 = vadd.f32 %v6058_v19, %v6057_v12  ;;  %v6093_v11 = vpop.f32.mrf.mxu1  ;;  %v3231_v12 = vld [vmem:[#allocation5 + $0x280] sm:$0xff]  ;;  %v3224_v19 = vld [vmem:[#allocation5 + $0x248] sm:$0xff] }
 0x49a   :  { %v6094_v33 = vadd.f32 %v6093_v11, %v6092_v57  ;;  %v3487_v57 = vld [vmem:[#allocation5 + $0xa80] sm:$0xff] }
 0x49b   :  { %v3223_v11 = vld [vmem:[#allocation5 + $0x240] sm:$0xff] }
 0x49c   :  { %v2375_v25 = vadd.f32 %v6094_v33, %v6059_v3  ;;  %v3480_v3 = vld [vmem:[#allocation5 + $0xa48] sm:$0xff] }
 0x49d   :  { %v3216_v33 = vld [vmem:[#allocation5 + $0x208] sm:$0xff] }
 0x49e   :  { %v2378_v14 = vmul.f32 0.0078125, %v2375_v25  ;;  %v3472_v25 = vld [vmem:[#allocation5 + $0xa08] sm:$0xff] }
 0x4a0   :  { %v2380_v10 = vsub.f32 %v2378_v14, %v2379_v9  ;;  %v3215_v9 = vld [vmem:[#allocation5 + $0x200] sm:$0xff] }
 0x4a1   :  { %v3471_v14 = vld [vmem:[#allocation5 + $0xa00] sm:$0xff] }
 0x4a2   :  { %v2381_v8 = vadd.f32 1e-05, %v2380_v10  ;;  %v3208_v10 = vld [vmem:[#allocation5 + $0x1c8] sm:$0xff] }
 0x4a4   :  { %6305 = vrsqrt.f32 %v2381_v8  ;;  %v3464_v8 = vld [vmem:[#allocation5 + $0x9c8] sm:$0xff] }
 0x4b1   :  { %v6306_v61 = vpop.eup %6305 }
 0x4b2   :  { %v2389_v35 = vmul.f32 %v6306_v61, %v5783_v34  ;;  %v3207_v34 = vld [vmem:[#allocation5 + $0x1c0] sm:$0xff] }
 0x4b3   :  { %v3463_v61 = vld [vmem:[#allocation5 + $0x9c0] sm:$0xff] }
 0x4b4   :  { %5787 = vmatmul.mubr.msk.f32.vlgmr.msra.gmra.mxu0 %vm8990_vm6, %v2389_v35  ;;  %5790 = vmatmul.mubr.msk.f32.vlgmr.msra.gmra.mxu1 %vm8991_vm0, %v2389_v35  ;;  %v2390_v28 = vmul.f32 %v2389_v35, %v2079_v4  ;;  %v3479_v4 = vld [vmem:[#allocation5 + $0xa40] sm:$0xff]  ;;  %v3200_v35 = vld [vmem:[#allocation5 + $0x188] sm:$0xff] }
 0x4b5   :  { %2624 = vmatprep.mubr.f32.mxu0 %v8912_v38  ;;  %2695 = vmatprep.mubr.f32.mxu1 %v8912_v38 }
 0x4b6   :  { %v2397_v1 = vsub.f32 %v5784_v44, %v2390_v28  ;;  %v3184_v28 = vld [vmem:[#allocation5 + $0x108] sm:$0xff] }
 0x4b7   :  { %v3440_v44 = vld [vmem:[#allocation5 + $0x908] sm:$0xff] }
 0x574   :  { %v2467_v37 = vpop.f32.mrf.mxu0  ;;  %v2538_v42 = vpop.f32.mrf.mxu1 }
 0x576   :  { %v2469_v36 = vpop.f32.mrf.mxu0  ;;  %v2540_v0 = vpop.f32.mrf.mxu1 }
 0x577   :  { %5791 = vmatprep.subr.msk.mxu0 %vm8660_vm7, %v2469_v36  ;;  %5794 = vmatprep.subr.msk.mxu1 %vm8660_vm7, %v2540_v0  ;;  %v3191_v36 = vld [vmem:[#allocation5 + $0x140] sm:$0xff] }
 0x578   :  { %5792 = vmatpush1.msk.msra.mxu0 %vm8660_vm7, %v2467_v37  ;;  %5795 = vmatpush1.msk.msra.mxu1 %vm8660_vm7, %v2538_v42  ;;  %v3192_v37 = vld [vmem:[#allocation5 + $0x148] sm:$0xff]  ;;  %v3447_v0 = vld [vmem:[#allocation5 + $0x940] sm:$0xff] }
 0x579   :  { %5793 = vmatmul.mubr.msk.f32.vlgmr.msra.gmra.mxu0 %vm8659_vm1, %v7789_v46  ;;  %5796 = vmatmul.mubr.msk.f32.vlgmr.msra.gmra.mxu1 %vm8659_vm1, %v7789_v46  ;;  %v3448_v42 = vld [vmem:[#allocation5 + $0x948] sm:$0xff] }
 0x57a   :  { %5797 = vmatprep.subr.msk.mxu0 %vm8983_vm15, %v8682_v41  ;;  %5800 = vmatprep.subr.msk.mxu1 %vm8985_vm5, %v8682_v41  ;;  %vm8661_vm5 = vcmask 130048  }
 0x57b   :  { %5798 = vmatpush1.msk.msra.mxu0 %vm8987_vm13, %v8682_v41  ;;  %2769 = vmatprep.mubr.f32.mxu0 %v8912_v38 }
 0x57c   :  { %5801 = vmatpush1.msk.msra.mxu1 %vm8989_vm4, %v8682_v41  ;;  %2840 = vmatprep.mubr.f32.mxu1 %v8912_v38 }
 0x57d   :  { %5799 = vmatmul.mubr.msk.f32.vlgmr.msra.gmra.mxu0 %vm8995_vm2, %v2397_v1  ;;  %5802 = vmatmul.mubr.msk.f32.vlgmr.msra.gmra.mxu1 %vm8996_vm3, %v2397_v1  ;;  %v3183_v1 = vld [vmem:[#allocation5 + $0x100] sm:$0xff] }
 0x57e   :  { %2923 = vmatprep.mubr.f32.mxu0 %v8912_v38  ;;  %2994 = vmatprep.mubr.f32.mxu1 %v8912_v38 }
 0x639   :  { %v7817_v59 = vpop.f32.mrf.mxu0  ;;  %v7819_v56 = vpop.f32.mrf.mxu1 }
 0x63b   :  { %v7821_v7 = vpop.f32.mrf.mxu0  ;;  %v7823_v27 = vpop.f32.mrf.mxu1 }
 0x63d   :  { %v2771_v29 = vpop.f32.mrf.mxu0  ;;  %v2842_v45 = vpop.f32.mrf.mxu1 }
 0x63f   :  { %v2773_v47 = vpop.f32.mrf.mxu0  ;;  %v2844_v63 = vpop.f32.mrf.mxu1 }
 0x640   :  { %5803 = vmatprep.subr.msk.mxu0 %vm8660_vm7, %v2773_v47  ;;  %5806 = vmatprep.subr.msk.mxu1 %vm8660_vm7, %v2844_v63  ;;  %v3432_v47 = vld [vmem:[#allocation5 + $0x8c8] sm:$0xff]  ;;  %v3175_v63 = vld [vmem:[#allocation5 + $0xc0] sm:$0xff] }
 0x641   :  { %5804 = vmatpush1.msk.msra.mxu0 %vm8660_vm7, %v2771_v29  ;;  %5807 = vmatpush1.msk.msra.mxu1 %vm8660_vm7, %v2842_v45  ;;  %v3439_v29 = vld [vmem:[#allocation5 + $0x900] sm:$0xff]  ;;  %v3176_v45 = vld [vmem:[#allocation5 + $0xc8] sm:$0xff] }
 0x642   :  { %5805 = vmatmul.mubr.msk.f32.vlgmr.msra.gmra.mxu0 %vm8659_vm1, %v7789_v46  ;;  %5808 = vmatmul.mubr.msk.f32.vlgmr.msra.gmra.mxu1 %vm8659_vm1, %v7789_v46 }
 0x643   :  { %3663 = vmatprep.subr.mxu0 %v3272_v50  ;;  %3734 = vmatprep.subr.mxu1 %v3528_v53  ;;  %v3431_v50 = vld [vmem:[#allocation5 + $0x8c0] sm:$0xff]  ;;  %v3168_v53 = vld [vmem:[#allocation5 + $0x88] sm:$0xff] }
 0x644   :  { %3664 = vmatpush1.msra.mxu0 %v3271_v54  ;;  %3735 = vmatpush1.msra.mxu1 %v3527_v18  ;;  %v3424_v54 = vld [vmem:[#allocation5 + $0x888] sm:$0xff]  ;;  %v3167_v18 = vld [vmem:[#allocation5 + $0x80] sm:$0xff] }
 0x645   :  { %3665 = vmatprep.subr.mxu0 %v3264_v58  ;;  %3736 = vmatprep.subr.mxu1 %v3520_v13  ;;  %v3423_v58 = vld [vmem:[#allocation5 + $0x880] sm:$0xff]  ;;  %v3160_v13 = vld [vmem:[#allocation5 + $0x48] sm:$0xff] }
 0x646   :  { %3666 = vmatpush1.msra.mxu0 %v3263_v62  ;;  %3737 = vmatpush1.msra.mxu1 %v3519_v26  ;;  %v3416_v62 = vld [vmem:[#allocation5 + $0x848] sm:$0xff]  ;;  %v3159_v26 = vld [vmem:[#allocation5 + $0x40] sm:$0xff] }
 0x647   :  { %3667 = vmatprep.subr.mxu0 %v3256_v22  ;;  %3738 = vmatprep.subr.mxu1 %v3512_v6  ;;  %v3415_v22 = vld [vmem:[#allocation5 + $0x840] sm:$0xff]  ;;  %v3152_v6 = vld [vmem:[#allocation5 + $0x8] sm:$0xff] }
 0x648   :  { %3668 = vmatpush1.msra.mxu0 %v3255_v23  ;;  %3739 = vmatpush1.msra.mxu1 %v3511_v15  ;;  %v3408_v23 = vld [vmem:[#allocation5 + $0x808] sm:$0xff]  ;;  %v3151_v15 = vld [vmem:[#allocation5] sm:$0xff] }
 0x649   :  { %3669 = vmatprep.subr.mxu0 %v3248_v20  ;;  %3740 = vmatprep.subr.mxu1 %v3504_v21  ;;  %v3407_v20 = vld [vmem:[#allocation5 + $0x800] sm:$0xff]  ;;  %v3400_v21 = vld [vmem:[#allocation5 + $0x7c8] sm:$0xff] }
 0x64a   :  { %3670 = vmatpush1.msra.mxu0 %v3247_v24  ;;  %3741 = vmatpush1.msra.mxu1 %v3503_v30  ;;  %v3656_v24 = vld [vmem:[#allocation5 + $0xfc8] sm:$0xff]  ;;  %v3399_v30 = vld [vmem:[#allocation5 + $0x7c0] sm:$0xff] }
 0x64b   :  { %3671 = vmatprep.subr.mxu0 %v3240_v31  ;;  %3742 = vmatprep.subr.mxu1 %v3496_v32  ;;  %v3655_v31 = vld [vmem:[#allocation5 + $0xfc0] sm:$0xff]  ;;  %v3392_v32 = vld [vmem:[#allocation5 + $0x788] sm:$0xff] }
 0x64c   :  { %3672 = vmatpush1.msra.mxu0 %v3239_v48  ;;  %3743 = vmatpush1.msra.mxu1 %v3495_v55  ;;  %v3648_v48 = vld [vmem:[#allocation5 + $0xf88] sm:$0xff]  ;;  %v3391_v55 = vld [vmem:[#allocation5 + $0x780] sm:$0xff] }
 0x64d   :  { %3673 = vmatprep.subr.mxu0 %v3232_v51  ;;  %3744 = vmatprep.subr.mxu1 %v3488_v17  ;;  %v3647_v51 = vld [vmem:[#allocation5 + $0xf80] sm:$0xff]  ;;  %v3384_v17 = vld [vmem:[#allocation5 + $0x748] sm:$0xff] }
 0x64e   :  { %3674 = vmatpush1.msra.mxu0 %v3231_v12  ;;  %3745 = vmatpush1.msra.mxu1 %v3487_v57  ;;  %v3640_v12 = vld [vmem:[#allocation5 + $0xf48] sm:$0xff]  ;;  %v3383_v57 = vld [vmem:[#allocation5 + $0x740] sm:$0xff] }
 0x64f   :  { %3675 = vmatprep.subr.mxu0 %v3224_v19  ;;  %3746 = vmatprep.subr.mxu1 %v3480_v3  ;;  %v3639_v19 = vld [vmem:[#allocation5 + $0xf40] sm:$0xff]  ;;  %v3376_v3 = vld [vmem:[#allocation5 + $0x708] sm:$0xff] }
 0x650   :  { %3676 = vmatpush1.msra.mxu0 %v3223_v11  ;;  %3747 = vmatpush1.msra.mxu1 %v3479_v4  ;;  %v3632_v11 = vld [vmem:[#allocation5 + $0xf08] sm:$0xff]  ;;  %v3375_v4 = vld [vmem:[#allocation5 + $0x700] sm:$0xff] }
 0x651   :  { %3677 = vmatprep.subr.mxu0 %v3216_v33  ;;  %3748 = vmatprep.subr.mxu1 %v3472_v25  ;;  %v3631_v33 = vld [vmem:[#allocation5 + $0xf00] sm:$0xff]  ;;  %v3368_v25 = vld [vmem:[#allocation5 + $0x6c8] sm:$0xff] }
 0x652   :  { %3678 = vmatpush1.msra.mxu0 %v3215_v9  ;;  %3749 = vmatpush1.msra.mxu1 %v3471_v14  ;;  %v3624_v9 = vld [vmem:[#allocation5 + $0xec8] sm:$0xff]  ;;  %v3367_v14 = vld [vmem:[#allocation5 + $0x6c0] sm:$0xff] }
 0x653   :  { %3679 = vmatprep.subr.mxu0 %v3208_v10  ;;  %3750 = vmatprep.subr.mxu1 %v3464_v8  ;;  %v3623_v10 = vld [vmem:[#allocation5 + $0xec0] sm:$0xff]  ;;  %v3360_v8 = vld [vmem:[#allocation5 + $0x688] sm:$0xff] }
 0x654   :  { %3680 = vmatpush1.msra.mxu0 %v3207_v34  ;;  %3751 = vmatpush1.msra.mxu1 %v3463_v61  ;;  %v3616_v34 = vld [vmem:[#allocation5 + $0xe88] sm:$0xff]  ;;  %v3359_v61 = vld [vmem:[#allocation5 + $0x680] sm:$0xff] }
 0x655   :  { %3681 = vmatprep.subr.mxu0 %v3200_v35  ;;  %3752 = vmatprep.subr.mxu1 %v3456_v16  ;;  %v3615_v35 = vld [vmem:[#allocation5 + $0xe80] sm:$0xff]  ;;  %v3352_v16 = vld [vmem:[#allocation5 + $0x648] sm:$0xff] }
 0x656   :  { %3682 = vmatpush1.msra.mxu0 %v3199_v60  ;;  %3753 = vmatpush1.msra.mxu1 %v3455_v40  ;;  %v3608_v60 = vld [vmem:[#allocation5 + $0xe48] sm:$0xff]  ;;  %v3351_v40 = vld [vmem:[#allocation5 + $0x640] sm:$0xff] }
 0x657   :  { %3683 = vmatprep.subr.mxu0 %v3192_v37  ;;  %3754 = vmatprep.subr.mxu1 %v3448_v42  ;;  %v3607_v37 = vld [vmem:[#allocation5 + $0xe40] sm:$0xff]  ;;  %v3344_v42 = vld [vmem:[#allocation5 + $0x608] sm:$0xff] }
 0x658   :  { %3684 = vmatpush1.msra.mxu0 %v3191_v36  ;;  %3755 = vmatpush1.msra.mxu1 %v3447_v0  ;;  %v3600_v36 = vld [vmem:[#allocation5 + $0xe08] sm:$0xff]  ;;  %v3343_v0 = vld [vmem:[#allocation5 + $0x600] sm:$0xff] }
 0x659   :  { %3685 = vmatprep.subr.mxu0 %v3184_v28  ;;  %3756 = vmatprep.subr.mxu1 %v3440_v44  ;;  %v3599_v28 = vld [vmem:[#allocation5 + $0xe00] sm:$0xff]  ;;  %v3336_v44 = vld [vmem:[#allocation5 + $0x5c8] sm:$0xff] }
 0x65a   :  { %3686 = vmatpush1.msra.mxu0 %v3183_v1  ;;  %3757 = vmatpush1.msra.mxu1 %v3439_v29  ;;  %v3592_v1 = vld [vmem:[#allocation5 + $0xdc8] sm:$0xff]  ;;  %v3335_v29 = vld [vmem:[#allocation5 + $0x5c0] sm:$0xff] }
 0x65b   :  { %3687 = vmatprep.subr.mxu0 %v3176_v45  ;;  %3758 = vmatprep.subr.mxu1 %v3432_v47  ;;  %v3591_v45 = vld [vmem:[#allocation5 + $0xdc0] sm:$0xff]  ;;  %v3328_v47 = vld [vmem:[#allocation5 + $0x588] sm:$0xff] }
 0x65c   :  { %3688 = vmatpush1.msra.mxu0 %v3175_v63  ;;  %3759 = vmatpush1.msra.mxu1 %v3431_v50  ;;  %v3584_v63 = vld [vmem:[#allocation5 + $0xd88] sm:$0xff]  ;;  %v3327_v50 = vld [vmem:[#allocation5 + $0x580] sm:$0xff] }
 0x65d   :  { %3689 = vmatprep.subr.mxu0 %v3168_v53  ;;  %3760 = vmatprep.subr.mxu1 %v3424_v54  ;;  %v3583_v53 = vld [vmem:[#allocation5 + $0xd80] sm:$0xff]  ;;  %v3320_v54 = vld [vmem:[#allocation5 + $0x548] sm:$0xff] }
 0x65e   :  { %3690 = vmatpush1.msra.mxu0 %v3167_v18  ;;  %3761 = vmatpush1.msra.mxu1 %v3423_v58  ;;  %v3576_v18 = vld [vmem:[#allocation5 + $0xd48] sm:$0xff]  ;;  %v3319_v58 = vld [vmem:[#allocation5 + $0x540] sm:$0xff] }
 0x65f   :  { %3691 = vmatprep.subr.mxu0 %v3160_v13  ;;  %3762 = vmatprep.subr.mxu1 %v3416_v62  ;;  %v3575_v13 = vld [vmem:[#allocation5 + $0xd40] sm:$0xff]  ;;  %v3312_v62 = vld [vmem:[#allocation5 + $0x508] sm:$0xff] }
 0x660   :  { %3692 = vmatpush1.msra.mxu0 %v3159_v26  ;;  %3763 = vmatpush1.msra.mxu1 %v3415_v22  ;;  %v3568_v26 = vld [vmem:[#allocation5 + $0xd08] sm:$0xff]  ;;  %v3311_v22 = vld [vmem:[#allocation5 + $0x500] sm:$0xff] }
 0x661   :  { %3693 = vmatprep.subr.mxu0 %v3152_v6  ;;  %3764 = vmatprep.subr.mxu1 %v3408_v23  ;;  %v3567_v6 = vld [vmem:[#allocation5 + $0xd00] sm:$0xff]  ;;  %v3304_v23 = vld [vmem:[#allocation5 + $0x4c8] sm:$0xff] }
 0x662   :  { %3694 = vmatpush1.msra.mxu0 %v3151_v15  ;;  %3765 = vmatpush1.msra.mxu1 %v3407_v20  ;;  %v3560_v15 = vld [vmem:[#allocation5 + $0xcc8] sm:$0xff]  ;;  %v3303_v20 = vld [vmem:[#allocation5 + $0x4c0] sm:$0xff] }
 0x663   :  { %3695 = vmatprep.subr.mxu0 %v3400_v21  ;;  %3766 = vmatprep.subr.mxu1 %v3656_v24  ;;  %v3559_v21 = vld [vmem:[#allocation5 + $0xcc0] sm:$0xff]  ;;  %v3296_v24 = vld [vmem:[#allocation5 + $0x488] sm:$0xff] }
 0x664   :  { %3696 = vmatpush2.msra.mxu0 %v3399_v30  ;;  %3767 = vmatpush2.msra.mxu1 %v3655_v31  ;;  %v3552_v30 = vld [vmem:[#allocation5 + $0xc88] sm:$0xff]  ;;  %v3295_v31 = vld [vmem:[#allocation5 + $0x480] sm:$0xff] }
 0x665   :  { %3697 = vmatprep.subr.mxu0 %v3392_v32  ;;  %3768 = vmatprep.subr.mxu1 %v3648_v48  ;;  %v3551_v32 = vld [vmem:[#allocation5 + $0xc80] sm:$0xff]  ;;  %v3288_v48 = vld [vmem:[#allocation5 + $0x448] sm:$0xff] }
 0x666   :  { %3698 = vmatpush2.msra.mxu0 %v3391_v55  ;;  %3769 = vmatpush2.msra.mxu1 %v3647_v51  ;;  %v3544_v55 = vld [vmem:[#allocation5 + $0xc48] sm:$0xff]  ;;  %v3287_v51 = vld [vmem:[#allocation5 + $0x440] sm:$0xff] }
 0x667   :  { %3699 = vmatprep.subr.mxu0 %v3384_v17  ;;  %3770 = vmatprep.subr.mxu1 %v3640_v12  ;;  %v3543_v17 = vld [vmem:[#allocation5 + $0xc40] sm:$0xff]  ;;  %v3280_v12 = vld [vmem:[#allocation5 + $0x408] sm:$0xff] }
 0x668   :  { %3700 = vmatpush2.msra.mxu0 %v3383_v57  ;;  %3771 = vmatpush2.msra.mxu1 %v3639_v19  ;;  %v3536_v57 = vld [vmem:[#allocation5 + $0xc08] sm:$0xff]  ;;  %v3279_v19 = vld [vmem:[#allocation5 + $0x400] sm:$0xff] }
 0x669   :  { %3701 = vmatprep.subr.mxu0 %v3376_v3  ;;  %3772 = vmatprep.subr.mxu1 %v3632_v11  ;;  %v3535_v3 = vld [vmem:[#allocation5 + $0xc00] sm:$0xff]  ;;  %v3274_v11 = vld [vmem:[#allocation5 + $0x3d8] sm:$0xff] }
 0x66a   :  { %3702 = vmatpush2.msra.mxu0 %v3375_v4  ;;  %3773 = vmatpush2.msra.mxu1 %v3631_v33  ;;  %v3530_v4 = vld [vmem:[#allocation5 + $0xbd8] sm:$0xff] }
 0x66b   :  { %3703 = vmatprep.subr.mxu0 %v3368_v25  ;;  %3774 = vmatprep.subr.mxu1 %v3624_v9  ;;  %v8997_v9 = vld [vmem:[#allocation50_spill] sm:$0xff] }
 0x66c   :  { %3704 = vmatpush2.msra.mxu0 %v3367_v14  ;;  %3775 = vmatpush2.msra.mxu1 %v3623_v10  ;;  %v3002_v14 = vmul.f32 %v7821_v7, %v8997_v9  ;;  %v3004_v10 = vmul.f32 %v7823_v27, %v7006_v43  ;;  %v3273_v7 = vld [vmem:[#allocation5 + $0x3d0] sm:$0xff]  ;;  %v3522_v43 = vld [vmem:[#allocation5 + $0xb98] sm:$0xff] }
 0x66d   :  { %3705 = vmatprep.subr.mxu0 %v3360_v8  ;;  %3776 = vmatprep.subr.mxu1 %v3616_v34  ;;  %v3001_v8 = vmul.f32 %v7817_v59, %v7004_v39  ;;  %v3003_v34 = vmul.f32 %v7819_v56, %v7020_v5  ;;  %v3266_v39 = vld [vmem:[#allocation5 + $0x398] sm:$0xff]  ;;  %v3265_v5 = vld [vmem:[#allocation5 + $0x390] sm:$0xff] }
 0x66e   :  { %3706 = vmatpush2.msra.mxu0 %v3359_v61  ;;  %3777 = vmatpush2.msra.mxu1 %v3615_v35  ;;  %v3521_v59 = vld [vmem:[#allocation5 + $0xb90] sm:$0xff]  ;;  %v3258_v56 = vld [vmem:[#allocation5 + $0x358] sm:$0xff] }
 0x66f   :  { %3707 = vmatprep.subr.mxu0 %v3352_v16  ;;  %3778 = vmatprep.subr.mxu1 %v3608_v60  ;;  %v3514_v27 = vld [vmem:[#allocation5 + $0xb58] sm:$0xff] }
 0x670   :  { %3708 = vmatpush2.msra.mxu0 %v3351_v40  ;;  %3779 = vmatpush2.msra.mxu1 %v3607_v37  ;;  %v3434_v9 = vld [vmem:[#allocation5 + $0x8d8] sm:$0xff] }
 0x671   :  { %3709 = vmatprep.subr.mxu0 %v3344_v42  ;;  %3780 = vmatprep.subr.mxu1 %v3600_v36  ;;  %v3529_v42 = vld [vmem:[#allocation5 + $0xbd0] sm:$0xff] }
 0x672   :  { %3710 = vmatpush2.msra.mxu0 %v3343_v0  ;;  %3781 = vmatpush2.msra.mxu1 %v3599_v28  ;;  %v3257_v36 = vld [vmem:[#allocation5 + $0x350] sm:$0xff]  ;;  %v3250_v28 = vld [vmem:[#allocation5 + $0x318] sm:$0xff] }
 0x673   :  { %3711 = vmatprep.subr.mxu0 %v3336_v44  ;;  %3782 = vmatprep.subr.mxu1 %v3592_v1  ;;  %v3513_v0 = vld [vmem:[#allocation5 + $0xb50] sm:$0xff]  ;;  %v3506_v44 = vld [vmem:[#allocation5 + $0xb18] sm:$0xff] }
 0x674   :  { %3712 = vmatpush2.msra.mxu0 %v3335_v29  ;;  %3783 = vmatpush2.msra.mxu1 %v3591_v45  ;;  %v3249_v1 = vld [vmem:[#allocation5 + $0x310] sm:$0xff]  ;;  %v3242_v45 = vld [vmem:[#allocation5 + $0x2d8] sm:$0xff] }
 0x675   :  { %3713 = vmatprep.subr.mxu0 %v3328_v47  ;;  %3784 = vmatprep.subr.mxu1 %v3584_v63  ;;  %v3505_v29 = vld [vmem:[#allocation5 + $0xb10] sm:$0xff]  ;;  %v3498_v47 = vld [vmem:[#allocation5 + $0xad8] sm:$0xff] }
 0x676   :  { %3714 = vmatpush2.msra.mxu0 %v3327_v50  ;;  %3785 = vmatpush2.msra.mxu1 %v3583_v53  ;;  %v3241_v63 = vld [vmem:[#allocation5 + $0x2d0] sm:$0xff]  ;;  %v3234_v53 = vld [vmem:[#allocation5 + $0x298] sm:$0xff] }
 0x677   :  { %3715 = vmatprep.subr.mxu0 %v3320_v54  ;;  %3786 = vmatprep.subr.mxu1 %v3576_v18  ;;  %v3497_v50 = vld [vmem:[#allocation5 + $0xad0] sm:$0xff]  ;;  %v3490_v54 = vld [vmem:[#allocation5 + $0xa98] sm:$0xff] }
 0x678   :  { %3716 = vmatpush2.msra.mxu0 %v3319_v58  ;;  %3787 = vmatpush2.msra.mxu1 %v3575_v13  ;;  %v3233_v18 = vld [vmem:[#allocation5 + $0x290] sm:$0xff]  ;;  %v3226_v13 = vld [vmem:[#allocation5 + $0x258] sm:$0xff] }
 0x679   :  { %3717 = vmatprep.subr.mxu0 %v3312_v62  ;;  %3788 = vmatprep.subr.mxu1 %v3568_v26  ;;  %v3489_v58 = vld [vmem:[#allocation5 + $0xa90] sm:$0xff]  ;;  %v3482_v62 = vld [vmem:[#allocation5 + $0xa58] sm:$0xff] }
 0x67a   :  { %3718 = vmatpush2.msra.mxu0 %v3311_v22  ;;  %3789 = vmatpush2.msra.mxu1 %v3567_v6  ;;  %v3225_v26 = vld [vmem:[#allocation5 + $0x250] sm:$0xff]  ;;  %v3218_v6 = vld [vmem:[#allocation5 + $0x218] sm:$0xff] }
 0x67b   :  { %3719 = vmatprep.subr.mxu0 %v3304_v23  ;;  %3790 = vmatprep.subr.mxu1 %v3560_v15  ;;  %v3481_v22 = vld [vmem:[#allocation5 + $0xa50] sm:$0xff]  ;;  %v3474_v23 = vld [vmem:[#allocation5 + $0xa18] sm:$0xff] }
 0x67c   :  { %3720 = vmatpush2.msra.mxu0 %v3303_v20  ;;  %3791 = vmatpush2.msra.mxu1 %v3559_v21  ;;  %v3217_v15 = vld [vmem:[#allocation5 + $0x210] sm:$0xff]  ;;  %v3210_v21 = vld [vmem:[#allocation5 + $0x1d8] sm:$0xff] }
 0x67d   :  { %3721 = vmatprep.subr.mxu0 %v3296_v24  ;;  %3792 = vmatprep.subr.mxu1 %v3552_v30  ;;  %v3473_v20 = vld [vmem:[#allocation5 + $0xa10] sm:$0xff]  ;;  %v3466_v24 = vld [vmem:[#allocation5 + $0x9d8] sm:$0xff] }
 0x67e   :  { %3722 = vmatpush2.msra.mxu0 %v3295_v31  ;;  %3793 = vmatpush2.msra.mxu1 %v3551_v32  ;;  %v3209_v30 = vld [vmem:[#allocation5 + $0x1d0] sm:$0xff]  ;;  %v3202_v32 = vld [vmem:[#allocation5 + $0x198] sm:$0xff] }
 0x67f   :  { %3723 = vmatprep.subr.mxu0 %v3288_v48  ;;  %3794 = vmatprep.subr.mxu1 %v3544_v55  ;;  %v3465_v31 = vld [vmem:[#allocation5 + $0x9d0] sm:$0xff]  ;;  %v3458_v48 = vld [vmem:[#allocation5 + $0x998] sm:$0xff] }
 0x680   :  { %3724 = vmatpush2.msra.mxu0 %v3287_v51  ;;  %3795 = vmatpush2.msra.mxu1 %v3543_v17  ;;  %v3201_v55 = vld [vmem:[#allocation5 + $0x190] sm:$0xff]  ;;  %v3194_v17 = vld [vmem:[#allocation5 + $0x158] sm:$0xff] }
 0x681   :  { %3725 = vmatprep.subr.mxu0 %v3280_v12  ;;  %3796 = vmatprep.subr.mxu1 %v3536_v57  ;;  %v3457_v51 = vld [vmem:[#allocation5 + $0x990] sm:$0xff]  ;;  %v3450_v12 = vld [vmem:[#allocation5 + $0x958] sm:$0xff] }
 0x682   :  { %3726 = vmatpush2.msra.mxu0 %v3279_v19  ;;  %3797 = vmatpush2.msra.mxu1 %v3535_v3  ;;  %v3193_v57 = vld [vmem:[#allocation5 + $0x150] sm:$0xff]  ;;  %v3186_v3 = vld [vmem:[#allocation5 + $0x118] sm:$0xff] }
 0x683   :  { %3805 = vmatprep.subr.mxu0 %v3274_v11  ;;  %3876 = vmatprep.subr.mxu1 %v3530_v4  ;;  %v3449_v19 = vld [vmem:[#allocation5 + $0x950] sm:$0xff]  ;;  %v3442_v11 = vld [vmem:[#allocation5 + $0x918] sm:$0xff] }
 0x684   :  { %v3185_v4 = vld [vmem:[#allocation5 + $0x110] sm:$0xff] }
 0x702   :  { %v2925_v33 = vpop.f32.mrf.mxu0  ;;  %v2996_v25 = vpop.f32.mrf.mxu1 }
 0x703   :  { %v7845_v40 = vadd.f32 %v3001_v8, %v2925_v33  ;;  %v7847_v37 = vadd.f32 %v3003_v34, %v2996_v25  ;;  %v3441_v33 = vld [vmem:[#allocation5 + $0x910] sm:$0xff]  ;;  %v3178_v25 = vld [vmem:[#allocation5 + $0xd8] sm:$0xff] }
 0x704   :  { %v2927_v61 = vpop.f32.mrf.mxu0  ;;  %v2998_v35 = vpop.f32.mrf.mxu1  ;;  %v3170_v8 = vld [vmem:[#allocation5 + $0x98] sm:$0xff] }
 0x705   :  { %v7841_v16 = vadd.f32 %v3002_v14, %v2927_v61  ;;  %v7843_v60 = vadd.f32 %v3004_v10, %v2998_v35  ;;  %v3177_v14 = vld [vmem:[#allocation5 + $0xd0] sm:$0xff]  ;;  %v3426_v34 = vld [vmem:[#allocation5 + $0x898] sm:$0xff] }
 0x706   :  { %v3433_v10 = vld [vmem:[#allocation5 + $0x8d0] sm:$0xff] }
 0x707   :  { %3727 = vmatprep.mubr.f32.mxu0 %v7841_v16  ;;  %3798 = vmatprep.mubr.f32.mxu1 %v7843_v60  ;;  %v3169_v61 = vld [vmem:[#allocation5 + $0x90] sm:$0xff] }
 0x708   :  { %3728 = vmatmul.mubr.f32.vlgmr.msra.gmra.mxu0 %v7845_v40  ;;  %3799 = vmatmul.mubr.f32.vlgmr.msra.gmra.mxu1 %v7847_v37  ;;  %v3425_v35 = vld [vmem:[#allocation5 + $0x890] sm:$0xff] }
 0x709   :  { %3806 = vmatpush1.msra.mxu0 %v3273_v7  ;;  %3877 = vmatpush1.msra.mxu1 %v3529_v42  ;;  %v3162_v7 = vld [vmem:[#allocation5 + $0x58] sm:$0xff] }
 0x70a   :  { %3807 = vmatprep.subr.mxu0 %v3266_v39  ;;  %3869 = vmatprep.mubr.f32.mxu0 %v7841_v16  ;;  %v3418_v42 = vld [vmem:[#allocation5 + $0x858] sm:$0xff]  ;;  %v3161_v39 = vld [vmem:[#allocation5 + $0x50] sm:$0xff] }
 0x70b   :  { %3878 = vmatprep.subr.mxu1 %v3522_v43  ;;  %3940 = vmatprep.mubr.f32.mxu1 %v7843_v60  ;;  %v3417_v43 = vld [vmem:[#allocation5 + $0x850] sm:$0xff] }
 0x70c   :  { %3808 = vmatpush1.msra.mxu0 %v3265_v5  ;;  %3879 = vmatpush1.msra.mxu1 %v3521_v59  ;;  %v3154_v5 = vld [vmem:[#allocation5 + $0x18] sm:$0xff] }
 0x70d   :  { %3809 = vmatprep.subr.mxu0 %v3258_v56  ;;  %3880 = vmatprep.subr.mxu1 %v3514_v27  ;;  %v3410_v59 = vld [vmem:[#allocation5 + $0x818] sm:$0xff]  ;;  %v3153_v56 = vld [vmem:[#allocation5 + $0x10] sm:$0xff] }
 0x70e   :  { %3810 = vmatpush1.msra.mxu0 %v3257_v36  ;;  %3881 = vmatpush1.msra.mxu1 %v3513_v0  ;;  %v3409_v27 = vld [vmem:[#allocation5 + $0x810] sm:$0xff]  ;;  %v3402_v36 = vld [vmem:[#allocation5 + $0x7d8] sm:$0xff] }
 0x70f   :  { %3811 = vmatprep.subr.mxu0 %v3250_v28  ;;  %3882 = vmatprep.subr.mxu1 %v3506_v44  ;;  %v3658_v0 = vld [vmem:[#allocation5 + $0xfd8] sm:$0xff]  ;;  %v3401_v28 = vld [vmem:[#allocation5 + $0x7d0] sm:$0xff] }
 0x710   :  { %3812 = vmatpush1.msra.mxu0 %v3249_v1  ;;  %3883 = vmatpush1.msra.mxu1 %v3505_v29  ;;  %v3657_v44 = vld [vmem:[#allocation5 + $0xfd0] sm:$0xff]  ;;  %v3394_v1 = vld [vmem:[#allocation5 + $0x798] sm:$0xff] }
 0x711   :  { %3813 = vmatprep.subr.mxu0 %v3242_v45  ;;  %3884 = vmatprep.subr.mxu1 %v3498_v47  ;;  %v3650_v29 = vld [vmem:[#allocation5 + $0xf98] sm:$0xff]  ;;  %v3393_v45 = vld [vmem:[#allocation5 + $0x790] sm:$0xff] }
 0x712   :  { %3814 = vmatpush1.msra.mxu0 %v3241_v63  ;;  %3885 = vmatpush1.msra.mxu1 %v3497_v50  ;;  %v3649_v47 = vld [vmem:[#allocation5 + $0xf90] sm:$0xff]  ;;  %v3386_v63 = vld [vmem:[#allocation5 + $0x758] sm:$0xff] }
 0x713   :  { %3815 = vmatprep.subr.mxu0 %v3234_v53  ;;  %3886 = vmatprep.subr.mxu1 %v3490_v54  ;;  %v3642_v50 = vld [vmem:[#allocation5 + $0xf58] sm:$0xff]  ;;  %v3385_v53 = vld [vmem:[#allocation5 + $0x750] sm:$0xff] }
 0x714   :  { %3816 = vmatpush1.msra.mxu0 %v3233_v18  ;;  %3887 = vmatpush1.msra.mxu1 %v3489_v58  ;;  %v3641_v54 = vld [vmem:[#allocation5 + $0xf50] sm:$0xff]  ;;  %v3378_v18 = vld [vmem:[#allocation5 + $0x718] sm:$0xff] }
 0x715   :  { %3817 = vmatprep.subr.mxu0 %v3226_v13  ;;  %3888 = vmatprep.subr.mxu1 %v3482_v62  ;;  %v3634_v58 = vld [vmem:[#allocation5 + $0xf18] sm:$0xff]  ;;  %v3377_v13 = vld [vmem:[#allocation5 + $0x710] sm:$0xff] }
 0x716   :  { %3818 = vmatpush1.msra.mxu0 %v3225_v26  ;;  %3889 = vmatpush1.msra.mxu1 %v3481_v22  ;;  %v3633_v62 = vld [vmem:[#allocation5 + $0xf10] sm:$0xff]  ;;  %v3370_v26 = vld [vmem:[#allocation5 + $0x6d8] sm:$0xff] }
 0x717   :  { %3819 = vmatprep.subr.mxu0 %v3218_v6  ;;  %3890 = vmatprep.subr.mxu1 %v3474_v23  ;;  %v3626_v22 = vld [vmem:[#allocation5 + $0xed8] sm:$0xff]  ;;  %v3369_v6 = vld [vmem:[#allocation5 + $0x6d0] sm:$0xff] }
 0x718   :  { %3820 = vmatpush1.msra.mxu0 %v3217_v15  ;;  %3891 = vmatpush1.msra.mxu1 %v3473_v20  ;;  %v3625_v23 = vld [vmem:[#allocation5 + $0xed0] sm:$0xff]  ;;  %v3362_v15 = vld [vmem:[#allocation5 + $0x698] sm:$0xff] }
 0x719   :  { %3821 = vmatprep.subr.mxu0 %v3210_v21  ;;  %3892 = vmatprep.subr.mxu1 %v3466_v24  ;;  %v3618_v20 = vld [vmem:[#allocation5 + $0xe98] sm:$0xff]  ;;  %v3361_v21 = vld [vmem:[#allocation5 + $0x690] sm:$0xff] }
 0x71a   :  { %3822 = vmatpush1.msra.mxu0 %v3209_v30  ;;  %3893 = vmatpush1.msra.mxu1 %v3465_v31  ;;  %v3617_v24 = vld [vmem:[#allocation5 + $0xe90] sm:$0xff]  ;;  %v3354_v30 = vld [vmem:[#allocation5 + $0x658] sm:$0xff] }
 0x71b   :  { %3823 = vmatprep.subr.mxu0 %v3202_v32  ;;  %3894 = vmatprep.subr.mxu1 %v3458_v48  ;;  %v3610_v31 = vld [vmem:[#allocation5 + $0xe58] sm:$0xff]  ;;  %v3353_v32 = vld [vmem:[#allocation5 + $0x650] sm:$0xff] }
 0x71c   :  { %3824 = vmatpush1.msra.mxu0 %v3201_v55  ;;  %3895 = vmatpush1.msra.mxu1 %v3457_v51  ;;  %v3609_v48 = vld [vmem:[#allocation5 + $0xe50] sm:$0xff]  ;;  %v3346_v55 = vld [vmem:[#allocation5 + $0x618] sm:$0xff] }
 0x71d   :  { %3825 = vmatprep.subr.mxu0 %v3194_v17  ;;  %3896 = vmatprep.subr.mxu1 %v3450_v12  ;;  %v3602_v51 = vld [vmem:[#allocation5 + $0xe18] sm:$0xff]  ;;  %v3345_v17 = vld [vmem:[#allocation5 + $0x610] sm:$0xff] }
 0x71e   :  { %3826 = vmatpush1.msra.mxu0 %v3193_v57  ;;  %3897 = vmatpush1.msra.mxu1 %v3449_v19  ;;  %v3601_v12 = vld [vmem:[#allocation5 + $0xe10] sm:$0xff]  ;;  %v3338_v57 = vld [vmem:[#allocation5 + $0x5d8] sm:$0xff] }
 0x71f   :  { %3827 = vmatprep.subr.mxu0 %v3186_v3  ;;  %3898 = vmatprep.subr.mxu1 %v3442_v11  ;;  %v3594_v19 = vld [vmem:[#allocation5 + $0xdd8] sm:$0xff]  ;;  %v3337_v3 = vld [vmem:[#allocation5 + $0x5d0] sm:$0xff] }
 0x720   :  { %3828 = vmatpush1.msra.mxu0 %v3185_v4  ;;  %3899 = vmatpush1.msra.mxu1 %v3441_v33  ;;  %v3593_v11 = vld [vmem:[#allocation5 + $0xdd0] sm:$0xff]  ;;  %v3330_v4 = vld [vmem:[#allocation5 + $0x598] sm:$0xff] }
 0x721   :  { %3829 = vmatprep.subr.mxu0 %v3178_v25  ;;  %3900 = vmatprep.subr.mxu1 %v3434_v9  ;;  %v3586_v33 = vld [vmem:[#allocation5 + $0xd98] sm:$0xff]  ;;  %v3329_v25 = vld [vmem:[#allocation5 + $0x590] sm:$0xff] }
 0x722   :  { %3830 = vmatpush1.msra.mxu0 %v3177_v14  ;;  %3901 = vmatpush1.msra.mxu1 %v3433_v10  ;;  %v3585_v9 = vld [vmem:[#allocation5 + $0xd90] sm:$0xff]  ;;  %v3322_v14 = vld [vmem:[#allocation5 + $0x558] sm:$0xff] }
 0x723   :  { %3831 = vmatprep.subr.mxu0 %v3170_v8  ;;  %3902 = vmatprep.subr.mxu1 %v3426_v34  ;;  %v3578_v10 = vld [vmem:[#allocation5 + $0xd58] sm:$0xff]  ;;  %v3321_v8 = vld [vmem:[#allocation5 + $0x550] sm:$0xff] }
 0x724   :  { %3832 = vmatpush1.msra.mxu0 %v3169_v61  ;;  %3903 = vmatpush1.msra.mxu1 %v3425_v35  ;;  %v3577_v34 = vld [vmem:[#allocation5 + $0xd50] sm:$0xff]  ;;  %v3314_v61 = vld [vmem:[#allocation5 + $0x518] sm:$0xff] }
 0x725   :  { %3833 = vmatprep.subr.mxu0 %v3162_v7  ;;  %3904 = vmatprep.subr.mxu1 %v3418_v42  ;;  %v3570_v35 = vld [vmem:[#allocation5 + $0xd18] sm:$0xff]  ;;  %v3313_v7 = vld [vmem:[#allocation5 + $0x510] sm:$0xff] }
 0x726   :  { %3834 = vmatpush1.msra.mxu0 %v3161_v39  ;;  %3905 = vmatpush1.msra.mxu1 %v3417_v43  ;;  %v3569_v42 = vld [vmem:[#allocation5 + $0xd10] sm:$0xff]  ;;  %v3306_v39 = vld [vmem:[#allocation5 + $0x4d8] sm:$0xff] }
 0x727   :  { %3835 = vmatprep.subr.mxu0 %v3154_v5  ;;  %3906 = vmatprep.subr.mxu1 %v3410_v59  ;;  %v3562_v43 = vld [vmem:[#allocation5 + $0xcd8] sm:$0xff]  ;;  %v3305_v5 = vld [vmem:[#allocation5 + $0x4d0] sm:$0xff] }
 0x728   :  { %3836 = vmatpush1.msra.mxu0 %v3153_v56  ;;  %3907 = vmatpush1.msra.mxu1 %v3409_v27  ;;  %v3561_v59 = vld [vmem:[#allocation5 + $0xcd0] sm:$0xff]  ;;  %v3298_v56 = vld [vmem:[#allocation5 + $0x498] sm:$0xff] }
 0x729   :  { %3837 = vmatprep.subr.mxu0 %v3402_v36  ;;  %3908 = vmatprep.subr.mxu1 %v3658_v0  ;;  %v3554_v27 = vld [vmem:[#allocation5 + $0xc98] sm:$0xff]  ;;  %v3297_v36 = vld [vmem:[#allocation5 + $0x490] sm:$0xff] }
 0x72a   :  { %3838 = vmatpush2.msra.mxu0 %v3401_v28  ;;  %3909 = vmatpush2.msra.mxu1 %v3657_v44  ;;  %v3553_v0 = vld [vmem:[#allocation5 + $0xc90] sm:$0xff]  ;;  %v3290_v28 = vld [vmem:[#allocation5 + $0x458] sm:$0xff] }
 0x72b   :  { %3839 = vmatprep.subr.mxu0 %v3394_v1  ;;  %3910 = vmatprep.subr.mxu1 %v3650_v29  ;;  %v3546_v44 = vld [vmem:[#allocation5 + $0xc58] sm:$0xff]  ;;  %v3289_v1 = vld [vmem:[#allocation5 + $0x450] sm:$0xff] }
 0x72c   :  { %3840 = vmatpush2.msra.mxu0 %v3393_v45  ;;  %3911 = vmatpush2.msra.mxu1 %v3649_v47  ;;  %v3545_v29 = vld [vmem:[#allocation5 + $0xc50] sm:$0xff]  ;;  %v3282_v45 = vld [vmem:[#allocation5 + $0x418] sm:$0xff] }
 0x72d   :  { %3841 = vmatprep.subr.mxu0 %v3386_v63  ;;  %3912 = vmatprep.subr.mxu1 %v3642_v50  ;;  %v3538_v47 = vld [vmem:[#allocation5 + $0xc18] sm:$0xff]  ;;  %v3281_v63 = vld [vmem:[#allocation5 + $0x410] sm:$0xff] }
 0x72e   :  { %3842 = vmatpush2.msra.mxu0 %v3385_v53  ;;  %3913 = vmatpush2.msra.mxu1 %v3641_v54  ;;  %v3537_v50 = vld [vmem:[#allocation5 + $0xc10] sm:$0xff]  ;;  %v3276_v53 = vld [vmem:[#allocation5 + $0x3e8] sm:$0xff] }
 0x72f   :  { %3843 = vmatprep.subr.mxu0 %v3378_v18  ;;  %3914 = vmatprep.subr.mxu1 %v3634_v58  ;;  %v3532_v54 = vld [vmem:[#allocation5 + $0xbe8] sm:$0xff]  ;;  %v3275_v18 = vld [vmem:[#allocation5 + $0x3e0] sm:$0xff] }
 0x730   :  { %3844 = vmatpush2.msra.mxu0 %v3377_v13  ;;  %3915 = vmatpush2.msra.mxu1 %v3633_v62  ;;  %v3531_v58 = vld [vmem:[#allocation5 + $0xbe0] sm:$0xff]  ;;  %v3268_v13 = vld [vmem:[#allocation5 + $0x3a8] sm:$0xff] }
 0x731   :  { %3845 = vmatprep.subr.mxu0 %v3370_v26  ;;  %3916 = vmatprep.subr.mxu1 %v3626_v22  ;;  %v3524_v62 = vld [vmem:[#allocation5 + $0xba8] sm:$0xff]  ;;  %v3267_v26 = vld [vmem:[#allocation5 + $0x3a0] sm:$0xff] }
 0x732   :  { %3846 = vmatpush2.msra.mxu0 %v3369_v6  ;;  %3917 = vmatpush2.msra.mxu1 %v3625_v23  ;;  %v3523_v22 = vld [vmem:[#allocation5 + $0xba0] sm:$0xff]  ;;  %v3260_v6 = vld [vmem:[#allocation5 + $0x368] sm:$0xff] }
 0x733   :  { %3847 = vmatprep.subr.mxu0 %v3362_v15  ;;  %3918 = vmatprep.subr.mxu1 %v3618_v20  ;;  %v3516_v23 = vld [vmem:[#allocation5 + $0xb68] sm:$0xff]  ;;  %v3259_v15 = vld [vmem:[#allocation5 + $0x360] sm:$0xff] }
 0x734   :  { %3848 = vmatpush2.msra.mxu0 %v3361_v21  ;;  %3919 = vmatpush2.msra.mxu1 %v3617_v24  ;;  %v3515_v20 = vld [vmem:[#allocation5 + $0xb60] sm:$0xff]  ;;  %v3252_v21 = vld [vmem:[#allocation5 + $0x328] sm:$0xff] }
 0x735   :  { %3849 = vmatprep.subr.mxu0 %v3354_v30  ;;  %3920 = vmatprep.subr.mxu1 %v3610_v31  ;;  %v3508_v24 = vld [vmem:[#allocation5 + $0xb28] sm:$0xff]  ;;  %v3251_v30 = vld [vmem:[#allocation5 + $0x320] sm:$0xff] }
 0x736   :  { %3850 = vmatpush2.msra.mxu0 %v3353_v32  ;;  %3921 = vmatpush2.msra.mxu1 %v3609_v48  ;;  %v3507_v31 = vld [vmem:[#allocation5 + $0xb20] sm:$0xff]  ;;  %v3244_v32 = vld [vmem:[#allocation5 + $0x2e8] sm:$0xff] }
 0x737   :  { %3851 = vmatprep.subr.mxu0 %v3346_v55  ;;  %3922 = vmatprep.subr.mxu1 %v3602_v51  ;;  %v3500_v48 = vld [vmem:[#allocation5 + $0xae8] sm:$0xff]  ;;  %v3243_v55 = vld [vmem:[#allocation5 + $0x2e0] sm:$0xff] }
 0x738   :  { %3852 = vmatpush2.msra.mxu0 %v3345_v17  ;;  %3923 = vmatpush2.msra.mxu1 %v3601_v12  ;;  %v3499_v51 = vld [vmem:[#allocation5 + $0xae0] sm:$0xff]  ;;  %v3236_v17 = vld [vmem:[#allocation5 + $0x2a8] sm:$0xff] }
 0x739   :  { %3853 = vmatprep.subr.mxu0 %v3338_v57  ;;  %3924 = vmatprep.subr.mxu1 %v3594_v19  ;;  %v3492_v12 = vld [vmem:[#allocation5 + $0xaa8] sm:$0xff]  ;;  %v3235_v57 = vld [vmem:[#allocation5 + $0x2a0] sm:$0xff] }
 0x73a   :  { %3854 = vmatpush2.msra.mxu0 %v3337_v3  ;;  %3925 = vmatpush2.msra.mxu1 %v3593_v11  ;;  %v3491_v19 = vld [vmem:[#allocation5 + $0xaa0] sm:$0xff]  ;;  %v3228_v3 = vld [vmem:[#allocation5 + $0x268] sm:$0xff] }
 0x73b   :  { %3855 = vmatprep.subr.mxu0 %v3330_v4  ;;  %3926 = vmatprep.subr.mxu1 %v3586_v33  ;;  %v3484_v11 = vld [vmem:[#allocation5 + $0xa68] sm:$0xff]  ;;  %v3227_v4 = vld [vmem:[#allocation5 + $0x260] sm:$0xff] }
 0x73c   :  { %3856 = vmatpush2.msra.mxu0 %v3329_v25  ;;  %3927 = vmatpush2.msra.mxu1 %v3585_v9  ;;  %v3483_v33 = vld [vmem:[#allocation5 + $0xa60] sm:$0xff]  ;;  %v3220_v25 = vld [vmem:[#allocation5 + $0x228] sm:$0xff] }
 0x73d   :  { %3857 = vmatprep.subr.mxu0 %v3322_v14  ;;  %3928 = vmatprep.subr.mxu1 %v3578_v10  ;;  %v3476_v9 = vld [vmem:[#allocation5 + $0xa28] sm:$0xff]  ;;  %v3219_v14 = vld [vmem:[#allocation5 + $0x220] sm:$0xff] }
 0x73e   :  { %3858 = vmatpush2.msra.mxu0 %v3321_v8  ;;  %3929 = vmatpush2.msra.mxu1 %v3577_v34  ;;  %v3475_v10 = vld [vmem:[#allocation5 + $0xa20] sm:$0xff]  ;;  %v3212_v8 = vld [vmem:[#allocation5 + $0x1e8] sm:$0xff] }
 0x73f   :  { %3859 = vmatprep.subr.mxu0 %v3314_v61  ;;  %3930 = vmatprep.subr.mxu1 %v3570_v35  ;;  %v3468_v34 = vld [vmem:[#allocation5 + $0x9e8] sm:$0xff]  ;;  %v3211_v61 = vld [vmem:[#allocation5 + $0x1e0] sm:$0xff] }
 0x740   :  { %3860 = vmatpush2.msra.mxu0 %v3313_v7  ;;  %3931 = vmatpush2.msra.mxu1 %v3569_v42  ;;  %v3467_v35 = vld [vmem:[#allocation5 + $0x9e0] sm:$0xff]  ;;  %v3204_v7 = vld [vmem:[#allocation5 + $0x1a8] sm:$0xff] }
 0x741   :  { %3861 = vmatprep.subr.mxu0 %v3306_v39  ;;  %3932 = vmatprep.subr.mxu1 %v3562_v43  ;;  %v3460_v42 = vld [vmem:[#allocation5 + $0x9a8] sm:$0xff]  ;;  %v3203_v39 = vld [vmem:[#allocation5 + $0x1a0] sm:$0xff] }
 0x742   :  { %3862 = vmatpush2.msra.mxu0 %v3305_v5  ;;  %3933 = vmatpush2.msra.mxu1 %v3561_v59  ;;  %v3459_v43 = vld [vmem:[#allocation5 + $0x9a0] sm:$0xff]  ;;  %v3196_v5 = vld [vmem:[#allocation5 + $0x168] sm:$0xff] }
 0x743   :  { %3863 = vmatprep.subr.mxu0 %v3298_v56  ;;  %3934 = vmatprep.subr.mxu1 %v3554_v27  ;;  %v3452_v59 = vld [vmem:[#allocation5 + $0x968] sm:$0xff]  ;;  %v3195_v56 = vld [vmem:[#allocation5 + $0x160] sm:$0xff] }
 0x744   :  { %3864 = vmatpush2.msra.mxu0 %v3297_v36  ;;  %3935 = vmatpush2.msra.mxu1 %v3553_v0  ;;  %v3451_v27 = vld [vmem:[#allocation5 + $0x960] sm:$0xff]  ;;  %v3188_v36 = vld [vmem:[#allocation5 + $0x128] sm:$0xff] }
 0x745   :  { %3865 = vmatprep.subr.mxu0 %v3290_v28  ;;  %3936 = vmatprep.subr.mxu1 %v3546_v44  ;;  %v3444_v0 = vld [vmem:[#allocation5 + $0x928] sm:$0xff]  ;;  %v3187_v28 = vld [vmem:[#allocation5 + $0x120] sm:$0xff] }
 0x746   :  { %3866 = vmatpush2.msra.mxu0 %v3289_v1  ;;  %3937 = vmatpush2.msra.mxu1 %v3545_v29  ;;  %v3443_v44 = vld [vmem:[#allocation5 + $0x920] sm:$0xff]  ;;  %v3180_v1 = vld [vmem:[#allocation5 + $0xe8] sm:$0xff] }
 0x747   :  { %3867 = vmatprep.subr.mxu0 %v3282_v45  ;;  %3938 = vmatprep.subr.mxu1 %v3538_v47  ;;  %v3436_v29 = vld [vmem:[#allocation5 + $0x8e8] sm:$0xff]  ;;  %v3179_v45 = vld [vmem:[#allocation5 + $0xe0] sm:$0xff] }
 0x748   :  { %3868 = vmatpush2.msra.mxu0 %v3281_v63  ;;  %3939 = vmatpush2.msra.mxu1 %v3537_v50  ;;  %v3435_v47 = vld [vmem:[#allocation5 + $0x8e0] sm:$0xff]  ;;  %v3172_v63 = vld [vmem:[#allocation5 + $0xa8] sm:$0xff] }
 0x749   :  { %3870 = vmatmul.mubr.f32.vlgmr.msra.gmra.mxu0 %v7845_v40  ;;  %3941 = vmatmul.mubr.f32.vlgmr.msra.gmra.mxu1 %v7847_v37  ;;  %v3428_v50 = vld [vmem:[#allocation5 + $0x8a8] sm:$0xff] }
 0x74a   :  { %3947 = vmatprep.subr.mxu0 %v3276_v53  ;;  %4018 = vmatprep.subr.mxu1 %v3532_v54  ;;  %v3171_v53 = vld [vmem:[#allocation5 + $0xa0] sm:$0xff] }
 0x74b   :  { %3948 = vmatpush1.msra.mxu0 %v3275_v18  ;;  %4011 = vmatprep.mubr.f32.mxu0 %v7841_v16  ;;  %v3427_v54 = vld [vmem:[#allocation5 + $0x8a0] sm:$0xff]  ;;  %v3164_v18 = vld [vmem:[#allocation5 + $0x68] sm:$0xff] }
 0x74c   :  { %4019 = vmatpush1.msra.mxu1 %v3531_v58  ;;  %4082 = vmatprep.mubr.f32.mxu1 %v7843_v60  ;;  %v3420_v58 = vld [vmem:[#allocation5 + $0x868] sm:$0xff] }
 0x74d   :  { %3949 = vmatprep.subr.mxu0 %v3268_v13  ;;  %4020 = vmatprep.subr.mxu1 %v3524_v62  ;;  %v3163_v13 = vld [vmem:[#allocation5 + $0x60] sm:$0xff] }
 0x74e   :  { %3950 = vmatpush1.msra.mxu0 %v3267_v26  ;;  %4021 = vmatpush1.msra.mxu1 %v3523_v22  ;;  %v3419_v62 = vld [vmem:[#allocation5 + $0x860] sm:$0xff]  ;;  %v3156_v26 = vld [vmem:[#allocation5 + $0x28] sm:$0xff] }
 0x74f   :  { %3951 = vmatprep.subr.mxu0 %v3260_v6  ;;  %4022 = vmatprep.subr.mxu1 %v3516_v23  ;;  %v3412_v22 = vld [vmem:[#allocation5 + $0x828] sm:$0xff]  ;;  %v3155_v6 = vld [vmem:[#allocation5 + $0x20] sm:$0xff] }
 0x750   :  { %3952 = vmatpush1.msra.mxu0 %v3259_v15  ;;  %4023 = vmatpush1.msra.mxu1 %v3515_v20  ;;  %v3411_v23 = vld [vmem:[#allocation5 + $0x820] sm:$0xff]  ;;  %v3404_v15 = vld [vmem:[#allocation5 + $0x7e8] sm:$0xff] }
 0x751   :  { %3953 = vmatprep.subr.mxu0 %v3252_v21  ;;  %4024 = vmatprep.subr.mxu1 %v3508_v24  ;;  %v3660_v20 = vld [vmem:[#allocation5 + $0xfe8] sm:$0xff]  ;;  %v3403_v21 = vld [vmem:[#allocation5 + $0x7e0] sm:$0xff] }
 0x752   :  { %3954 = vmatpush1.msra.mxu0 %v3251_v30  ;;  %4025 = vmatpush1.msra.mxu1 %v3507_v31  ;;  %v3659_v24 = vld [vmem:[#allocation5 + $0xfe0] sm:$0xff]  ;;  %v3396_v30 = vld [vmem:[#allocation5 + $0x7a8] sm:$0xff] }
 0x753   :  { %3955 = vmatprep.subr.mxu0 %v3244_v32  ;;  %4026 = vmatprep.subr.mxu1 %v3500_v48  ;;  %v3652_v31 = vld [vmem:[#allocation5 + $0xfa8] sm:$0xff]  ;;  %v3395_v32 = vld [vmem:[#allocation5 + $0x7a0] sm:$0xff] }
 0x754   :  { %3956 = vmatpush1.msra.mxu0 %v3243_v55  ;;  %4027 = vmatpush1.msra.mxu1 %v3499_v51  ;;  %v3651_v48 = vld [vmem:[#allocation5 + $0xfa0] sm:$0xff]  ;;  %v3388_v55 = vld [vmem:[#allocation5 + $0x768] sm:$0xff] }
 0x755   :  { %3957 = vmatprep.subr.mxu0 %v3236_v17  ;;  %4028 = vmatprep.subr.mxu1 %v3492_v12  ;;  %v3644_v51 = vld [vmem:[#allocation5 + $0xf68] sm:$0xff]  ;;  %v3387_v17 = vld [vmem:[#allocation5 + $0x760] sm:$0xff] }
 0x756   :  { %3958 = vmatpush1.msra.mxu0 %v3235_v57  ;;  %4029 = vmatpush1.msra.mxu1 %v3491_v19  ;;  %v3643_v12 = vld [vmem:[#allocation5 + $0xf60] sm:$0xff]  ;;  %v3380_v57 = vld [vmem:[#allocation5 + $0x728] sm:$0xff] }
 0x757   :  { %3959 = vmatprep.subr.mxu0 %v3228_v3  ;;  %4030 = vmatprep.subr.mxu1 %v3484_v11  ;;  %v3636_v19 = vld [vmem:[#allocation5 + $0xf28] sm:$0xff]  ;;  %v3379_v3 = vld [vmem:[#allocation5 + $0x720] sm:$0xff] }
 0x758   :  { %3960 = vmatpush1.msra.mxu0 %v3227_v4  ;;  %4031 = vmatpush1.msra.mxu1 %v3483_v33  ;;  %v3635_v11 = vld [vmem:[#allocation5 + $0xf20] sm:$0xff]  ;;  %v3372_v4 = vld [vmem:[#allocation5 + $0x6e8] sm:$0xff] }
 0x759   :  { %3961 = vmatprep.subr.mxu0 %v3220_v25  ;;  %4032 = vmatprep.subr.mxu1 %v3476_v9  ;;  %v3628_v33 = vld [vmem:[#allocation5 + $0xee8] sm:$0xff]  ;;  %v3371_v25 = vld [vmem:[#allocation5 + $0x6e0] sm:$0xff] }
 0x75a   :  { %3962 = vmatpush1.msra.mxu0 %v3219_v14  ;;  %4033 = vmatpush1.msra.mxu1 %v3475_v10  ;;  %v3627_v9 = vld [vmem:[#allocation5 + $0xee0] sm:$0xff]  ;;  %v3364_v14 = vld [vmem:[#allocation5 + $0x6a8] sm:$0xff] }
 0x75b   :  { %3963 = vmatprep.subr.mxu0 %v3212_v8  ;;  %4034 = vmatprep.subr.mxu1 %v3468_v34  ;;  %v3620_v10 = vld [vmem:[#allocation5 + $0xea8] sm:$0xff]  ;;  %v3363_v8 = vld [vmem:[#allocation5 + $0x6a0] sm:$0xff] }
 0x75c   :  { %3964 = vmatpush1.msra.mxu0 %v3211_v61  ;;  %4035 = vmatpush1.msra.mxu1 %v3467_v35  ;;  %v3619_v34 = vld [vmem:[#allocation5 + $0xea0] sm:$0xff]  ;;  %v3356_v61 = vld [vmem:[#allocation5 + $0x668] sm:$0xff] }
 0x75d   :  { %3965 = vmatprep.subr.mxu0 %v3204_v7  ;;  %4036 = vmatprep.subr.mxu1 %v3460_v42  ;;  %v3612_v35 = vld [vmem:[#allocation5 + $0xe68] sm:$0xff]  ;;  %v3355_v7 = vld [vmem:[#allocation5 + $0x660] sm:$0xff] }
 0x75e   :  { %3966 = vmatpush1.msra.mxu0 %v3203_v39  ;;  %4037 = vmatpush1.msra.mxu1 %v3459_v43  ;;  %v3611_v42 = vld [vmem:[#allocation5 + $0xe60] sm:$0xff]  ;;  %v3348_v39 = vld [vmem:[#allocation5 + $0x628] sm:$0xff] }
 0x75f   :  { %3967 = vmatprep.subr.mxu0 %v3196_v5  ;;  %4038 = vmatprep.subr.mxu1 %v3452_v59  ;;  %v3604_v43 = vld [vmem:[#allocation5 + $0xe28] sm:$0xff]  ;;  %v3347_v5 = vld [vmem:[#allocation5 + $0x620] sm:$0xff] }
 0x760   :  { %3968 = vmatpush1.msra.mxu0 %v3195_v56  ;;  %4039 = vmatpush1.msra.mxu1 %v3451_v27  ;;  %v3603_v59 = vld [vmem:[#allocation5 + $0xe20] sm:$0xff]  ;;  %v3340_v56 = vld [vmem:[#allocation5 + $0x5e8] sm:$0xff] }
 0x761   :  { %3969 = vmatprep.subr.mxu0 %v3188_v36  ;;  %4040 = vmatprep.subr.mxu1 %v3444_v0  ;;  %v3596_v27 = vld [vmem:[#allocation5 + $0xde8] sm:$0xff]  ;;  %v3339_v36 = vld [vmem:[#allocation5 + $0x5e0] sm:$0xff] }
 0x762   :  { %3970 = vmatpush1.msra.mxu0 %v3187_v28  ;;  %4041 = vmatpush1.msra.mxu1 %v3443_v44  ;;  %v3595_v0 = vld [vmem:[#allocation5 + $0xde0] sm:$0xff]  ;;  %v3332_v28 = vld [vmem:[#allocation5 + $0x5a8] sm:$0xff] }
 0x763   :  { %3971 = vmatprep.subr.mxu0 %v3180_v1  ;;  %4042 = vmatprep.subr.mxu1 %v3436_v29  ;;  %v3588_v44 = vld [vmem:[#allocation5 + $0xda8] sm:$0xff]  ;;  %v3331_v1 = vld [vmem:[#allocation5 + $0x5a0] sm:$0xff] }
 0x764   :  { %3972 = vmatpush1.msra.mxu0 %v3179_v45  ;;  %4043 = vmatpush1.msra.mxu1 %v3435_v47  ;;  %v3587_v29 = vld [vmem:[#allocation5 + $0xda0] sm:$0xff]  ;;  %v3324_v45 = vld [vmem:[#allocation5 + $0x568] sm:$0xff] }
 0x765   :  { %3973 = vmatprep.subr.mxu0 %v3172_v63  ;;  %4044 = vmatprep.subr.mxu1 %v3428_v50  ;;  %v3580_v47 = vld [vmem:[#allocation5 + $0xd68] sm:$0xff]  ;;  %v3323_v63 = vld [vmem:[#allocation5 + $0x560] sm:$0xff] }
 0x766   :  { %3974 = vmatpush1.msra.mxu0 %v3171_v53  ;;  %4045 = vmatpush1.msra.mxu1 %v3427_v54  ;;  %v3579_v50 = vld [vmem:[#allocation5 + $0xd60] sm:$0xff]  ;;  %v3316_v53 = vld [vmem:[#allocation5 + $0x528] sm:$0xff] }
 0x767   :  { %3975 = vmatprep.subr.mxu0 %v3164_v18  ;;  %4046 = vmatprep.subr.mxu1 %v3420_v58  ;;  %v3572_v54 = vld [vmem:[#allocation5 + $0xd28] sm:$0xff]  ;;  %v3315_v18 = vld [vmem:[#allocation5 + $0x520] sm:$0xff] }
 0x768   :  { %3976 = vmatpush1.msra.mxu0 %v3163_v13  ;;  %4047 = vmatpush1.msra.mxu1 %v3419_v62  ;;  %v3571_v58 = vld [vmem:[#allocation5 + $0xd20] sm:$0xff]  ;;  %v3308_v13 = vld [vmem:[#allocation5 + $0x4e8] sm:$0xff] }
 0x769   :  { %3977 = vmatprep.subr.mxu0 %v3156_v26  ;;  %4048 = vmatprep.subr.mxu1 %v3412_v22  ;;  %v3564_v62 = vld [vmem:[#allocation5 + $0xce8] sm:$0xff]  ;;  %v3307_v26 = vld [vmem:[#allocation5 + $0x4e0] sm:$0xff] }
 0x76a   :  { %3978 = vmatpush1.msra.mxu0 %v3155_v6  ;;  %4049 = vmatpush1.msra.mxu1 %v3411_v23  ;;  %v3563_v22 = vld [vmem:[#allocation5 + $0xce0] sm:$0xff]  ;;  %v3300_v6 = vld [vmem:[#allocation5 + $0x4a8] sm:$0xff] }
 0x76b   :  { %3979 = vmatprep.subr.mxu0 %v3404_v15  ;;  %4050 = vmatprep.subr.mxu1 %v3660_v20  ;;  %v3556_v23 = vld [vmem:[#allocation5 + $0xca8] sm:$0xff]  ;;  %v3299_v15 = vld [vmem:[#allocation5 + $0x4a0] sm:$0xff] }
 0x76c   :  { %3980 = vmatpush2.msra.mxu0 %v3403_v21  ;;  %4051 = vmatpush2.msra.mxu1 %v3659_v24  ;;  %v3555_v20 = vld [vmem:[#allocation5 + $0xca0] sm:$0xff]  ;;  %v3292_v21 = vld [vmem:[#allocation5 + $0x468] sm:$0xff] }
 0x76d   :  { %3981 = vmatprep.subr.mxu0 %v3396_v30  ;;  %4052 = vmatprep.subr.mxu1 %v3652_v31  ;;  %v3548_v24 = vld [vmem:[#allocation5 + $0xc68] sm:$0xff]  ;;  %v3291_v30 = vld [vmem:[#allocation5 + $0x460] sm:$0xff] }
 0x76e   :  { %3982 = vmatpush2.msra.mxu0 %v3395_v32  ;;  %4053 = vmatpush2.msra.mxu1 %v3651_v48  ;;  %v3547_v31 = vld [vmem:[#allocation5 + $0xc60] sm:$0xff]  ;;  %v3284_v32 = vld [vmem:[#allocation5 + $0x428] sm:$0xff] }
 0x76f   :  { %3983 = vmatprep.subr.mxu0 %v3388_v55  ;;  %4054 = vmatprep.subr.mxu1 %v3644_v51  ;;  %v3540_v48 = vld [vmem:[#allocation5 + $0xc28] sm:$0xff]  ;;  %v3283_v55 = vld [vmem:[#allocation5 + $0x420] sm:$0xff] }
 0x770   :  { %3984 = vmatpush2.msra.mxu0 %v3387_v17  ;;  %4055 = vmatpush2.msra.mxu1 %v3643_v12  ;;  %v3539_v51 = vld [vmem:[#allocation5 + $0xc20] sm:$0xff]  ;;  %v3278_v17 = vld [vmem:[#allocation5 + $0x3f8] sm:$0xff] }
 0x771   :  { %3985 = vmatprep.subr.mxu0 %v3380_v57  ;;  %4056 = vmatprep.subr.mxu1 %v3636_v19  ;;  %v3534_v12 = vld [vmem:[#allocation5 + $0xbf8] sm:$0xff]  ;;  %v3277_v57 = vld [vmem:[#allocation5 + $0x3f0] sm:$0xff] }
 0x772   :  { %3986 = vmatpush2.msra.mxu0 %v3379_v3  ;;  %4057 = vmatpush2.msra.mxu1 %v3635_v11  ;;  %v3533_v19 = vld [vmem:[#allocation5 + $0xbf0] sm:$0xff]  ;;  %v3270_v3 = vld [vmem:[#allocation5 + $0x3b8] sm:$0xff] }
 0x773   :  { %3987 = vmatprep.subr.mxu0 %v3372_v4  ;;  %4058 = vmatprep.subr.mxu1 %v3628_v33  ;;  %v3526_v11 = vld [vmem:[#allocation5 + $0xbb8] sm:$0xff]  ;;  %v3269_v4 = vld [vmem:[#allocation5 + $0x3b0] sm:$0xff] }
 0x774   :  { %3988 = vmatpush2.msra.mxu0 %v3371_v25  ;;  %4059 = vmatpush2.msra.mxu1 %v3627_v9  ;;  %v3525_v33 = vld [vmem:[#allocation5 + $0xbb0] sm:$0xff]  ;;  %v3262_v25 = vld [vmem:[#allocation5 + $0x378] sm:$0xff] }
 0x775   :  { %3989 = vmatprep.subr.mxu0 %v3364_v14  ;;  %4060 = vmatprep.subr.mxu1 %v3620_v10  ;;  %v3518_v9 = vld [vmem:[#allocation5 + $0xb78] sm:$0xff]  ;;  %v3261_v14 = vld [vmem:[#allocation5 + $0x370] sm:$0xff] }
 0x776   :  { %3990 = vmatpush2.msra.mxu0 %v3363_v8  ;;  %4061 = vmatpush2.msra.mxu1 %v3619_v34  ;;  %v3517_v10 = vld [vmem:[#allocation5 + $0xb70] sm:$0xff]  ;;  %v3254_v8 = vld [vmem:[#allocation5 + $0x338] sm:$0xff] }
 0x777   :  { %3991 = vmatprep.subr.mxu0 %v3356_v61  ;;  %4062 = vmatprep.subr.mxu1 %v3612_v35  ;;  %v3510_v34 = vld [vmem:[#allocation5 + $0xb38] sm:$0xff]  ;;  %v3253_v61 = vld [vmem:[#allocation5 + $0x330] sm:$0xff] }
 0x778   :  { %3992 = vmatpush2.msra.mxu0 %v3355_v7  ;;  %4063 = vmatpush2.msra.mxu1 %v3611_v42  ;;  %v3509_v35 = vld [vmem:[#allocation5 + $0xb30] sm:$0xff]  ;;  %v3502_v7 = vld [vmem:[#allocation5 + $0xaf8] sm:$0xff] }
 0x779   :  { %3993 = vmatprep.subr.mxu0 %v3348_v39  ;;  %4064 = vmatprep.subr.mxu1 %v3604_v43  ;;  %v3501_v42 = vld [vmem:[#allocation5 + $0xaf0] sm:$0xff]  ;;  %v3238_v39 = vld [vmem:[#allocation5 + $0x2b8] sm:$0xff] }
 0x77a   :  { %3994 = vmatpush2.msra.mxu0 %v3347_v5  ;;  %4065 = vmatpush2.msra.mxu1 %v3603_v59  ;;  %v3494_v43 = vld [vmem:[#allocation5 + $0xab8] sm:$0xff]  ;;  %v3237_v5 = vld [vmem:[#allocation5 + $0x2b0] sm:$0xff] }
 0x77b   :  { %3995 = vmatprep.subr.mxu0 %v3340_v56  ;;  %4066 = vmatprep.subr.mxu1 %v3596_v27  ;;  %v3493_v59 = vld [vmem:[#allocation5 + $0xab0] sm:$0xff]  ;;  %v3230_v56 = vld [vmem:[#allocation5 + $0x278] sm:$0xff] }
 0x77c   :  { %3996 = vmatpush2.msra.mxu0 %v3339_v36  ;;  %4067 = vmatpush2.msra.mxu1 %v3595_v0  ;;  %v3486_v27 = vld [vmem:[#allocation5 + $0xa78] sm:$0xff]  ;;  %v3229_v36 = vld [vmem:[#allocation5 + $0x270] sm:$0xff] }
 0x77d   :  { %3997 = vmatprep.subr.mxu0 %v3332_v28  ;;  %4068 = vmatprep.subr.mxu1 %v3588_v44  ;;  %v3485_v0 = vld [vmem:[#allocation5 + $0xa70] sm:$0xff]  ;;  %v3222_v28 = vld [vmem:[#allocation5 + $0x238] sm:$0xff] }
 0x77e   :  { %3998 = vmatpush2.msra.mxu0 %v3331_v1  ;;  %4069 = vmatpush2.msra.mxu1 %v3587_v29  ;;  %v3478_v44 = vld [vmem:[#allocation5 + $0xa38] sm:$0xff]  ;;  %v3221_v1 = vld [vmem:[#allocation5 + $0x230] sm:$0xff] }
 0x77f   :  { %3999 = vmatprep.subr.mxu0 %v3324_v45  ;;  %4070 = vmatprep.subr.mxu1 %v3580_v47  ;;  %v3477_v29 = vld [vmem:[#allocation5 + $0xa30] sm:$0xff]  ;;  %v3214_v45 = vld [vmem:[#allocation5 + $0x1f8] sm:$0xff] }
 0x780   :  { %4000 = vmatpush2.msra.mxu0 %v3323_v63  ;;  %4071 = vmatpush2.msra.mxu1 %v3579_v50  ;;  %v3470_v47 = vld [vmem:[#allocation5 + $0x9f8] sm:$0xff]  ;;  %v3213_v63 = vld [vmem:[#allocation5 + $0x1f0] sm:$0xff] }
 0x781   :  { %4001 = vmatprep.subr.mxu0 %v3316_v53  ;;  %4072 = vmatprep.subr.mxu1 %v3572_v54  ;;  %v3469_v50 = vld [vmem:[#allocation5 + $0x9f0] sm:$0xff]  ;;  %v3206_v53 = vld [vmem:[#allocation5 + $0x1b8] sm:$0xff] }
 0x782   :  { %4002 = vmatpush2.msra.mxu0 %v3315_v18  ;;  %4073 = vmatpush2.msra.mxu1 %v3571_v58  ;;  %v3462_v54 = vld [vmem:[#allocation5 + $0x9b8] sm:$0xff]  ;;  %v3205_v18 = vld [vmem:[#allocation5 + $0x1b0] sm:$0xff] }
 0x783   :  { %4003 = vmatprep.subr.mxu0 %v3308_v13  ;;  %4074 = vmatprep.subr.mxu1 %v3564_v62  ;;  %v3461_v58 = vld [vmem:[#allocation5 + $0x9b0] sm:$0xff]  ;;  %v3198_v13 = vld [vmem:[#allocation5 + $0x178] sm:$0xff] }
 0x784   :  { %4004 = vmatpush2.msra.mxu0 %v3307_v26  ;;  %4075 = vmatpush2.msra.mxu1 %v3563_v22  ;;  %v3454_v62 = vld [vmem:[#allocation5 + $0x978] sm:$0xff]  ;;  %v3197_v26 = vld [vmem:[#allocation5 + $0x170] sm:$0xff] }
 0x785   :  { %4005 = vmatprep.subr.mxu0 %v3300_v6  ;;  %4076 = vmatprep.subr.mxu1 %v3556_v23  ;;  %v3453_v22 = vld [vmem:[#allocation5 + $0x970] sm:$0xff]  ;;  %v3190_v6 = vld [vmem:[#allocation5 + $0x138] sm:$0xff] }
 0x786   :  { %4006 = vmatpush2.msra.mxu0 %v3299_v15  ;;  %4077 = vmatpush2.msra.mxu1 %v3555_v20  ;;  %v3446_v23 = vld [vmem:[#allocation5 + $0x938] sm:$0xff]  ;;  %v3189_v15 = vld [vmem:[#allocation5 + $0x130] sm:$0xff] }
 0x787   :  { %4007 = vmatprep.subr.mxu0 %v3292_v21  ;;  %4078 = vmatprep.subr.mxu1 %v3548_v24  ;;  %v3445_v20 = vld [vmem:[#allocation5 + $0x930] sm:$0xff]  ;;  %v3182_v21 = vld [vmem:[#allocation5 + $0xf8] sm:$0xff] }
 0x788   :  { %4008 = vmatpush2.msra.mxu0 %v3291_v30  ;;  %4079 = vmatpush2.msra.mxu1 %v3547_v31  ;;  %v3438_v24 = vld [vmem:[#allocation5 + $0x8f8] sm:$0xff]  ;;  %v3181_v30 = vld [vmem:[#allocation5 + $0xf0] sm:$0xff] }
 0x789   :  { %4009 = vmatprep.subr.mxu0 %v3284_v32  ;;  %4080 = vmatprep.subr.mxu1 %v3540_v48  ;;  %v3437_v31 = vld [vmem:[#allocation5 + $0x8f0] sm:$0xff]  ;;  %v3174_v32 = vld [vmem:[#allocation5 + $0xb8] sm:$0xff] }
 0x78a   :  { %4010 = vmatpush2.msra.mxu0 %v3283_v55  ;;  %4081 = vmatpush2.msra.mxu1 %v3539_v51  ;;  %v3430_v48 = vld [vmem:[#allocation5 + $0x8b8] sm:$0xff]  ;;  %v3173_v55 = vld [vmem:[#allocation5 + $0xb0] sm:$0xff] }
 0x78b   :  { %4012 = vmatmul.mubr.f32.vlgmr.msra.gmra.mxu0 %v7845_v40  ;;  %4083 = vmatmul.mubr.f32.vlgmr.msra.gmra.mxu1 %v7847_v37  ;;  %v3429_v51 = vld [vmem:[#allocation5 + $0x8b0] sm:$0xff] }
 0x78c   :  { %4089 = vmatprep.subr.mxu0 %v3278_v17  ;;  %4160 = vmatprep.subr.mxu1 %v3534_v12  ;;  %v3166_v17 = vld [vmem:[#allocation5 + $0x78] sm:$0xff] }
 0x78d   :  { %4090 = vmatpush1.msra.mxu0 %v3277_v57  ;;  %4153 = vmatprep.mubr.f32.mxu0 %v7841_v16  ;;  %v3246_v16 = vld [vmem:[#allocation5 + $0x2f8] sm:$0xff]  ;;  %v3165_v57 = vld [vmem:[#allocation5 + $0x70] sm:$0xff] }
 0x78e   :  { %4161 = vmatpush1.msra.mxu1 %v3533_v19  ;;  %4224 = vmatprep.mubr.f32.mxu1 %v7843_v60  ;;  %v3245_v60 = vld [vmem:[#allocation5 + $0x2f0] sm:$0xff]  ;;  %v3422_v12 = vld [vmem:[#allocation5 + $0x878] sm:$0xff] }
 0x78f   :  { %4091 = vmatprep.subr.mxu0 %v3270_v3  ;;  %4162 = vmatprep.subr.mxu1 %v3526_v11  ;;  %v3421_v19 = vld [vmem:[#allocation5 + $0x870] sm:$0xff]  ;;  %v3158_v3 = vld [vmem:[#allocation5 + $0x38] sm:$0xff] }
 0x790   :  { %4092 = vmatpush1.msra.mxu0 %v3269_v4  ;;  %4163 = vmatpush1.msra.mxu1 %v3525_v33  ;;  %v3414_v11 = vld [vmem:[#allocation5 + $0x838] sm:$0xff]  ;;  %v3157_v4 = vld [vmem:[#allocation5 + $0x30] sm:$0xff] }
 0x791   :  { %4093 = vmatprep.subr.mxu0 %v3262_v25  ;;  %4164 = vmatprep.subr.mxu1 %v3518_v9  ;;  %v3413_v33 = vld [vmem:[#allocation5 + $0x830] sm:$0xff]  ;;  %v3406_v25 = vld [vmem:[#allocation5 + $0x7f8] sm:$0xff] }
 0x792   :  { %4094 = vmatpush1.msra.mxu0 %v3261_v14  ;;  %4165 = vmatpush1.msra.mxu1 %v3517_v10  ;;  %v3662_v9 = vld [vmem:[#allocation5 + $0xff8] sm:$0xff]  ;;  %v3405_v14 = vld [vmem:[#allocation5 + $0x7f0] sm:$0xff] }
 0x793   :  { %4095 = vmatprep.subr.mxu0 %v3254_v8  ;;  %4166 = vmatprep.subr.mxu1 %v3510_v34  ;;  %v3661_v10 = vld [vmem:[#allocation5 + $0xff0] sm:$0xff]  ;;  %v3398_v8 = vld [vmem:[#allocation5 + $0x7b8] sm:$0xff] }
 0x794   :  { %4096 = vmatpush1.msra.mxu0 %v3253_v61  ;;  %4167 = vmatpush1.msra.mxu1 %v3509_v35  ;;  %v3654_v34 = vld [vmem:[#allocation5 + $0xfb8] sm:$0xff]  ;;  %v3397_v61 = vld [vmem:[#allocation5 + $0x7b0] sm:$0xff] }
 0x795   :  { %4097 = vmatprep.subr.mxu0 %v3246_v16  ;;  %4168 = vmatprep.subr.mxu1 %v3502_v7  ;;  %v3653_v35 = vld [vmem:[#allocation5 + $0xfb0] sm:$0xff]  ;;  %v3390_v16 = vld [vmem:[#allocation5 + $0x778] sm:$0xff] }
 0x796   :  { %4098 = vmatpush1.msra.mxu0 %v3245_v60  ;;  %4169 = vmatpush1.msra.mxu1 %v3501_v42  ;;  %v3646_v7 = vld [vmem:[#allocation5 + $0xf78] sm:$0xff]  ;;  %v3389_v60 = vld [vmem:[#allocation5 + $0x770] sm:$0xff] }
 0x797   :  { %4099 = vmatprep.subr.mxu0 %v3238_v39  ;;  %4170 = vmatprep.subr.mxu1 %v3494_v43  ;;  %v3645_v42 = vld [vmem:[#allocation5 + $0xf70] sm:$0xff]  ;;  %v3382_v39 = vld [vmem:[#allocation5 + $0x738] sm:$0xff] }
 0x798   :  { %4100 = vmatpush1.msra.mxu0 %v3237_v5  ;;  %4171 = vmatpush1.msra.mxu1 %v3493_v59  ;;  %v3638_v43 = vld [vmem:[#allocation5 + $0xf38] sm:$0xff]  ;;  %v3381_v5 = vld [vmem:[#allocation5 + $0x730] sm:$0xff] }
 0x799   :  { %4101 = vmatprep.subr.mxu0 %v3230_v56  ;;  %4172 = vmatprep.subr.mxu1 %v3486_v27  ;;  %v3637_v59 = vld [vmem:[#allocation5 + $0xf30] sm:$0xff]  ;;  %v3374_v56 = vld [vmem:[#allocation5 + $0x6f8] sm:$0xff] }
 0x79a   :  { %4102 = vmatpush1.msra.mxu0 %v3229_v36  ;;  %4173 = vmatpush1.msra.mxu1 %v3485_v0  ;;  %v3630_v27 = vld [vmem:[#allocation5 + $0xef8] sm:$0xff]  ;;  %v3373_v36 = vld [vmem:[#allocation5 + $0x6f0] sm:$0xff] }
 0x79b   :  { %4103 = vmatprep.subr.mxu0 %v3222_v28  ;;  %4174 = vmatprep.subr.mxu1 %v3478_v44  ;;  %v3629_v0 = vld [vmem:[#allocation5 + $0xef0] sm:$0xff]  ;;  %v3366_v28 = vld [vmem:[#allocation5 + $0x6b8] sm:$0xff] }
 0x79c   :  { %4104 = vmatpush1.msra.mxu0 %v3221_v1  ;;  %4175 = vmatpush1.msra.mxu1 %v3477_v29  ;;  %v3622_v44 = vld [vmem:[#allocation5 + $0xeb8] sm:$0xff]  ;;  %v3365_v1 = vld [vmem:[#allocation5 + $0x6b0] sm:$0xff] }
 0x79d   :  { %4105 = vmatprep.subr.mxu0 %v3214_v45  ;;  %4176 = vmatprep.subr.mxu1 %v3470_v47  ;;  %v3621_v29 = vld [vmem:[#allocation5 + $0xeb0] sm:$0xff]  ;;  %v3358_v45 = vld [vmem:[#allocation5 + $0x678] sm:$0xff] }
 0x79e   :  { %4106 = vmatpush1.msra.mxu0 %v3213_v63  ;;  %4177 = vmatpush1.msra.mxu1 %v3469_v50  ;;  %v3614_v47 = vld [vmem:[#allocation5 + $0xe78] sm:$0xff]  ;;  %v3357_v63 = vld [vmem:[#allocation5 + $0x670] sm:$0xff] }
 0x79f   :  { %4107 = vmatprep.subr.mxu0 %v3206_v53  ;;  %4178 = vmatprep.subr.mxu1 %v3462_v54  ;;  %v3613_v50 = vld [vmem:[#allocation5 + $0xe70] sm:$0xff]  ;;  %v3350_v53 = vld [vmem:[#allocation5 + $0x638] sm:$0xff] }
 0x7a0   :  { %4108 = vmatpush1.msra.mxu0 %v3205_v18  ;;  %4179 = vmatpush1.msra.mxu1 %v3461_v58  ;;  %v3606_v54 = vld [vmem:[#allocation5 + $0xe38] sm:$0xff]  ;;  %v3349_v18 = vld [vmem:[#allocation5 + $0x630] sm:$0xff] }
 0x7a1   :  { %4109 = vmatprep.subr.mxu0 %v3198_v13  ;;  %4180 = vmatprep.subr.mxu1 %v3454_v62  ;;  %v3605_v58 = vld [vmem:[#allocation5 + $0xe30] sm:$0xff]  ;;  %v3342_v13 = vld [vmem:[#allocation5 + $0x5f8] sm:$0xff] }
 0x7a2   :  { %4110 = vmatpush1.msra.mxu0 %v3197_v26  ;;  %4181 = vmatpush1.msra.mxu1 %v3453_v22  ;;  %v3598_v62 = vld [vmem:[#allocation5 + $0xdf8] sm:$0xff]  ;;  %v3341_v26 = vld [vmem:[#allocation5 + $0x5f0] sm:$0xff] }
 0x7a3   :  { %4111 = vmatprep.subr.mxu0 %v3190_v6  ;;  %4182 = vmatprep.subr.mxu1 %v3446_v23  ;;  %v3597_v22 = vld [vmem:[#allocation5 + $0xdf0] sm:$0xff]  ;;  %v3334_v6 = vld [vmem:[#allocation5 + $0x5b8] sm:$0xff] }
 0x7a4   :  { %4112 = vmatpush1.msra.mxu0 %v3189_v15  ;;  %4183 = vmatpush1.msra.mxu1 %v3445_v20  ;;  %v3590_v23 = vld [vmem:[#allocation5 + $0xdb8] sm:$0xff]  ;;  %v3333_v15 = vld [vmem:[#allocation5 + $0x5b0] sm:$0xff] }
 0x7a5   :  { %4113 = vmatprep.subr.mxu0 %v3182_v21  ;;  %4184 = vmatprep.subr.mxu1 %v3438_v24  ;;  %v3589_v20 = vld [vmem:[#allocation5 + $0xdb0] sm:$0xff]  ;;  %v3326_v21 = vld [vmem:[#allocation5 + $0x578] sm:$0xff] }
 0x7a6   :  { %4114 = vmatpush1.msra.mxu0 %v3181_v30  ;;  %4185 = vmatpush1.msra.mxu1 %v3437_v31  ;;  %v3582_v24 = vld [vmem:[#allocation5 + $0xd78] sm:$0xff]  ;;  %v3325_v30 = vld [vmem:[#allocation5 + $0x570] sm:$0xff] }
 0x7a7   :  { %4115 = vmatprep.subr.mxu0 %v3174_v32  ;;  %4186 = vmatprep.subr.mxu1 %v3430_v48  ;;  %v3581_v31 = vld [vmem:[#allocation5 + $0xd70] sm:$0xff]  ;;  %v3318_v32 = vld [vmem:[#allocation5 + $0x538] sm:$0xff] }
 0x7a8   :  { %4116 = vmatpush1.msra.mxu0 %v3173_v55  ;;  %4187 = vmatpush1.msra.mxu1 %v3429_v51  ;;  %v3574_v48 = vld [vmem:[#allocation5 + $0xd38] sm:$0xff]  ;;  %v3317_v55 = vld [vmem:[#allocation5 + $0x530] sm:$0xff] }
 0x7a9   :  { %4117 = vmatprep.subr.mxu0 %v3166_v17  ;;  %4188 = vmatprep.subr.mxu1 %v3422_v12  ;;  %v3573_v51 = vld [vmem:[#allocation5 + $0xd30] sm:$0xff]  ;;  %v3310_v17 = vld [vmem:[#allocation5 + $0x4f8] sm:$0xff] }
 0x7aa   :  { %4118 = vmatpush1.msra.mxu0 %v3165_v57  ;;  %4189 = vmatpush1.msra.mxu1 %v3421_v19  ;;  %v3566_v12 = vld [vmem:[#allocation5 + $0xcf8] sm:$0xff]  ;;  %v3309_v57 = vld [vmem:[#allocation5 + $0x4f0] sm:$0xff] }
 0x7ab   :  { %4119 = vmatprep.subr.mxu0 %v3158_v3  ;;  %4190 = vmatprep.subr.mxu1 %v3414_v11  ;;  %v3565_v19 = vld [vmem:[#allocation5 + $0xcf0] sm:$0xff]  ;;  %v3302_v3 = vld [vmem:[#allocation5 + $0x4b8] sm:$0xff] }
 0x7ac   :  { %4120 = vmatpush1.msra.mxu0 %v3157_v4  ;;  %4191 = vmatpush1.msra.mxu1 %v3413_v33  ;;  %v3558_v11 = vld [vmem:[#allocation5 + $0xcb8] sm:$0xff]  ;;  %v3301_v4 = vld [vmem:[#allocation5 + $0x4b0] sm:$0xff] }
 0x7ad   :  { %4121 = vmatprep.subr.mxu0 %v3406_v25  ;;  %4192 = vmatprep.subr.mxu1 %v3662_v9  ;;  %v3557_v33 = vld [vmem:[#allocation5 + $0xcb0] sm:$0xff]  ;;  %v3294_v25 = vld [vmem:[#allocation5 + $0x478] sm:$0xff] }
 0x7ae   :  { %4122 = vmatpush2.msra.mxu0 %v3405_v14  ;;  %4193 = vmatpush2.msra.mxu1 %v3661_v10  ;;  %v3550_v9 = vld [vmem:[#allocation5 + $0xc78] sm:$0xff]  ;;  %v3293_v14 = vld [vmem:[#allocation5 + $0x470] sm:$0xff] }
 0x7af   :  { %4123 = vmatprep.subr.mxu0 %v3398_v8  ;;  %4194 = vmatprep.subr.mxu1 %v3654_v34  ;;  %v3549_v10 = vld [vmem:[#allocation5 + $0xc70] sm:$0xff]  ;;  %v8998_v8 = vld [vmem:[#allocation29_spill] sm:$0xff] }
 0x7b0   :  { %4124 = vmatpush2.msra.mxu0 %v3397_v61  ;;  %4195 = vmatpush2.msra.mxu1 %v3653_v35  ;;  %v3138_v34 = vand.u32 15, %v8998_v8  ;;  %v3286_v61 = vld [vmem:[#allocation5 + $0x438] sm:$0xff] }
 0x7b1   :  { %4125 = vmatprep.subr.mxu0 %v3390_v16  ;;  %4196 = vmatprep.subr.mxu1 %v3646_v7  ;;  %v3542_v35 = vld [vmem:[#allocation5 + $0xc38] sm:$0xff]  ;;  %v3137_v16 = vand.u32 15, %v8992_v52  ;;  %v3285_v7 = vld [vmem:[#allocation5 + $0x430] sm:$0xff] }
 0x7b2   :  { %4126 = vmatpush2.msra.mxu0 %v3389_v60  ;;  %4197 = vmatpush2.msra.mxu1 %v3645_v42  ;;  %v3541_v60 = vld [vmem:[#allocation5 + $0xc30] sm:$0xff]  ;;  %v8999_v42 = vld [vmem:[#allocation77_spill] sm:$0xff]  ;;  %vm7878_vm12 = vcmp.eq.s32.totalorder %v3138_v34, %v8993_v2 }
 0x7b3   :  { %4127 = vmatprep.subr.mxu0 %v3382_v39  ;;  %4198 = vmatprep.subr.mxu1 %v3638_v43  ;;  %vm7866_vm9 = vcmp.eq.s32.totalorder %v3138_v34, %v8999_v42  ;;  %v9000_v39 = vmov 0  ;;  %vm7871_vm11 = vcmp.eq.s32.totalorder %v3137_v16, %v8999_v42  ;;  %v9003_v43 = vmov 0  ;;  %v9054_v8 = vld [vmem:[#allocation53_spill] sm:$0xff] }
 0x7b4   :  { %4128 = vmatpush2.msra.mxu0 %v3381_v5  ;;  %4199 = vmatpush2.msra.mxu1 %v3637_v59  ;;  %v9001_v39 = vsel %vm7866_vm9, 4294967295, %v9000_v39  ;;  %v9004_v43 = vsel %vm7871_vm11, 4294967295, %v9003_v43  ;;  %v9006_v5 = vmov 0  ;;  %vm7886_vm15 = vcmp.eq.s32.totalorder %v3137_v16, %v8993_v2 }
 0x7b5   :  { %4129 = vmatprep.subr.mxu0 %v3374_v56  ;;  %4200 = vmatprep.subr.mxu1 %v3630_v27  ;;  %9002 = vst [vmem:[#allocation61_spill] sm:$0xff] %v9001_v39  ;;  %9005 = vst [vmem:[#allocation62_spill] sm:$0xff] %v9004_v43  ;;  %v9007_v5 = vsel %vm7878_vm12, 4294967295, %v9006_v5  ;;  %v9009_v59 = vmov 0  ;;  %v9013_v27 = vld [vmem:[#allocation37_spill] sm:$0xff]  ;;  %v3032_v34 = vand.u32 15, %v9054_v8 }
 0x7b6   :  { %4130 = vmatpush2.msra.mxu0 %v3373_v36  ;;  %4201 = vmatpush2.msra.mxu1 %v3629_v0  ;;  %9008 = vst [vmem:[#allocation63_spill] sm:$0xff] %v9007_v5  ;;  %v9010_v59 = vsel %vm7886_vm15, 4294967295, %v9009_v59  ;;  %v3024_v36 = vand.u32 15, %v9013_v27  ;;  %v9014_v0 = vld [vmem:[#allocation38_spill] sm:$0xff]  ;;  %v9096_v39 = vld [vmem:[#allocation35_spill] sm:$0xff] }
 0x7b7   :  { %4131 = vmatprep.subr.mxu0 %v3366_v28  ;;  %4202 = vmatprep.subr.mxu1 %v3622_v44  ;;  %9011 = vst [vmem:[#allocation64_spill] sm:$0xff] %v9010_v59  ;;  %v3039_v28 = vand.u32 15, %v9014_v0  ;;  %v9015_v44 = vld [vmem:[#allocation39_spill] sm:$0xff]  ;;  %v9066_v0 = vld [vmem:[#allocation57_spill] sm:$0xff] }
 0x7b8   :  { %4132 = vmatpush2.msra.mxu0 %v3365_v1  ;;  %4203 = vmatpush2.msra.mxu1 %v3621_v29  ;;  %v3023_v1 = vand.u32 15, %v9015_v44  ;;  %v9016_v29 = vld [vmem:[#allocation40_spill] sm:$0xff]  ;;  %vm7914_vm4 = vcmp.eq.s32.totalorder %v3024_v36, %v8992_v52  ;;  %v9064_v36 = vmov 0  ;;  %v9067_v44 = vmov 0 }
 0x7b9   :  { %4133 = vmatprep.subr.mxu0 %v3358_v45  ;;  %4204 = vmatprep.subr.mxu1 %v3614_v47  ;;  %v3038_v45 = vand.u32 15, %v9016_v29  ;;  %v9017_v47 = vld [vmem:[#allocation41_spill] sm:$0xff]  ;;  %vm7919_vm6 = vcmp.eq.s32.totalorder %v3039_v28, %v8992_v52  ;;  %v3030_v28 = vand.u32 15, %v9066_v0 }
 0x7ba   :  { %4134 = vmatpush2.msra.mxu0 %v3357_v63  ;;  %4205 = vmatpush2.msra.mxu1 %v3613_v50  ;;  %v3022_v63 = vand.u32 15, %v9017_v47  ;;  %vm7928_vm0 = vcmp.eq.s32.totalorder %v3023_v1, %v8992_v52  ;;  %v9069_v1 = vld [vmem:[#allocation59_spill] sm:$0xff]  ;;  %v9072_v47 = vld [vmem:[#allocation60_spill] sm:$0xff] }
 0x7bb   :  { %4135 = vmatprep.subr.mxu0 %v3350_v53  ;;  %4206 = vmatprep.subr.mxu1 %v3606_v54  ;;  %vm7937_vm14 = vcmp.eq.s32.totalorder %v3038_v45, %v8992_v52  ;;  %v3014_v29 = vand.u32 15, %v9069_v1  ;;  %v9070_v45 = vmov 0  ;;  %v3010_v53 = vand.u32 15, %v8999_v42  ;;  %v9122_v54 = vld [vmem:[#allocation28_spill] sm:$0xff] }
 0x7bc   :  { %4136 = vmatpush2.msra.mxu0 %v3349_v18  ;;  %4207 = vmatpush2.msra.mxu1 %v3605_v58  ;;  %v9024_v18 = vld [vmem:[#allocation42_spill] sm:$0xff]  ;;  %vm7946_vm8 = vcmp.eq.s32.totalorder %v3022_v63, %v8992_v52  ;;  %v3029_v63 = vand.u32 15, %v9072_v47  ;;  %v9125_v42 = vld [vmem:[#allocation61_spill] sm:$0xff] }
 0x7bd   :  { %4137 = vmatprep.subr.mxu0 %v3342_v13  ;;  %4208 = vmatprep.subr.mxu1 %v3598_v62  ;;  %v3037_v58 = vand.u32 15, %v9024_v18  ;;  %v9027_v62 = vld [vmem:[#allocation43_spill] sm:$0xff]  ;;  %v9073_v18 = vmov 0  ;;  %v9123_v13 = vld [vmem:[#allocation78_spill] sm:$0xff] }
 0x7be   :  { %4138 = vmatpush2.msra.mxu0 %v3341_v26  ;;  %4209 = vmatpush2.msra.mxu1 %v3597_v22  ;;  %v3021_v26 = vand.u32 15, %v9027_v62  ;;  %v3025_v22 = vand.u32 15, %v9123_v13  ;;  %v4982_v13 = vld [vmem:[%s8514_s3 + $0x90] sm:$0xff] }
 0x7bf   :  { %4139 = vmatprep.subr.mxu0 %v3334_v6  ;;  %4210 = vmatprep.subr.mxu1 %v3590_v23  ;;  %v9030_v6 = vld [vmem:[#allocation44_spill] sm:$0xff]  ;;  %vm7955_vm10 = vcmp.eq.s32.totalorder %v3037_v58, %v8992_v52  ;;  %v9075_v58 = vld [vmem:[#allocation65_spill] sm:$0xff] }
 0x7c0   :  { %4140 = vmatpush2.msra.mxu0 %v3333_v15  ;;  %4211 = vmatpush2.msra.mxu1 %v3589_v20  ;;  %v3036_v23 = vand.u32 15, %v9030_v6  ;;  %v9033_v20 = vld [vmem:[#allocation45_spill] sm:$0xff]  ;;  %vm7964_vm2 = vcmp.eq.s32.totalorder %v3021_v26, %v8992_v52  ;;  %v3013_v62 = vand.u32 15, %v9075_v58  ;;  %v9076_v26 = vmov 0  ;;  %v9078_v6 = vld [vmem:[#allocation71_spill] sm:$0xff]  ;;  %v9124_v15 = vld [vmem:[#allocation30_spill] sm:$0xff] }
 0x7c1   :  { %4141 = vmatprep.subr.mxu0 %v3326_v21  ;;  %4212 = vmatprep.subr.mxu1 %v3582_v24  ;;  %v3020_v21 = vand.u32 15, %v9033_v20  ;;  %v9079_v20 = vmov 0  ;;  %v3009_v24 = vand.u32 15, %v9124_v15 }
 0x7c2   :  { %4142 = vmatpush2.msra.mxu0 %v3325_v30  ;;  %4213 = vmatpush2.msra.mxu1 %v3581_v31  ;;  %v9036_v30 = vld [vmem:[#allocation46_spill] sm:$0xff]  ;;  %vm7973_vm3 = vcmp.eq.s32.totalorder %v3036_v23, %v8992_v52  ;;  %v3028_v23 = vand.u32 15, %v9078_v6 }
 0x7c3   :  { %4143 = vmatprep.subr.mxu0 %v3318_v32  ;;  %4214 = vmatprep.subr.mxu1 %v3574_v48  ;;  %v3035_v31 = vand.u32 15, %v9036_v30  ;;  %v9039_v48 = vld [vmem:[#allocation47_spill] sm:$0xff]  ;;  %vm7982_vm1 = vcmp.eq.s32.totalorder %v3020_v21, %v8992_v52  ;;  %v9081_v21 = vld [vmem:[#allocation73_spill] sm:$0xff] }
 0x7c4   :  { %4144 = vmatpush2.msra.mxu0 %v3317_v55  ;;  %4215 = vmatpush2.msra.mxu1 %v3573_v51  ;;  %v3019_v55 = vand.u32 15, %v9039_v48  ;;  %v3012_v30 = vand.u32 15, %v9081_v21  ;;  %v9084_v48 = vld [vmem:[#allocation74_spill] sm:$0xff] }
 0x7c5   :  { %4145 = vmatprep.subr.mxu0 %v3310_v17  ;;  %4216 = vmatprep.subr.mxu1 %v3566_v12  ;;  %v9042_v17 = vld [vmem:[#allocation48_spill] sm:$0xff]  ;;  %vm7991_vm7 = vcmp.eq.s32.totalorder %v3035_v31, %v8992_v52  ;;  %v9082_v31 = vmov 0 }
 0x7c6   :  { %4146 = vmatpush2.msra.mxu0 %v3309_v57  ;;  %4217 = vmatpush2.msra.mxu1 %v3565_v19  ;;  %v3034_v12 = vand.u32 15, %v9042_v17  ;;  %v9045_v19 = vld [vmem:[#allocation49_spill] sm:$0xff]  ;;  %v9085_v17 = vmov 0 }
 0x7c7   :  { %4147 = vmatprep.subr.mxu0 %v3302_v3  ;;  %4218 = vmatprep.subr.mxu1 %v3558_v11  ;;  %v3018_v3 = vand.u32 15, %v9045_v19  ;;  %v9127_v11 = vld [vmem:[#allocation62_spill] sm:$0xff] }
 0x7c8   :  { %4148 = vmatpush2.msra.mxu0 %v3301_v4  ;;  %4219 = vmatpush2.msra.mxu1 %v3557_v33  ;;  %v9048_v4 = vld [vmem:[#allocation51_spill] sm:$0xff]  ;;  %v3800_v8 = vpop.f32.mrf.mxu1 }
 0x7c9   :  { %4149 = vmatprep.subr.mxu0 %v3294_v25  ;;  %4220 = vmatprep.subr.mxu1 %v3550_v9  ;;  %v3033_v33 = vand.u32 15, %v9048_v4  ;;  %v9049_v25 = vmov 0  ;;  %v9051_v9 = vld [vmem:[#allocation52_spill] sm:$0xff]  ;;  %v9090_v4 = vmov 0 }
 0x7ca   :  { %4150 = vmatpush2.msra.mxu0 %v3293_v14  ;;  %4221 = vmatpush2.msra.mxu1 %v3549_v10  ;;  %v3017_v14 = vand.u32 15, %v9051_v9  ;;  %v9052_v10 = vmov 0  ;;  %v9094_v9 = vmov 0 }
 0x7cb   :  { %4151 = vmatprep.subr.mxu0 %v3286_v61  ;;  %4222 = vmatprep.subr.mxu1 %v3542_v35  ;;  %v9055_v61 = vmov 0  ;;  %v9057_v35 = vld [vmem:[#allocation54_spill] sm:$0xff] }
 0x7cc   :  { %4152 = vmatpush2.msra.mxu0 %v3285_v7  ;;  %4223 = vmatpush2.msra.mxu1 %v3541_v60  ;;  %v3016_v16 = vand.u32 15, %v9057_v35  ;;  %v9058_v7 = vmov 0  ;;  %v9060_v60 = vld [vmem:[#allocation55_spill] sm:$0xff]  ;;  %v3802_v35 = vpop.f32.mrf.mxu1 }
 0x7cd   :  { %4154 = vmatmul.mubr.f32.vlgmr.msra.gmra.mxu0 %v7845_v40  ;;  %4225 = vmatmul.mubr.f32.vlgmr.msra.gmra.mxu1 %v7847_v37  ;;  %v4237_v40 = vld [vmem:[#allocation11] sm:$0x1]  ;;  %v9012_v37 = vld [vmem:[#allocation36_spill] sm:$0xff] }
 0x7ce   :  { %5845 = vmatprep.subr.msk.mxu0 %vm7866_vm9, %v8682_v41  ;;  %4306 = vmatprep.mubr.f32.mxu0 %v8912_v38  ;;  %v3040_v56 = vand.u32 15, %v9012_v37  ;;  %vm8036_vm9 = vcmp.eq.s32.totalorder %v3017_v14, %v8992_v52  ;;  %v9061_v37 = vmov 0  ;;  %v3729_v14 = vpop.f32.mrf.mxu0 }
 0x7cf   :  { %5846 = vmatpush1.msk.msra.mxu0 %vm7871_vm11, %v8682_v41  ;;  %4411 = vmatprep.mubr.f32.mxu1 %v8912_v38  ;;  %vm8027_vm11 = vcmp.eq.s32.totalorder %v3033_v33, %v8992_v52  ;;  %v9062_v37 = vsel %vm8036_vm9, 4294967295, %v9061_v37  ;;  %v9092_v33 = vmov 0  ;;  %v3801_v58 = vadd.f32 %v3800_v8, %v3729_v14 }
 0x7d0   :  { %5847 = vmatprep.subr.msk.mxu0 %vm7878_vm12, %v8682_v41  ;;  %vm7909_vm13 = vcmp.eq.s32.totalorder %v3040_v56, %v8992_v52  ;;  %vm8018_vm12 = vcmp.eq.s32.totalorder %v3018_v3, %v8992_v52  ;;  %v9059_v7 = vsel %vm8027_vm11, 4294967295, %v9058_v7  ;;  %v9063_v56 = vld [vmem:[#allocation56_spill] sm:$0xff]  ;;  %v9088_v3 = vmov 0 }
 0x7d1   :  { %5848 = vmatpush1.msk.msra.mxu0 %vm7886_vm15, %v8682_v41  ;;  %vm8009_vm15 = vcmp.eq.s32.totalorder %v3034_v12, %v8992_v52  ;;  %v9056_v61 = vsel %vm8018_vm12, 4294967295, %v9055_v61  ;;  %v3015_v27 = vand.u32 15, %v9063_v56  ;;  %v9087_v12 = vld [vmem:[#allocation75_spill] sm:$0xff] }
 0x7d2   :  { %5849 = vmatmul.mubr.msk.f32.vlgmr.msra.gmra.mxu0 %vm8661_vm5, %v4237_v40  ;;  %6095 = vmatprep.subr.msk.mxu0 %vm7909_vm13, %v8682_v41  ;;  %vm8000_vm5 = vcmp.eq.s32.totalorder %v3019_v55, %v8992_v52  ;;  %v9053_v10 = vsel %vm8009_vm15, 4294967295, %v9052_v10  ;;  %v3031_v40 = vand.u32 15, %v9060_v60  ;;  %v3027_v55 = vand.u32 15, %v9084_v48 }
 0x7d3   :  { %6096 = vmatpush3.msk.msra.mxu0 %vm7914_vm4, %v8682_v41  ;;  %v9050_v25 = vsel %vm8000_vm5, 4294967295, %v9049_v25  ;;  %v3011_v19 = vand.u32 15, %v9087_v12 }
 0x7d4   :  { %6097 = vmatprep.subr.msk.mxu0 %vm7919_vm6, %v8682_v41 }
 0x7d5   :  { %6098 = vmatpush3.msk.msra.mxu0 %vm7928_vm0, %v8682_v41 }
 0x7d6   :  { %6099 = vmatprep.subr.msk.mxu0 %vm7937_vm14, %v8682_v41 }
 0x7d7   :  { %6100 = vmatpush3.msk.msra.mxu0 %vm7946_vm8, %v8682_v41 }
 0x7d8   :  { %6101 = vmatprep.subr.msk.mxu0 %vm7955_vm10, %v8682_v41 }
 0x7d9   :  { %6102 = vmatpush3.msk.msra.mxu0 %vm7964_vm2, %v8682_v41 }
 0x7da   :  { %6103 = vmatprep.subr.msk.mxu0 %vm7973_vm3, %v8682_v41 }
 0x7db   :  { %6104 = vmatpush3.msk.msra.mxu0 %vm7982_vm1, %v8682_v41 }
 0x7dc   :  { %6105 = vmatprep.subr.msk.mxu0 %vm7991_vm7, %v8682_v41 }
 0x7dd   :  { %6106 = vmatpush3.msk.msra.mxu0 %vm8000_vm5, %v8682_v41  ;;  %vm8045_vm5 = vcmp.eq.s32.totalorder %v3032_v34, %v8992_v52  ;;  %v3731_v34 = vpop.f32.mrf.mxu0 }
 0x7de   :  { %6107 = vmatprep.subr.msk.mxu0 %vm8009_vm15, %v8682_v41  ;;  %v9065_v36 = vsel %vm8045_vm5, 4294967295, %v9064_v36  ;;  %vm8054_vm15 = vcmp.eq.s32.totalorder %v3016_v16, %v8992_v52  ;;  %v3803_v21 = vadd.f32 %v3802_v35, %v3731_v34 }
 0x7df   :  { %6108 = vmatpush3.msk.msra.mxu0 %vm8018_vm12, %v8682_v41  ;;  %v9068_v44 = vsel %vm8054_vm15, 4294967295, %v9067_v44  ;;  %vm8063_vm12 = vcmp.eq.s32.totalorder %v3031_v40, %v8992_v52 }
 0x7e0   :  { %6109 = vmatprep.subr.msk.mxu0 %vm8027_vm11, %v8682_v41  ;;  %v9071_v45 = vsel %vm8063_vm12, 4294967295, %v9070_v45  ;;  %vm8072_vm11 = vcmp.eq.s32.totalorder %v3015_v27, %v8992_v52 }
 0x7e1   :  { %6110 = vmatpush3.msk.msra.mxu0 %vm8036_vm9, %v8682_v41  ;;  %v9074_v18 = vsel %vm8072_vm11, 4294967295, %v9073_v18  ;;  %vm8081_vm9 = vcmp.eq.s32.totalorder %v3030_v28, %v8992_v52 }
 0x7e2   :  { %6111 = vmatprep.subr.msk.mxu0 %vm8045_vm5, %v8682_v41  ;;  %v9077_v26 = vsel %vm8081_vm9, 4294967295, %v9076_v26  ;;  %vm8090_vm5 = vcmp.eq.s32.totalorder %v3014_v29, %v8992_v52 }
 0x7e3   :  { %6112 = vmatpush3.msk.msra.mxu0 %vm8054_vm15, %v8682_v41  ;;  %v9080_v20 = vsel %vm8090_vm5, 4294967295, %v9079_v20  ;;  %vm8099_vm15 = vcmp.eq.s32.totalorder %v3029_v63, %v8992_v52 }
 0x7e4   :  { %6113 = vmatprep.subr.msk.mxu0 %vm8063_vm12, %v8682_v41  ;;  %v9083_v31 = vsel %vm8099_vm15, 4294967295, %v9082_v31  ;;  %vm8108_vm12 = vcmp.eq.s32.totalorder %v3013_v62, %v8992_v52 }
 0x7e5   :  { %6114 = vmatpush3.msk.msra.mxu0 %vm8072_vm11, %v8682_v41  ;;  %v9086_v17 = vsel %vm8108_vm12, 4294967295, %v9085_v17  ;;  %vm8117_vm11 = vcmp.eq.s32.totalorder %v3028_v23, %v8992_v52 }
 0x7e6   :  { %6115 = vmatprep.subr.msk.mxu0 %vm8081_vm9, %v8682_v41  ;;  %v9089_v3 = vsel %vm8117_vm11, 4294967295, %v9088_v3  ;;  %vm8125_vm9 = vcmp.eq.s32.totalorder %v3012_v30, %v8992_v52 }
 0x7e7   :  { %6116 = vmatpush3.msk.msra.mxu0 %vm8090_vm5, %v8682_v41  ;;  %v9091_v4 = vsel %vm8125_vm9, 4294967295, %v9090_v4  ;;  %vm8133_vm5 = vcmp.eq.s32.totalorder %v3027_v55, %v8992_v52 }
 0x7e8   :  { %6117 = vmatprep.subr.msk.mxu0 %vm8099_vm15, %v8682_v41  ;;  %v9093_v33 = vsel %vm8133_vm5, 4294967295, %v9092_v33  ;;  %vm8141_vm15 = vcmp.eq.s32.totalorder %v3011_v19, %v8992_v52 }
 0x7e9   :  { %6118 = vmatpush3.msk.msra.mxu0 %vm8108_vm12, %v8682_v41  ;;  %v9095_v9 = vsel %vm8141_vm15, 4294967295, %v9094_v9 }
 0x7ea   :  { %6119 = vmatprep.subr.msk.mxu0 %vm8117_vm11, %v8682_v41 }
 0x7eb   :  { %6120 = vmatpush3.msk.msra.mxu0 %vm8125_vm9, %v8682_v41  ;;  %vm9097_vm9 = vcmask 1043456  }
 0x7ec   :  { %6121 = vmatprep.subr.msk.mxu0 %vm8133_vm5, %v8682_v41  ;;  %vm9098_vm11 = vmmov %vm9097_vm9 }
 0x7ed   :  { %6122 = vmatpush3.msk.msra.mxu0 %vm8141_vm15, %v8682_v41  ;;  %vm9100_vm12 = vmmov %vm9097_vm9 }
 0x809   :  { %v3871_v16 = vpop.f32.mrf.mxu0  ;;  %v3942_v60 = vpop.f32.mrf.mxu1 }
 0x80a   :  { %v3943_v29 = vadd.f32 %v3942_v60, %v3871_v16 }
 0x80b   :  { %v3873_v40 = vpop.f32.mrf.mxu0  ;;  %v3944_v56 = vpop.f32.mrf.mxu1 }
 0x80c   :  { %v3945_v62 = vadd.f32 %v3944_v56, %v3873_v40  ;;  %v4231_v55 = vmax.f32 %v3801_v58, %v3943_v29 }
 0x80e   :  { %v4232_v46 = vmax.f32 %v3803_v21, %v3945_v62  ;;  %v4995_v62 = vld [vmem:[%s8514_s3 + $0xf8] sm:$0xff]  ;;  %v4978_v21 = vld [vmem:[%s8514_s3 + $0x70] sm:$0xff] }
 0x84b   :  { %v4013_v27 = vpop.f32.mrf.mxu0  ;;  %v4084_v0 = vpop.f32.mrf.mxu1 }
 0x84c   :  { %v4085_v6 = vadd.f32 %v4084_v0, %v4013_v27 }
 0x84d   :  { %v4015_v28 = vpop.f32.mrf.mxu0  ;;  %v4086_v1 = vpop.f32.mrf.mxu1 }
 0x84e   :  { %v4087_v12 = vadd.f32 %v4086_v1, %v4015_v28 }
 0x88d   :  { %v4155_v47 = vpop.f32.mrf.mxu0  ;;  %v4226_v63 = vpop.f32.mrf.mxu1 }
 0x88e   :  { %v4227_v23 = vadd.f32 %v4226_v63, %v4155_v47  ;;  %v5923_v47 = vld [vmem:[#allocation14] ss:$0 sm:$0xff] }
 0x88f   :  { %v4157_v30 = vpop.f32.mrf.mxu0  ;;  %v4228_v48 = vpop.f32.mrf.mxu1 }
 0x890   :  { %v4233_v19 = vmax.f32 %v4085_v6, %v4227_v23  ;;  %v4229_v41 = vadd.f32 %v4228_v48, %v4157_v30  ;;  %v4979_v6 = vld [vmem:[%s8514_s3 + $0x78] sm:$0xff]  ;;  %v4994_v23 = vld [vmem:[%s8514_s3 + $0xf0] sm:$0xff]  ;;  %v4993_v30 = vld [vmem:[%s8514_s3 + $0xe8] sm:$0xff] }
 0x891   :  { %v4977_v48 = vld [vmem:[%s8514_s3 + $0x68] sm:$0xff] }
 0x892   :  { %v4234_v59 = vmax.f32 %v4087_v12, %v4229_v41  ;;  %v4235_v5 = vmax.f32 %v4231_v55, %v4233_v19  ;;  %v4308_v43 = vpop.f32.mrf.mxu0  ;;  %v4992_v55 = vld [vmem:[%s8514_s3 + $0xe0] sm:$0xff]  ;;  %v4991_v19 = vld [vmem:[%s8514_s3 + $0xd8] sm:$0xff] }
 0x893   :  { %v4316_v2 = vrot.slane %v4308_v43, %v9096_v39  ;;  %v4976_v12 = vld [vmem:[%s8514_s3 + $0x60] sm:$0xff] }
 0x894   :  { %v4236_v16 = vmax.f32 %v4232_v46, %v4234_v59  ;;  %v4310_v60 = vpop.f32.mrf.mxu0 }
 0x895   :  { %v4321_v52 = vadd.f32 %v4316_v2, %v4235_v5  ;;  %v4320_v14 = vrot.slane %v4310_v60, %v9096_v39  ;;  %v4990_v60 = vld [vmem:[%s8514_s3 + $0xd0] sm:$0xff] }
 0x897   :  { %v4325_v8 = vmin.f32 %v4321_v52, 0.0  ;;  %v4322_v40 = vadd.f32 %v4320_v14, %v4236_v16  ;;  %vm4323_vm15 = vcmp.gt.f32.partialorder %v4321_v52, 0.0  ;;  %v4975_v16 = vld [vmem:[%s8514_s3 + $0x58] sm:$0xff]  ;;  %v4974_v14 = vld [vmem:[%s8514_s3 + $0x50] sm:$0xff] }
 0x899   :  { %v4327_v34 = vmul.f32 1.442695, %v4325_v8  ;;  %v4326_v35 = vmin.f32 %v4322_v40, 0.0  ;;  %vm4324_vm5 = vcmp.gt.f32.partialorder %v4322_v40, 0.0  ;;  %v4989_v8 = vld [vmem:[%s8514_s3 + $0xc8] sm:$0xff] }
 0x89b   :  { %6307 = vpow2.f32 %v4327_v34  ;;  %v4329_v56 = vmul.f32 1.442695, %v4326_v35  ;;  %v4988_v34 = vld [vmem:[%s8514_s3 + $0xc0] sm:$0xff] }
 0x89c   :  { %v4972_v35 = vld [vmem:[%s8514_s3 + $0x40] sm:$0xff] }
 0x89d   :  { %6309 = vpow2.f32 %v4329_v56  ;;  %v4987_v56 = vld [vmem:[%s8514_s3 + $0xb8] sm:$0xff] }
 0x8a8   :  { %v6308_v27 = vpop.eup %6307 }
 0x8a9   :  { %v5850_v0 = vadd.f32 -1.0, %v6308_v27  ;;  %v4971_v27 = vld [vmem:[%s8514_s3 + $0x38] sm:$0xff] }
 0x8aa   :  { %v6310_v28 = vpop.eup %6309 }
 0x8ab   :  { %v4333_v41 = vmul.f32 1.6732632, %v5850_v0  ;;  %v5851_v1 = vadd.f32 -1.0, %v6310_v28  ;;  %v4986_v0 = vld [vmem:[%s8514_s3 + $0xb0] sm:$0xff] }
 0x8ac   :  { %v4970_v28 = vld [vmem:[%s8514_s3 + $0x30] sm:$0xff] }
 0x8ad   :  { %v4335_v29 = vsel %vm4323_vm15, %v4321_v52, %v4333_v41  ;;  %v4334_v43 = vmul.f32 1.6732632, %v5851_v1  ;;  %vm9099_vm15 = vcmask 31744   ;;  %v9102_v52 = vmov 1.0   ;;  %v4985_v41 = vld [vmem:[%s8514_s3 + $0xa8] sm:$0xff] }
 0x8ae   :  { %v8156_v46 = vmul.f32 1.050701, %v4335_v29  ;;  %v4969_v1 = vld [vmem:[%s8514_s3 + $0x28] sm:$0xff] }
 0x8af   :  { %v4336_v2 = vsel %vm4324_vm5, %v4322_v40, %v4334_v43  ;;  %vm9101_vm5 = vmmov %vm9097_vm9  ;;  %v4973_v40 = vld [vmem:[%s8514_s3 + $0x48] sm:$0xff] }
 0x8b0   :  { %v8158_v39 = vmul.f32 1.050701, %v4336_v2  ;;  %v4489_v59 = vmul.f32 %v8156_v46, %v8156_v46 }
 0x8b2   :  { %5852 = vmatprep.subr.msk.mxu1 %vm9097_vm9, %v8158_v39  ;;  %v4490_v5 = vmul.f32 %v8158_v39, %v8158_v39  ;;  %vm9103_vm9 = vmmov %vm9099_vm15 }
 0x8b3   :  { %5853 = vmatpush1.msk.msra.mxu1 %vm9098_vm11, %v8156_v46  ;;  %vm9104_vm11 = vnez %v9050_v25 }
 0x8b4   :  { %5854 = vmatmul.mubr.msk.f32.vlgmr.msra.gmra.mxu1 %vm9099_vm15, %v6852_v49  ;;  %5887 = vmatprep.subr.msk.mxu1 %vm9100_vm12, %v4490_v5  ;;  %vm9105_vm12 = vnez %v9053_v10  ;;  %vm9117_vm15 = vnez %v9089_v3  ;;  %v9129_v10 = vld [vmem:[#allocation63_spill] sm:$0xff]  ;;  %v9137_v5 = vld [vmem:[#allocation58_spill] sm:$0xff] }
 0x8b5   :  { %5888 = vmatpush1.msk.msra.mxu1 %vm9101_vm5, %v4489_v59  ;;  %4561 = vmatprep.mubr.f32.mxu1 %v8912_v38  ;;  %vm9118_vm5 = vnez %v9091_v4  ;;  %v5922_v4 = vld [vmem:[#allocation13] ss:$0 sm:$0xff] }
 0x8b6   :  { %6130 = vmatprep.subr.msk.mxu1 %vm7909_vm13, %v9102_v52  ;;  %vm9106_vm13 = vnez %v9056_v61  ;;  %v9131_v61 = vld [vmem:[#allocation64_spill] sm:$0xff] }
 0x8b8   :  { %5889 = vmatmul.mubr.msk.f32.vlgmr.msra.gmra.mxu1 %vm9103_vm9, %v6852_v49  ;;  %vm9119_vm9 = vnez %v9093_v33  ;;  %v9121_v49 = vld [vmem:[#allocation76_spill] sm:$0xff] }
 0x8b9   :  { %6131 = vmatpush3.msk.msra.mxu1 %vm7914_vm4, %v9102_v52  ;;  %vm9107_vm4 = vnez %v9059_v7  ;;  %v3026_v50 = vand.u32 15, %v9121_v49  ;;  %v4968_v49 = vld [vmem:[%s8514_s3 + $0x20] sm:$0xff] }
 0x8ba   :  { %6132 = vmatprep.subr.msk.mxu1 %vm7919_vm6, %v9102_v52  ;;  %vm9110_vm6 = vnez %v9068_v44 }
 0x8bb   :  { %6133 = vmatpush3.msk.msra.mxu1 %vm7928_vm0, %v9102_v52  ;;  %vm9111_vm0 = vnez %v9071_v45 }
 0x8bc   :  { %6134 = vmatprep.subr.msk.mxu1 %vm7937_vm14, %v9102_v52  ;;  %vm9112_vm14 = vnez %v9074_v18 }
 0x8bd   :  { %6135 = vmatpush3.msk.msra.mxu1 %vm7946_vm8, %v9102_v52  ;;  %vm9113_vm8 = vnez %v9077_v26 }
 0x8be   :  { %6136 = vmatprep.subr.msk.mxu1 %vm7955_vm10, %v9102_v52  ;;  %vm9114_vm10 = vnez %v9080_v20 }
 0x8bf   :  { %6137 = vmatpush3.msk.msra.mxu1 %vm7964_vm2, %v9102_v52  ;;  %vm9115_vm2 = vnez %v9083_v31 }
 0x8c0   :  { %6138 = vmatprep.subr.msk.mxu1 %vm7973_vm3, %v9102_v52  ;;  %vm9116_vm3 = vnez %v9086_v17 }
 0x8c1   :  { %6139 = vmatpush3.msk.msra.mxu1 %vm7982_vm1, %v9102_v52  ;;  %vm9108_vm1 = vnez %v9062_v37 }
 0x8c2   :  { %6140 = vmatprep.subr.msk.mxu1 %vm7991_vm7, %v9102_v52  ;;  %vm9109_vm7 = vnez %v9065_v36 }
 0x8c3   :  { %6141 = vmatpush3.msk.msra.mxu1 %vm9104_vm11, %v9102_v52  ;;  %vm9120_vm11 = vnez %v9095_v9 }
 0x8c4   :  { %6142 = vmatprep.subr.msk.mxu1 %vm9105_vm12, %v9102_v52  ;;  %vm3058_vm12 = vcmp.eq.s32.totalorder %v3026_v50, %v9122_v54  ;;  %v4983_v50 = vld [vmem:[%s8514_s3 + $0x98] sm:$0xff] }
 0x8c5   :  { %6143 = vmatpush3.msk.msra.mxu1 %vm9106_vm13, %v9102_v52  ;;  %6123 = vmatprep.subr.msk.mxu0 %vm3058_vm12, %v9102_v52  ;;  %vm3042_vm13 = vcmp.eq.s32.totalorder %v3010_v53, %v9122_v54  ;;  %v4967_v53 = vld [vmem:[%s8514_s3 + $0x18] sm:$0xff] }
 0x8c6   :  { %6144 = vmatprep.subr.msk.mxu1 %vm9107_vm4, %v9102_v52  ;;  %6124 = vmatpush3.msk.msra.mxu0 %vm3042_vm13, %v9102_v52  ;;  %vm3057_vm4 = vcmp.eq.s32.totalorder %v3025_v22, %v9122_v54  ;;  %v4966_v22 = vld [vmem:[%s8514_s3 + $0x10] sm:$0xff] }
 0x8c7   :  { %6145 = vmatpush3.msk.msra.mxu1 %vm9108_vm1, %v9102_v52  ;;  %6125 = vmatprep.subr.msk.mxu0 %vm3057_vm4, %v9102_v52  ;;  %vm3041_vm1 = vcmp.eq.s32.totalorder %v3009_v24, %v9122_v54  ;;  %v4981_v24 = vld [vmem:[%s8514_s3 + $0x88] sm:$0xff] }
 0x8c8   :  { %6146 = vmatprep.subr.msk.mxu1 %vm9109_vm7, %v9102_v52  ;;  %6126 = vmatpush3.msk.msra.mxu0 %vm3041_vm1, %v9102_v52  ;;  %vm9126_vm7 = vnez %v9125_v42  ;;  %v4965_v42 = vld [vmem:[%s8514_s3 + $0x8] sm:$0xff] }
 0x8c9   :  { %6147 = vmatpush3.msk.msra.mxu1 %vm9110_vm6, %v9102_v52  ;;  %5924 = vmatprep.subr.msk.mxu0 %vm9126_vm7, %v9102_v52  ;;  %vm9128_vm6 = vnez %v9127_v11  ;;  %v5084_v11 = vld [vmem:[%s8515_s4 + $0x58] sm:$0xff] }
 0x8ca   :  { %6148 = vmatprep.subr.msk.mxu1 %vm9111_vm0, %v9102_v52  ;;  %vm9130_vm0 = vnez %v9129_v10  ;;  %v5082_v10 = vld [vmem:[%s8515_s4 + $0x48] sm:$0xff] }
 0x8cb   :  { %6149 = vmatpush3.msk.msra.mxu1 %vm9112_vm14, %v9102_v52  ;;  %vm9132_vm14 = vnez %v9131_v61  ;;  %v5081_v61 = vld [vmem:[%s8515_s4 + $0x40] sm:$0xff] }
 0x8cc   :  { %6150 = vmatprep.subr.msk.mxu1 %vm9113_vm8, %v9102_v52  ;;  %vm9133_vm8 = vcmask 130048  }
 0x8cd   :  { %6151 = vmatpush3.msk.msra.mxu1 %vm9114_vm10, %v9102_v52  ;;  %vm9134_vm10 = vmmov %vm9133_vm8 }
 0x8ce   :  { %6152 = vmatprep.subr.msk.mxu1 %vm9115_vm2, %v9102_v52  ;;  %vm9135_vm2 = vcmask 1041408  }
 0x8cf   :  { %6153 = vmatpush3.msk.msra.mxu1 %vm9116_vm3, %v9102_v52  ;;  %vm9136_vm3 = vmmov %vm9135_vm2 }
 0x8d0   :  { %6154 = vmatprep.subr.msk.mxu1 %vm9117_vm15, %v9102_v52  ;;  %vm9138_vm15 = vcmask 15360  }
 0x8d1   :  { %6155 = vmatpush3.msk.msra.mxu1 %vm9118_vm5, %v9102_v52  ;;  %vm9139_vm5 = vmmov %vm9135_vm2 }
 0x8d2   :  { %6156 = vmatprep.subr.msk.mxu1 %vm9119_vm9, %v9102_v52  ;;  %vm9140_vm9 = vmmov %vm9135_vm2 }
 0x8d3   :  { %6157 = vmatpush3.msk.msra.mxu1 %vm9120_vm11, %v9102_v52  ;;  %vm9141_vm11 = vmmov %vm9138_vm15 }
 0x8d4   :  { %6158 = vmatprep.subr.msk.mxu1 %vm3058_vm12, %v9102_v52  ;;  %vm9142_vm12 = vcmask 1043456  }
 0x8d5   :  { %6159 = vmatpush3.msk.msra.mxu1 %vm3042_vm13, %v9102_v52  ;;  %vm6585_vm13 = vmmov 0  }
 0x8d6   :  { %6160 = vmatprep.subr.msk.mxu1 %vm3057_vm4, %v9102_v52  ;;  %vm5093_vm4 = vcmask 818176  }
 0x8d7   :  { %6161 = vmatpush3.msk.msra.mxu1 %vm3041_vm1, %v9102_v52  ;;  %vm5170_vm1 = vcmp.eq.s32.totalorder %v9122_v54, %v9124_v15 }
 0x8d8   :  { %5932 = vmatprep.subr.msk.mxu1 %vm9126_vm7, %v9102_v52 }
 0x974   :  { %v4413_v32 = vpop.f32.mrf.mxu1 }
 0x976   :  { %v4415_v51 = vpop.f32.mrf.mxu1 }
 0x977   :  { %4482 = vmatprep.mubr.f32.mxu0 %v4415_v51  ;;  %v4964_v51 = vld [vmem:[%s8514_s3] sm:$0xff] }
 0x978   :  { %4483 = vmatmul.mubr.f32.vlgmr.msra.gmra.mxu0 %v4413_v32  ;;  %v4563_v57 = vpop.f32.mrf.mxu1  ;;  %v4980_v32 = vld [vmem:[%s8514_s3 + $0x80] sm:$0xff] }
 0x979   :  { %5925 = vmatpush1.msk.msra.mxu0 %vm9128_vm6, %v9102_v52  ;;  %4725 = vmatprep.mubr.f32.mxu0 %v8912_v38 }
 0x97a   :  { %v4565_v25 = vpop.f32.mrf.mxu1  ;;  %5926 = vmatprep.subr.msk.mxu0 %vm9130_vm0, %v9102_v52 }
 0x97b   :  { %4632 = vmatprep.mubr.f32.mxu1 %v4565_v25  ;;  %5927 = vmatpush1.msk.msra.mxu0 %vm9132_vm14, %v9102_v52  ;;  %v5083_v25 = vld [vmem:[%s8515_s4 + $0x50] sm:$0xff] }
 0x97c   :  { %4633 = vmatmul.mubr.f32.vlgmr.msra.gmra.mxu1 %v4563_v57  ;;  %v5085_v57 = vld [vmem:[%s8515_s4 + $0x60] sm:$0xf] }
 0x97d   :  { %5933 = vmatpush1.msk.msra.mxu1 %vm9128_vm6, %v9102_v52  ;;  %4876 = vmatprep.mubr.f32.mxu1 %v8912_v38  ;;  %vm9143_vm6 = vmmov %vm9142_vm12 }
 0x97e   :  { %5934 = vmatprep.subr.msk.mxu1 %vm9130_vm0, %v9102_v52  ;;  %vm9144_vm0 = vmmov %vm9143_vm6 }
 0x97f   :  { %5935 = vmatpush1.msk.msra.mxu1 %vm9132_vm14, %v9102_v52  ;;  %v4984_v52 = vld [vmem:[%s8514_s3 + $0xa0] sm:$0xff]  ;;  %vm9145_vm14 = vcmask 31744  }
 0x980   :  { %6165 = vmatprep.subr.mxu1 %v4995_v62 }
 0xa38   :  { %v6127_v7 = vpop.f32.mrf.mxu0 }
 0xa3a   :  { %v6128_v37 = vpop.f32.mrf.mxu0 }
 0xa3b   :  { %v6129_v36 = vadd.f32 %v6128_v37, %v6127_v7  ;;  %v5080_v7 = vld [vmem:[%s8515_s4 + $0x38] sm:$0xff]  ;;  %v5079_v37 = vld [vmem:[%s8515_s4 + $0x30] sm:$0xff] }
 0xa3c   :  { %v6162_v44 = vpop.f32.mrf.mxu1 }
 0xa3d   :  { %v4488_v45 = vmul.f32 0.03125, %v6129_v36  ;;  %v5078_v36 = vld [vmem:[%s8515_s4 + $0x28] sm:$0xff] }
 0xa3e   :  { %v6163_v18 = vpop.f32.mrf.mxu1 }
 0xa3f   :  { %v6164_v26 = vadd.f32 %v6163_v18, %v6162_v44  ;;  %v4639_v20 = vmul.f32 %v4488_v45, %v4488_v45  ;;  %v5077_v44 = vld [vmem:[%s8515_s4 + $0x20] sm:$0xff] }
 0xa41   :  { %v4638_v31 = vmul.f32 0.03125, %v6164_v26 }
 0xa43   :  { %v4640_v17 = vsub.f32 %v4638_v31, %v4639_v20 }
 0xa45   :  { %v4641_v3 = vadd.f32 1e-05, %v4640_v17 }
 0xa47   :  { %6311 = vrsqrt.f32 %v4641_v3 }
 0xa54   :  { %v6312_v33 = vpop.eup %6311 }
 0xa55   :  { %v4649_v9 = vmul.f32 %v6312_v33, %v5922_v4  ;;  %v5076_v33 = vld [vmem:[%s8515_s4 + $0x18] sm:$0xff] }
 0xa57   :  { %5928 = vmatmul.mubr.msk.f32.vlgmr.msra.gmra.mxu0 %vm9133_vm8, %v4649_v9  ;;  %v4650_v63 = vmul.f32 %v4649_v9, %v4488_v45  ;;  %v5075_v9 = vld [vmem:[%s8515_s4 + $0x10] sm:$0xff]  ;;  %vm9146_vm8 = vmmov %vm9145_vm14 }
 0xa58   :  { %4802 = vmatprep.mubr.f32.mxu0 %v8912_v38 }
 0xa59   :  { %v4657_v58 = vsub.f32 %v5923_v47, %v4650_v63  ;;  %v5940_v63 = vld [vmem:[#allocation16] ss:$0 sm:$0xff] }
 0xa5b   :  { %5936 = vmatmul.mubr.msk.f32.vlgmr.msra.gmra.mxu1 %vm9134_vm10, %v4657_v58  ;;  %vm9147_vm10 = vmmov %vm9135_vm2 }
 0xa5c   :  { %6166 = vmatpush3.msra.mxu1 %v4979_v6 }
 0xa5d   :  { %6167 = vmatprep.subr.mxu1 %v4994_v23  ;;  %v5173_v23 = vadd.s32 2, %v9124_v15  ;;  %v5254_v15 = vld [vmem:[%s8516_s5 + $0x8] sm:$0x3] }
 0xa5e   :  { %6168 = vmatpush3.msra.mxu1 %v4978_v21  ;;  %v5941_v21 = vld [vmem:[#allocation17] ss:$0 sm:$0xff] }
 0xa5f   :  { %6169 = vmatprep.subr.mxu1 %v4993_v30  ;;  %vm5174_vm7 = vcmp.eq.s32.totalorder %v9122_v54, %v5173_v23 }
 0xa60   :  { %6170 = vmatpush3.msra.mxu1 %v4977_v48 }
 0xa61   :  { %6171 = vmatprep.subr.mxu1 %v4992_v55  ;;  %v5944_v55 = vsel %vm5170_vm1, 1.0, %v8912_v38 }
 0xa62   :  { %6172 = vmatpush3.msra.mxu1 %v4976_v12  ;;  %v5945_v12 = vsel %vm5174_vm7, 1.0, %v8912_v38 }
 0xa63   :  { %6173 = vmatprep.subr.mxu1 %v4991_v19 }
 0xa64   :  { %6174 = vmatpush3.msra.mxu1 %v4975_v16  ;;  %v5329_v16 = vld [vmem:[%s8517_s6 + $0x8] sm:$0x3] }
 0xa65   :  { %6175 = vmatprep.subr.mxu1 %v4990_v60  ;;  %v5328_v60 = vld [vmem:[%s8517_s6] sm:$0xff] }
 0xa66   :  { %6176 = vmatpush3.msra.mxu1 %v4974_v14  ;;  %v5253_v14 = vld [vmem:[%s8516_s5] sm:$0xff]  ;;  %s6586_s5 = smov [#allocation20]  }
 0xa67   :  { %6177 = vmatprep.subr.mxu1 %v4989_v8  ;;  %s5521_s6 = sshll.u32 %s6586_s5, 4  ;;  %s5522_s6 = int_to_ptr.vmem [resolvable:$true] %s5521_s6 }
 0xa68   :  { %6178 = vmatpush3.msra.mxu1 %v4973_v40  ;;  %s6534_s13 = scalar_lea.vmem %s5522_s6, 32  ;;  %p6539_p0 = scmp.lt.s32.totalorder %s5522_s6, %s5522_s6 }
 0xa69   :  { %6179 = vmatprep.subr.mxu1 %v4988_v34  ;;  %p6535_p13 = scmp.ne.s32.totalorder %s5522_s6, %s6534_s13  ;;  %p6540_p1 = scmp.lt.s32.totalorder %s6534_s13, %s6534_s13 }
 0xa6a   :  { %6180 = vmatpush3.msra.mxu1 %v4972_v35 }
 0xa6b   :  { %6181 = vmatprep.subr.mxu1 %v4987_v56  ;;  %p6541_p2 = por %p6540_p1, %p6539_p0 }
 0xa6c   :  { %6182 = vmatpush3.msra.mxu1 %v4971_v27 }
 0xa6d   :  { %6183 = vmatprep.subr.mxu1 %v4986_v0  ;;  %p6542_p3 = pnand %p6541_p2, %p6535_p13 }
 0xa6e   :  { %6184 = vmatpush3.msra.mxu1 %v4970_v28 }
 0xa6f   :  { %6185 = vmatprep.subr.mxu1 %v4985_v41 }
 0xa70   :  { %6186 = vmatpush3.msra.mxu1 %v4969_v1 }
 0xa71   :  { %6187 = vmatprep.subr.mxu1 %v4984_v52 }
 0xa72   :  { %6188 = vmatpush3.msra.mxu1 %v4968_v49 }
 0xa73   :  { %6189 = vmatprep.subr.mxu1 %v4983_v50 }
 0xa74   :  { %6190 = vmatpush3.msra.mxu1 %v4967_v53 }
 0xa75   :  { %6191 = vmatprep.subr.mxu1 %v4982_v13 }
 0xa76   :  { %6192 = vmatpush3.msra.mxu1 %v4966_v22 }
 0xa77   :  { %6193 = vmatprep.subr.mxu1 %v4981_v24 }
 0xa78   :  { %6194 = vmatpush3.msra.mxu1 %v4965_v42 }
 0xa79   :  { %6195 = vmatprep.subr.mxu1 %v4980_v32 }
 0xa7a   :  { %6196 = vmatpush3.msra.mxu1 %v4964_v51 }
 0xa7b   :  { %6258 = vmatprep.subr.mxu1 %v8912_v38 }
 0xb17   :  { %v4727_v29 = vpop.f32.mrf.mxu0 }
 0xb19   :  { %v4729_v43 = vpop.f32.mrf.mxu0 }
 0xb1a   :  { %5929 = vmatprep.subr.msk.mxu0 %vm9135_vm2, %v4729_v43 }
 0xb1b   :  { %5930 = vmatpush1.msk.msra.mxu0 %vm9136_vm3, %v4727_v29  ;;  %v4878_v2 = vpop.f32.mrf.mxu1  ;;  %vm5330_vm3 = vcmask 80896  }
 0xb1c   :  { %5931 = vmatmul.mubr.msk.f32.vlgmr.msra.gmra.mxu0 %vm9138_vm15, %v9137_v5  ;;  %vm5491_vm15 = vcmask 9216  }
 0xb1d   :  { %v4880_v59 = vpop.f32.mrf.mxu1  ;;  %4953 = vmatprep.mubr.f32.mxu0 %v8912_v38 }
 0xb1e   :  { %5937 = vmatprep.subr.msk.mxu0 %vm9139_vm5, %v4880_v59 }
 0xb1f   :  { %5938 = vmatpush1.msk.msra.mxu0 %vm9140_vm9, %v4878_v2 }
 0xb20   :  { %5939 = vmatmul.mubr.msk.f32.vlgmr.msra.gmra.mxu0 %vm9141_vm11, %v9137_v5  ;;  %6224 = vmatprep.subr.mxu0 %v8912_v38 }
 0xb21   :  { %6225 = vmatpush3.msk.msra.mxu0 %vm9142_vm12, %v5085_v57  ;;  %6250 = vmatprep.mubr.msk.f32.mxu0 %vm6585_vm13, %v8912_v38 }
 0xb22   :  { %6226 = vmatprep.subr.mxu0 %v8912_v38 }
 0xb23   :  { %6227 = vmatpush3.msra.mxu0 %v5084_v11 }
 0xb24   :  { %6228 = vmatprep.subr.mxu0 %v8912_v38 }
 0xb25   :  { %6229 = vmatpush3.msra.mxu0 %v5083_v25 }
 0xb26   :  { %6230 = vmatprep.subr.mxu0 %v8912_v38 }
 0xb27   :  { %6231 = vmatpush3.msra.mxu0 %v5082_v10 }
 0xb28   :  { %6232 = vmatprep.subr.mxu0 %v8912_v38 }
 0xb29   :  { %6233 = vmatpush3.msra.mxu0 %v5081_v61 }
 0xb2a   :  { %6234 = vmatprep.subr.mxu0 %v8912_v38 }
 0xb2b   :  { %6235 = vmatpush3.msra.mxu0 %v5080_v7 }
 0xb2c   :  { %6236 = vmatprep.subr.mxu0 %v8912_v38 }
 0xb2d   :  { %6237 = vmatpush3.msra.mxu0 %v5079_v37 }
 0xb2e   :  { %6238 = vmatprep.subr.mxu0 %v8912_v38 }
 0xb2f   :  { %6239 = vmatpush3.msra.mxu0 %v5078_v36 }
 0xb30   :  { %6240 = vmatprep.subr.mxu0 %v8912_v38 }
 0xb31   :  { %6241 = vmatpush3.msra.mxu0 %v5077_v44 }
 0xb32   :  { %6242 = vmatprep.subr.mxu0 %v8912_v38 }
 0xb33   :  { %6243 = vmatpush3.msra.mxu0 %v5076_v33 }
 0xb34   :  { %6244 = vmatprep.subr.mxu0 %v8912_v38 }
 0xb35   :  { %6245 = vmatpush3.msra.mxu0 %v5075_v9 }
 0xb36   :  { %6246 = vmatprep.subr.mxu0 %v8912_v38 }
 0xbdc   :  { %v4804_v45 = vpop.f32.mrf.mxu0 }
 0xbdd   :  { %v4960_v31 = vmul.f32 %v4804_v45, %v8156_v46  ;;  %v5074_v46 = vld [vmem:[%s8515_s4 + $0x8] sm:$0xff] }
 0xbde   :  { %v4806_v18 = vpop.f32.mrf.mxu0  ;;  %6247 = vmatpush3.msra.mxu0 %v5074_v46 }
 0xbdf   :  { %v4961_v20 = vmul.f32 %v4806_v18, %v8158_v39  ;;  %6248 = vmatprep.subr.mxu0 %v8912_v38  ;;  %v5073_v39 = vld [vmem:[%s8515_s4] sm:$0xff] }
 0xbe0   :  { %v4955_v26 = vpop.f32.mrf.mxu0  ;;  %6249 = vmatpush3.msra.mxu0 %v5073_v39 }
 0xbe1   :  { %v4962_v4 = vadd.f32 %v4960_v31, %v4955_v26  ;;  %6253 = vmatprep.subr.mxu0 %v8912_v38 }
 0xbe2   :  { %v4957_v17 = vpop.f32.mrf.mxu0 }
 0xbe3   :  { %v4963_v3 = vadd.f32 %v4961_v20, %v4957_v17 }
 0xbe5   :  { %5067 = vmatprep.mubr.f32.mxu1 %v4963_v3 }
 0xbe6   :  { %5068 = vmatmul.mubr.f32.vlgmr.msra.gmra.mxu1 %v4962_v4 }
 0xbe7   :  { %6260 = vmatprep.mubr.msk.f32.mxu1 %vm6585_vm13, %v8912_v38 }
 0xca6   :  { %v6197_v47 = vpop.f32.mrf.mxu1 }
 0xca8   :  { %v6198_v58 = vpop.f32.mrf.mxu1 }
 0xca9   :  { %v6199_v62 = vadd.f32 %v6198_v58, %v6197_v47 }
 0xcab   :  { %v5070_v6 = vadd.f32 %v6199_v62, %v5940_v63 }
 0xcad   :  { %6251 = vmatmul.mubr.msk.f32.vlgmr.msra.gmra.mxu0 %vm5093_vm4, %v5070_v6 }
 0xcae   :  { %6255 = vmatprep.mubr.msk.f32.mxu0 %vm6585_vm13, %v8912_v38 }
 0xd6d   :  { %v5166_v30 = vpop.f32.mrf.mxu0 }
 0xd6e   :  { %v5167_v48 = vadd.f32 %v5941_v21, %v5166_v30 }
 0xd6f   :  { %v6252_v19 = vpop.f32.mrf.mxu0 }
 0xd70   :  { %6254 = vmatpush3.msk.msra.mxu0 %vm9143_vm6, %v5167_v48  ;;  %6259 = vmatpush3.msk.msra.mxu1 %vm9144_vm0, %v5167_v48 }
 0xd71   :  { %6256 = vmatmul.mubr.msk.f32.vlgmr.msra.gmra.mxu0 %vm9145_vm14, %v5944_v55  ;;  %6261 = vmatmul.mubr.msk.f32.vlgmr.msra.gmra.mxu1 %vm9146_vm8, %v5945_v12 }
 0xd72   :  { %6263 = vmatprep.subr.mxu0 %v8912_v38  ;;  %6270 = vmatprep.subr.mxu1 %v8912_v38 }
 0xd73   :  { %6264 = vmatpush3.msk.msra.mxu0 %vm9147_vm10, %v5329_v16  ;;  %6271 = vmatpush3.msk.msra.mxu1 %vm9135_vm2, %v5254_v15 }
 0xd74   :  { %6265 = vmatprep.subr.mxu0 %v8912_v38  ;;  %6272 = vmatprep.subr.mxu1 %v8912_v38 }
 0xd75   :  { %6267 = vmatprep.mubr.msk.f32.mxu0 %vm6585_vm13, %v8912_v38  ;;  %6274 = vmatprep.mubr.msk.f32.mxu1 %vm6585_vm13, %v8912_v38  ;;  %v5954_v38 = vld [vmem:[#allocation19] ss:$0 sm:$0xff] }
 0xd76   :  { %6266 = vmatpush3.msra.mxu0 %v5328_v60  ;;  %6273 = vmatpush3.msra.mxu1 %v5253_v14 }
 0xe31   :  { %v5249_v8 = vpop.f32.mrf.mxu0  ;;  %v5324_v40 = vpop.f32.mrf.mxu1 }
 0xe32   :  { %6268 = vmatmul.mubr.msk.f32.vlgmr.msra.gmra.mxu0 %vm5330_vm3, %v5324_v40  ;;  %6275 = vmatmul.mubr.msk.f32.vlgmr.msra.gmra.mxu1 %vm5330_vm3, %v5249_v8 }
 0xe33   :  { %v6257_v34 = vpop.f32.mrf.mxu0  ;;  %v6262_v35 = vpop.f32.mrf.mxu1 }
 0xef2   :  { %v5403_v56 = vpop.f32.mrf.mxu0  ;;  %v5479_v27 = vpop.f32.mrf.mxu1 }
 0xef3   :  { %v5480_v0 = vadd.f32 %v5479_v27, %v5403_v56 }
 0xef4   :  { %v6269_v28 = vpop.f32.mrf.mxu0  ;;  %v6276_v41 = vpop.f32.mrf.mxu1 }
 0xef5   :  { %v5490_v1 = vadd.f32 %v5954_v38, %v5480_v0 }
 0xef7   :  { %v5493_v29 = vsel %vm5491_vm15, %v5490_v1, -inf  ;;  %5492 = vst.msk [vmem:[#allocation20] sm:$0x3] %vm5491_vm15, %v5490_v1 }
 0xef8   :  { %5494 = vmax.xlane.f32.xlu0 %v5493_v29 }
 0xf81   :  { %v5495_v43 = vpop.xlane.xlu0 %5494 }
 0xf82   :  { %vm5496_vm5 = vcmp.eq.f32.partialorder %v5490_v1, %v5495_v43 }
 0xf83   :  { %v5497_v2 = vsel %vm5496_vm5, %v9122_v54, 2 }
 0xf84   :  { %v5498_v5 = vsel %vm5491_vm15, %v5497_v2, 2147483647 }
 0xf85   :  { %v5500_v59 = vshra.s32 %v5498_v5, 16  ;;  %v5499_v49 = vand.u32 65535, %v5498_v5 }
 0xf87   :  { %v5502_v52 = vcvt.s32.f32 %v5500_v59  ;;  %v5501_v53 = vcvt.s32.f32 %v5499_v49 }
 0xf89   :  { %5503 = vmin.xlane.f32.xlu0 %v5502_v52 }
0x1012   :  { %v5504_v50 = vpop.xlane.xlu0 %5503 }
0x1013   :  { %vm5505_vm9 = vcmp.eq.f32.partialorder %v5502_v52, %v5504_v50 }
0x1014   :  { %v5506_v13 = vsel %vm5505_vm9, %v5501_v53, inf }
0x1015   :  { %5507 = vmin.xlane.f32.xlu1 %v5506_v13 }
0x1016   :  { %6545 = shalt.err (!%p6542_p3)
}
0x1017   :  { %5524 = dma.vmem_to_hbm [thread:$0]  %s5522_s6, 32, %s8527_s16, [#allocation4]   ;;  %v5510_v54 = vcvt.f32.s32 %v5504_v50  ;;  %vm5513_vm11 = vcmask 1024  }
0x1019   :  { %v5511_v24 = vshll.u32 %v5510_v54, 16 }
0x109e   :  { %v5508_v22 = vpop.xlane.xlu1 %5507 }
0x109f   :  { %v5509_v42 = vcvt.f32.s32 %v5508_v22 }
0x10a1   :  { %v5512_v32 = vadd.s32 %v5511_v24, %v5509_v42 }
0x10a3   :  { %5514 = vst.msk [vmem:[%s8528_s17] sm:$0x3] %vm5513_vm11, %v5512_v32 }
0x10a4   :  { %6566 = dma.done.wait [#allocation4], 32  }
0x10a5   :  { %6567 = vsyncadd [#allocation4], 4294967264 }
0x10a6   :  { %5532 = vsyncpa [#allocation3], 1 }
0x10a7   :  { %5533 = vsyncpa [#allocation6], 1 }
0x10a8   :  { %5534 = vsyncpa [#allocation9], 1 }
0x10a9   :  { %5535 = vsyncpa [#allocation12], 1 }
0x10aa   :  { %5536 = vsyncpa [#allocation15], 1 }
0x10ab   :  { %5537 = vsyncpa [#allocation18], 1 }
0x10ac   :  { %5538 = vsyncpa [#allocation4], 1 }

</bundles_post_ra>
